<compile_context>
chip_gen: v7x
topology: tpu7x:2x2x1
jax: 0.10.0
libtpu: 0.0.40
codegen_flags: <defaults>
</compile_context>

<pallas_src>
import functools

import jax
import jax.numpy as jnp
from jax.experimental import pallas as pl
from jax.experimental.pallas import tpu as pltpu

# Static conv hyper-parameters (from nn.Conv2d(3, 6, kernel_size=3, stride=1, padding=0))
CIN = 3
COUT = 6
KH = 3
KW = 3


def _round_up(x, m):
    return ((x + m - 1) // m) * m


def _conv2d_kernel(x_ref, wb_ref, o_ref, *, in_w, n_chunks):
    """VPU conv, batch-on-sublanes / spatial-on-lanes layout, scalar weights in SMEM.

    x_ref : (CIN, NB, HW_PAD)            f32  VMEM -- H*W flattened on lanes.
    wb_ref: (KH*KW*CIN*COUT + COUT,)     f32  SMEM -- tap-major flat weights, then bias.
    o_ref : (COUT, NB, HW_PAD)           f32  VMEM -- "wide" conv output; positions with
            h >= Hout or w >= Wout are garbage and are sliced off in the wrapper.
    """
    hw = x_ref.shape[2]
    bias_base = KH * KW * CIN * COUT

    # Loop over 8-image sub-chunks so the live accumulator stays small
    # (COUT * 1 sublane-slab = ~12 vregs) no matter how large the batch block is.
    for chunk in range(n_chunks):
        rows = pl.ds(chunk * 8, 8)
        x = x_ref[:, rows, :]                                  # (CIN, 8, HW_PAD)

        # Bias folded into the accumulator init: one (8, HW_PAD) slab per out-channel.
        acc = [jnp.full((8, hw), wb_ref[bias_base + co], jnp.float32)
               for co in range(COUT)]

        for kh in range(KH):
            for kw in range(KW):
                shift = kh * in_w + kw
                # xs[c, n, p] = x[c, n, (p + shift) % hw]: lane roll (XLU) of the whole
                # 6-vreg chunk implements the (kh, kw) window shift; the wrap-around
                # only contaminates output positions the wrapper discards.
                xs = pltpu.roll(x, shift=hw - shift, axis=2) if shift else x
                for ci in range(CIN):
                    xc = xs[ci]                                # (8, HW_PAD)
                    for co in range(COUT):
                        widx = ((kh * KW + kw) * CIN + ci) * COUT + co
                        # scalar-weight x full-vreg FMA on the VPU (no broadcasts).
                        acc[co] = acc[co] + wb_ref[widx] * xc

        for co in range(COUT):
            o_ref[co, rows, :] = acc[co]                       # full-lane stores


def conv2d_pallas(x_nchw, w_oihw, bias):
    """x_nchw: (N, Cin, H, W) f32; w_oihw: (Cout, Cin, KH, KW) f32; bias: (Cout,) f32."""
    n, cin, h, w = x_nchw.shape
    cout, _, kh_dim, kw_dim = w_oihw.shape
    hout = h - kh_dim + 1
    wout = w - kw_dim + 1

    hw = h * w
    hw_pad = _round_up(hw, 128)                  # lane-dense spatial axis

    # Batch blocking: 8-image sub-chunks inside the kernel; up to 8 chunks (64 images)
    # per grid step, while keeping >= 2 grid steps when the batch allows it so the
    # "parallel" batch axis can be split across both v7x TensorCores.
    n8 = _round_up(max(n, 1), 8)
    total_chunks = n8 // 8
    if total_chunks <= 1:
        chunks_per_block = 1
    else:
        chunks_per_block = min(8, max(1, total_chunks // 2))
    nb = chunks_per_block * 8
    n_pad = _round_up(n8, nb)
    grid = n_pad // nb

    # Layout-only glue: NCHW -> (CIN, N_pad, HW_pad); batch on sublanes, spatial lanes.
    x_cnhw = jnp.transpose(x_nchw.reshape(n, cin, hw), (1, 0, 2))
    if (n_pad, hw_pad) != (n, hw):
        x_cnhw = jnp.pad(x_cnhw, ((0, 0), (0, n_pad - n), (0, hw_pad - hw)))

    # Flat scalar parameters for SMEM: (KH, KW, CIN, COUT) tap-major weights, then bias.
    w_flat = jnp.transpose(w_oihw, (2, 3, 1, 0)).reshape(-1).astype(jnp.float32)
    wb = jnp.concatenate([w_flat, bias.astype(jnp.float32)])

    kernel = functools.partial(_conv2d_kernel, in_w=w, n_chunks=chunks_per_block)

    out_wide = pl.pallas_call(
        kernel,
        out_shape=jax.ShapeDtypeStruct((cout, n_pad, hw_pad), jnp.float32),
        grid_spec=pltpu.PrefetchScalarGridSpec(
            num_scalar_prefetch=0,
            grid=(grid,),
            in_specs=[
                pl.BlockSpec((cin, nb, hw_pad), lambda i: (0, i, 0)),
                pl.BlockSpec(memory_space=pltpu.MemorySpace.SMEM),   # scalar weights
            ],
            out_specs=pl.BlockSpec((cout, nb, hw_pad), lambda i: (0, i, 0)),
        ),
        compiler_params=pltpu.CompilerParams(
            dimension_semantics=("parallel",),
        ),
    )(x_cnhw, wb)

    # (COUT, N_pad, HW_pad) -> NCHW: drop padding, unflatten spatial, keep valid region.
    out = jnp.transpose(out_wide[:, :n, :hw], (1, 0, 2)).reshape(n, cout, h, w)
    return out[:, :, :hout, :wout]


if __name__ == "__main__":
    key = jax.random.PRNGKey(0)
    kx, kw_key, kb = jax.random.split(key, 3)

    # Deterministic synthetic parameters (Conv2d(3, 6, 3) shapes).
    fan_in = CIN * KH * KW
    bound = 1.0 / (fan_in ** 0.5)
    weight = jax.random.uniform(kw_key, (COUT, CIN, KH, KW), jnp.float32, -bound, bound)
    bias = jax.random.uniform(kb, (COUT,), jnp.float32, -bound, bound)

    # Small input consistent with the module: batch=2, channels=3, spatial=16.
    x = jax.random.normal(kx, (2, CIN, 16, 16), jnp.float32)

    out = conv2d_pallas(x, weight, bias)
    out = jax.block_until_ready(out)

    # Reference check with XLA's conv (NCHW / OIHW, VALID padding).
    ref = jax.lax.conv_general_dilated(
        x, weight, window_strides=(1, 1), padding="VALID",
        dimension_numbers=("NCHW", "OIHW", "NCHW"),
    ) + bias[None, :, None, None]
    assert out.shape == (2, COUT, 14, 14)
    assert jnp.max(jnp.abs(out - ref)) < 1e-4

    print("KERNEL_OK")
</pallas_src>

<mosaic_0001>
module attributes {stable_mosaic.version = 11 : i64} {
  func.func @_conv2d_kernel(%arg0: i32, %arg1: memref<3x8x256xf32, #tpu.memory_space<vmem>>, %arg2: memref<168xf32, #tpu.memory_space<smem>>, %arg3: memref<6x8x256xf32, #tpu.memory_space<vmem>>) attributes {dimension_semantics = [#tpu.dimension_semantics<parallel>], iteration_bounds = array<i64: 1>, scalar_prefetch = 0 : i64, scratch_operands = 0 : i64, tpu.core_type = #tpu.core_type<tc>, window_params = [{transform_indices = @transform_0, window_bounds = array<i64: 3, 8, 256>}, {transform_indices = @transform_1, window_bounds = array<i64: 168>}, {transform_indices = @transform_2, window_bounds = array<i64: 6, 8, 256>}]} {
    %c0 = arith.constant 0 : index
    %c0_0 = arith.constant 0 : index
    %c0_1 = arith.constant 0 : index
    %0 = vector.load %arg1[%c0, %c0_0, %c0_1] : memref<3x8x256xf32, #tpu.memory_space<vmem>>, vector<3x8x256xf32>
    %c162 = arith.constant 162 : index
    %1 = memref.load %arg2[%c162] : memref<168xf32, #tpu.memory_space<smem>>
    %2 = vector.broadcast %1 : f32 to vector<8x256xf32>
    %c163 = arith.constant 163 : index
    %3 = memref.load %arg2[%c163] : memref<168xf32, #tpu.memory_space<smem>>
    %4 = vector.broadcast %3 : f32 to vector<8x256xf32>
    %c164 = arith.constant 164 : index
    %5 = memref.load %arg2[%c164] : memref<168xf32, #tpu.memory_space<smem>>
    %6 = vector.broadcast %5 : f32 to vector<8x256xf32>
    %c165 = arith.constant 165 : index
    %7 = memref.load %arg2[%c165] : memref<168xf32, #tpu.memory_space<smem>>
    %8 = vector.broadcast %7 : f32 to vector<8x256xf32>
    %c166 = arith.constant 166 : index
    %9 = memref.load %arg2[%c166] : memref<168xf32, #tpu.memory_space<smem>>
    %10 = vector.broadcast %9 : f32 to vector<8x256xf32>
    %c167 = arith.constant 167 : index
    %11 = memref.load %arg2[%c167] : memref<168xf32, #tpu.memory_space<smem>>
    %12 = vector.broadcast %11 : f32 to vector<8x256xf32>
    %13 = vector.extract_strided_slice %0 {offsets = [0, 0, 0], sizes = [1, 8, 256], strides = [1, 1, 1]} : vector<3x8x256xf32> to vector<1x8x256xf32>
    %14 = vector.shape_cast %13 : vector<1x8x256xf32> to vector<8x256xf32>
    %c0_2 = arith.constant 0 : index
    %15 = memref.load %arg2[%c0_2] : memref<168xf32, #tpu.memory_space<smem>>
    %16 = vector.broadcast %15 : f32 to vector<8x256xf32>
    %17 = arith.mulf %16, %14 : vector<8x256xf32>
    %18 = arith.addf %2, %17 : vector<8x256xf32>
    %c1 = arith.constant 1 : index
    %19 = memref.load %arg2[%c1] : memref<168xf32, #tpu.memory_space<smem>>
    %20 = vector.broadcast %19 : f32 to vector<8x256xf32>
    %21 = arith.mulf %20, %14 : vector<8x256xf32>
    %22 = arith.addf %4, %21 : vector<8x256xf32>
    %c2 = arith.constant 2 : index
    %23 = memref.load %arg2[%c2] : memref<168xf32, #tpu.memory_space<smem>>
    %24 = vector.broadcast %23 : f32 to vector<8x256xf32>
    %25 = arith.mulf %24, %14 : vector<8x256xf32>
    %26 = arith.addf %6, %25 : vector<8x256xf32>
    %c3 = arith.constant 3 : index
    %27 = memref.load %arg2[%c3] : memref<168xf32, #tpu.memory_space<smem>>
    %28 = vector.broadcast %27 : f32 to vector<8x256xf32>
    %29 = arith.mulf %28, %14 : vector<8x256xf32>
    %30 = arith.addf %8, %29 : vector<8x256xf32>
    %c4 = arith.constant 4 : index
    %31 = memref.load %arg2[%c4] : memref<168xf32, #tpu.memory_space<smem>>
    %32 = vector.broadcast %31 : f32 to vector<8x256xf32>
    %33 = arith.mulf %32, %14 : vector<8x256xf32>
    %34 = arith.addf %10, %33 : vector<8x256xf32>
    %c5 = arith.constant 5 : index
    %35 = memref.load %arg2[%c5] : memref<168xf32, #tpu.memory_space<smem>>
    %36 = vector.broadcast %35 : f32 to vector<8x256xf32>
    %37 = arith.mulf %36, %14 : vector<8x256xf32>
    %38 = arith.addf %12, %37 : vector<8x256xf32>
    %39 = vector.extract_strided_slice %0 {offsets = [1, 0, 0], sizes = [1, 8, 256], strides = [1, 1, 1]} : vector<3x8x256xf32> to vector<1x8x256xf32>
    %40 = vector.shape_cast %39 : vector<1x8x256xf32> to vector<8x256xf32>
    %c6 = arith.constant 6 : index
    %41 = memref.load %arg2[%c6] : memref<168xf32, #tpu.memory_space<smem>>
    %42 = vector.broadcast %41 : f32 to vector<8x256xf32>
    %43 = arith.mulf %42, %40 : vector<8x256xf32>
    %44 = arith.addf %18, %43 : vector<8x256xf32>
    %c7 = arith.constant 7 : index
    %45 = memref.load %arg2[%c7] : memref<168xf32, #tpu.memory_space<smem>>
    %46 = vector.broadcast %45 : f32 to vector<8x256xf32>
    %47 = arith.mulf %46, %40 : vector<8x256xf32>
    %48 = arith.addf %22, %47 : vector<8x256xf32>
    %c8 = arith.constant 8 : index
    %49 = memref.load %arg2[%c8] : memref<168xf32, #tpu.memory_space<smem>>
    %50 = vector.broadcast %49 : f32 to vector<8x256xf32>
    %51 = arith.mulf %50, %40 : vector<8x256xf32>
    %52 = arith.addf %26, %51 : vector<8x256xf32>
    %c9 = arith.constant 9 : index
    %53 = memref.load %arg2[%c9] : memref<168xf32, #tpu.memory_space<smem>>
    %54 = vector.broadcast %53 : f32 to vector<8x256xf32>
    %55 = arith.mulf %54, %40 : vector<8x256xf32>
    %56 = arith.addf %30, %55 : vector<8x256xf32>
    %c10 = arith.constant 10 : index
    %57 = memref.load %arg2[%c10] : memref<168xf32, #tpu.memory_space<smem>>
    %58 = vector.broadcast %57 : f32 to vector<8x256xf32>
    %59 = arith.mulf %58, %40 : vector<8x256xf32>
    %60 = arith.addf %34, %59 : vector<8x256xf32>
    %c11 = arith.constant 11 : index
    %61 = memref.load %arg2[%c11] : memref<168xf32, #tpu.memory_space<smem>>
    %62 = vector.broadcast %61 : f32 to vector<8x256xf32>
    %63 = arith.mulf %62, %40 : vector<8x256xf32>
    %64 = arith.addf %38, %63 : vector<8x256xf32>
    %65 = vector.extract_strided_slice %0 {offsets = [2, 0, 0], sizes = [1, 8, 256], strides = [1, 1, 1]} : vector<3x8x256xf32> to vector<1x8x256xf32>
    %66 = vector.shape_cast %65 : vector<1x8x256xf32> to vector<8x256xf32>
    %c12 = arith.constant 12 : index
    %67 = memref.load %arg2[%c12] : memref<168xf32, #tpu.memory_space<smem>>
    %68 = vector.broadcast %67 : f32 to vector<8x256xf32>
    %69 = arith.mulf %68, %66 : vector<8x256xf32>
    %70 = arith.addf %44, %69 : vector<8x256xf32>
    %c13 = arith.constant 13 : index
    %71 = memref.load %arg2[%c13] : memref<168xf32, #tpu.memory_space<smem>>
    %72 = vector.broadcast %71 : f32 to vector<8x256xf32>
    %73 = arith.mulf %72, %66 : vector<8x256xf32>
    %74 = arith.addf %48, %73 : vector<8x256xf32>
    %c14 = arith.constant 14 : index
    %75 = memref.load %arg2[%c14] : memref<168xf32, #tpu.memory_space<smem>>
    %76 = vector.broadcast %75 : f32 to vector<8x256xf32>
    %77 = arith.mulf %76, %66 : vector<8x256xf32>
    %78 = arith.addf %52, %77 : vector<8x256xf32>
    %c15 = arith.constant 15 : index
    %79 = memref.load %arg2[%c15] : memref<168xf32, #tpu.memory_space<smem>>
    %80 = vector.broadcast %79 : f32 to vector<8x256xf32>
    %81 = arith.mulf %80, %66 : vector<8x256xf32>
    %82 = arith.addf %56, %81 : vector<8x256xf32>
    %c16 = arith.constant 16 : index
    %83 = memref.load %arg2[%c16] : memref<168xf32, #tpu.memory_space<smem>>
    %84 = vector.broadcast %83 : f32 to vector<8x256xf32>
    %85 = arith.mulf %84, %66 : vector<8x256xf32>
    %86 = arith.addf %60, %85 : vector<8x256xf32>
    %c17 = arith.constant 17 : index
    %87 = memref.load %arg2[%c17] : memref<168xf32, #tpu.memory_space<smem>>
    %88 = vector.broadcast %87 : f32 to vector<8x256xf32>
    %89 = arith.mulf %88, %66 : vector<8x256xf32>
    %90 = arith.addf %64, %89 : vector<8x256xf32>
    %c255_i32 = arith.constant 255 : i32
    %91 = tpu.dynamic_rotate %0 by %c255_i32 dim 2 : vector<3x8x256xf32>, i32 -> vector<3x8x256xf32>
    %92 = vector.extract_strided_slice %91 {offsets = [0, 0, 0], sizes = [1, 8, 256], strides = [1, 1, 1]} : vector<3x8x256xf32> to vector<1x8x256xf32>
    %93 = vector.shape_cast %92 : vector<1x8x256xf32> to vector<8x256xf32>
    %c18 = arith.constant 18 : index
    %94 = memref.load %arg2[%c18] : memref<168xf32, #tpu.memory_space<smem>>
    %95 = vector.broadcast %94 : f32 to vector<8x256xf32>
    %96 = arith.mulf %95, %93 : vector<8x256xf32>
    %97 = arith.addf %70, %96 : vector<8x256xf32>
    %c19 = arith.constant 19 : index
    %98 = memref.load %arg2[%c19] : memref<168xf32, #tpu.memory_space<smem>>
    %99 = vector.broadcast %98 : f32 to vector<8x256xf32>
    %100 = arith.mulf %99, %93 : vector<8x256xf32>
    %101 = arith.addf %74, %100 : vector<8x256xf32>
    %c20 = arith.constant 20 : index
    %102 = memref.load %arg2[%c20] : memref<168xf32, #tpu.memory_space<smem>>
    %103 = vector.broadcast %102 : f32 to vector<8x256xf32>
    %104 = arith.mulf %103, %93 : vector<8x256xf32>
    %105 = arith.addf %78, %104 : vector<8x256xf32>
    %c21 = arith.constant 21 : index
    %106 = memref.load %arg2[%c21] : memref<168xf32, #tpu.memory_space<smem>>
    %107 = vector.broadcast %106 : f32 to vector<8x256xf32>
    %108 = arith.mulf %107, %93 : vector<8x256xf32>
    %109 = arith.addf %82, %108 : vector<8x256xf32>
    %c22 = arith.constant 22 : index
    %110 = memref.load %arg2[%c22] : memref<168xf32, #tpu.memory_space<smem>>
    %111 = vector.broadcast %110 : f32 to vector<8x256xf32>
    %112 = arith.mulf %111, %93 : vector<8x256xf32>
    %113 = arith.addf %86, %112 : vector<8x256xf32>
    %c23 = arith.constant 23 : index
    %114 = memref.load %arg2[%c23] : memref<168xf32, #tpu.memory_space<smem>>
    %115 = vector.broadcast %114 : f32 to vector<8x256xf32>
    %116 = arith.mulf %115, %93 : vector<8x256xf32>
    %117 = arith.addf %90, %116 : vector<8x256xf32>
    %118 = vector.extract_strided_slice %91 {offsets = [1, 0, 0], sizes = [1, 8, 256], strides = [1, 1, 1]} : vector<3x8x256xf32> to vector<1x8x256xf32>
    %119 = vector.shape_cast %118 : vector<1x8x256xf32> to vector<8x256xf32>
    %c24 = arith.constant 24 : index
    %120 = memref.load %arg2[%c24] : memref<168xf32, #tpu.memory_space<smem>>
    %121 = vector.broadcast %120 : f32 to vector<8x256xf32>
    %122 = arith.mulf %121, %119 : vector<8x256xf32>
    %123 = arith.addf %97, %122 : vector<8x256xf32>
    %c25 = arith.constant 25 : index
    %124 = memref.load %arg2[%c25] : memref<168xf32, #tpu.memory_space<smem>>
    %125 = vector.broadcast %124 : f32 to vector<8x256xf32>
    %126 = arith.mulf %125, %119 : vector<8x256xf32>
    %127 = arith.addf %101, %126 : vector<8x256xf32>
    %c26 = arith.constant 26 : index
    %128 = memref.load %arg2[%c26] : memref<168xf32, #tpu.memory_space<smem>>
    %129 = vector.broadcast %128 : f32 to vector<8x256xf32>
    %130 = arith.mulf %129, %119 : vector<8x256xf32>
    %131 = arith.addf %105, %130 : vector<8x256xf32>
    %c27 = arith.constant 27 : index
    %132 = memref.load %arg2[%c27] : memref<168xf32, #tpu.memory_space<smem>>
    %133 = vector.broadcast %132 : f32 to vector<8x256xf32>
    %134 = arith.mulf %133, %119 : vector<8x256xf32>
    %135 = arith.addf %109, %134 : vector<8x256xf32>
    %c28 = arith.constant 28 : index
    %136 = memref.load %arg2[%c28] : memref<168xf32, #tpu.memory_space<smem>>
    %137 = vector.broadcast %136 : f32 to vector<8x256xf32>
    %138 = arith.mulf %137, %119 : vector<8x256xf32>
    %139 = arith.addf %113, %138 : vector<8x256xf32>
    %c29 = arith.constant 29 : index
    %140 = memref.load %arg2[%c29] : memref<168xf32, #tpu.memory_space<smem>>
    %141 = vector.broadcast %140 : f32 to vector<8x256xf32>
    %142 = arith.mulf %141, %119 : vector<8x256xf32>
    %143 = arith.addf %117, %142 : vector<8x256xf32>
    %144 = vector.extract_strided_slice %91 {offsets = [2, 0, 0], sizes = [1, 8, 256], strides = [1, 1, 1]} : vector<3x8x256xf32> to vector<1x8x256xf32>
    %145 = vector.shape_cast %144 : vector<1x8x256xf32> to vector<8x256xf32>
    %c30 = arith.constant 30 : index
    %146 = memref.load %arg2[%c30] : memref<168xf32, #tpu.memory_space<smem>>
    %147 = vector.broadcast %146 : f32 to vector<8x256xf32>
    %148 = arith.mulf %147, %145 : vector<8x256xf32>
    %149 = arith.addf %123, %148 : vector<8x256xf32>
    %c31 = arith.constant 31 : index
    %150 = memref.load %arg2[%c31] : memref<168xf32, #tpu.memory_space<smem>>
    %151 = vector.broadcast %150 : f32 to vector<8x256xf32>
    %152 = arith.mulf %151, %145 : vector<8x256xf32>
    %153 = arith.addf %127, %152 : vector<8x256xf32>
    %c32 = arith.constant 32 : index
    %154 = memref.load %arg2[%c32] : memref<168xf32, #tpu.memory_space<smem>>
    %155 = vector.broadcast %154 : f32 to vector<8x256xf32>
    %156 = arith.mulf %155, %145 : vector<8x256xf32>
    %157 = arith.addf %131, %156 : vector<8x256xf32>
    %c33 = arith.constant 33 : index
    %158 = memref.load %arg2[%c33] : memref<168xf32, #tpu.memory_space<smem>>
    %159 = vector.broadcast %158 : f32 to vector<8x256xf32>
    %160 = arith.mulf %159, %145 : vector<8x256xf32>
    %161 = arith.addf %135, %160 : vector<8x256xf32>
    %c34 = arith.constant 34 : index
    %162 = memref.load %arg2[%c34] : memref<168xf32, #tpu.memory_space<smem>>
    %163 = vector.broadcast %162 : f32 to vector<8x256xf32>
    %164 = arith.mulf %163, %145 : vector<8x256xf32>
    %165 = arith.addf %139, %164 : vector<8x256xf32>
    %c35 = arith.constant 35 : index
    %166 = memref.load %arg2[%c35] : memref<168xf32, #tpu.memory_space<smem>>
    %167 = vector.broadcast %166 : f32 to vector<8x256xf32>
    %168 = arith.mulf %167, %145 : vector<8x256xf32>
    %169 = arith.addf %143, %168 : vector<8x256xf32>
    %c254_i32 = arith.constant 254 : i32
    %170 = tpu.dynamic_rotate %0 by %c254_i32 dim 2 : vector<3x8x256xf32>, i32 -> vector<3x8x256xf32>
    %171 = vector.extract_strided_slice %170 {offsets = [0, 0, 0], sizes = [1, 8, 256], strides = [1, 1, 1]} : vector<3x8x256xf32> to vector<1x8x256xf32>
    %172 = vector.shape_cast %171 : vector<1x8x256xf32> to vector<8x256xf32>
    %c36 = arith.constant 36 : index
    %173 = memref.load %arg2[%c36] : memref<168xf32, #tpu.memory_space<smem>>
    %174 = vector.broadcast %173 : f32 to vector<8x256xf32>
    %175 = arith.mulf %174, %172 : vector<8x256xf32>
    %176 = arith.addf %149, %175 : vector<8x256xf32>
    %c37 = arith.constant 37 : index
    %177 = memref.load %arg2[%c37] : memref<168xf32, #tpu.memory_space<smem>>
    %178 = vector.broadcast %177 : f32 to vector<8x256xf32>
    %179 = arith.mulf %178, %172 : vector<8x256xf32>
    %180 = arith.addf %153, %179 : vector<8x256xf32>
    %c38 = arith.constant 38 : index
    %181 = memref.load %arg2[%c38] : memref<168xf32, #tpu.memory_space<smem>>
    %182 = vector.broadcast %181 : f32 to vector<8x256xf32>
    %183 = arith.mulf %182, %172 : vector<8x256xf32>
    %184 = arith.addf %157, %183 : vector<8x256xf32>
    %c39 = arith.constant 39 : index
    %185 = memref.load %arg2[%c39] : memref<168xf32, #tpu.memory_space<smem>>
    %186 = vector.broadcast %185 : f32 to vector<8x256xf32>
    %187 = arith.mulf %186, %172 : vector<8x256xf32>
    %188 = arith.addf %161, %187 : vector<8x256xf32>
    %c40 = arith.constant 40 : index
    %189 = memref.load %arg2[%c40] : memref<168xf32, #tpu.memory_space<smem>>
    %190 = vector.broadcast %189 : f32 to vector<8x256xf32>
    %191 = arith.mulf %190, %172 : vector<8x256xf32>
    %192 = arith.addf %165, %191 : vector<8x256xf32>
    %c41 = arith.constant 41 : index
    %193 = memref.load %arg2[%c41] : memref<168xf32, #tpu.memory_space<smem>>
    %194 = vector.broadcast %193 : f32 to vector<8x256xf32>
    %195 = arith.mulf %194, %172 : vector<8x256xf32>
    %196 = arith.addf %169, %195 : vector<8x256xf32>
    %197 = vector.extract_strided_slice %170 {offsets = [1, 0, 0], sizes = [1, 8, 256], strides = [1, 1, 1]} : vector<3x8x256xf32> to vector<1x8x256xf32>
    %198 = vector.shape_cast %197 : vector<1x8x256xf32> to vector<8x256xf32>
    %c42 = arith.constant 42 : index
    %199 = memref.load %arg2[%c42] : memref<168xf32, #tpu.memory_space<smem>>
    %200 = vector.broadcast %199 : f32 to vector<8x256xf32>
    %201 = arith.mulf %200, %198 : vector<8x256xf32>
    %202 = arith.addf %176, %201 : vector<8x256xf32>
    %c43 = arith.constant 43 : index
    %203 = memref.load %arg2[%c43] : memref<168xf32, #tpu.memory_space<smem>>
    %204 = vector.broadcast %203 : f32 to vector<8x256xf32>
    %205 = arith.mulf %204, %198 : vector<8x256xf32>
    %206 = arith.addf %180, %205 : vector<8x256xf32>
    %c44 = arith.constant 44 : index
    %207 = memref.load %arg2[%c44] : memref<168xf32, #tpu.memory_space<smem>>
    %208 = vector.broadcast %207 : f32 to vector<8x256xf32>
    %209 = arith.mulf %208, %198 : vector<8x256xf32>
    %210 = arith.addf %184, %209 : vector<8x256xf32>
    %c45 = arith.constant 45 : index
    %211 = memref.load %arg2[%c45] : memref<168xf32, #tpu.memory_space<smem>>
    %212 = vector.broadcast %211 : f32 to vector<8x256xf32>
    %213 = arith.mulf %212, %198 : vector<8x256xf32>
    %214 = arith.addf %188, %213 : vector<8x256xf32>
    %c46 = arith.constant 46 : index
    %215 = memref.load %arg2[%c46] : memref<168xf32, #tpu.memory_space<smem>>
    %216 = vector.broadcast %215 : f32 to vector<8x256xf32>
    %217 = arith.mulf %216, %198 : vector<8x256xf32>
    %218 = arith.addf %192, %217 : vector<8x256xf32>
    %c47 = arith.constant 47 : index
    %219 = memref.load %arg2[%c47] : memref<168xf32, #tpu.memory_space<smem>>
    %220 = vector.broadcast %219 : f32 to vector<8x256xf32>
    %221 = arith.mulf %220, %198 : vector<8x256xf32>
    %222 = arith.addf %196, %221 : vector<8x256xf32>
    %223 = vector.extract_strided_slice %170 {offsets = [2, 0, 0], sizes = [1, 8, 256], strides = [1, 1, 1]} : vector<3x8x256xf32> to vector<1x8x256xf32>
    %224 = vector.shape_cast %223 : vector<1x8x256xf32> to vector<8x256xf32>
    %c48 = arith.constant 48 : index
    %225 = memref.load %arg2[%c48] : memref<168xf32, #tpu.memory_space<smem>>
    %226 = vector.broadcast %225 : f32 to vector<8x256xf32>
    %227 = arith.mulf %226, %224 : vector<8x256xf32>
    %228 = arith.addf %202, %227 : vector<8x256xf32>
    %c49 = arith.constant 49 : index
    %229 = memref.load %arg2[%c49] : memref<168xf32, #tpu.memory_space<smem>>
    %230 = vector.broadcast %229 : f32 to vector<8x256xf32>
    %231 = arith.mulf %230, %224 : vector<8x256xf32>
    %232 = arith.addf %206, %231 : vector<8x256xf32>
    %c50 = arith.constant 50 : index
    %233 = memref.load %arg2[%c50] : memref<168xf32, #tpu.memory_space<smem>>
    %234 = vector.broadcast %233 : f32 to vector<8x256xf32>
    %235 = arith.mulf %234, %224 : vector<8x256xf32>
    %236 = arith.addf %210, %235 : vector<8x256xf32>
    %c51 = arith.constant 51 : index
    %237 = memref.load %arg2[%c51] : memref<168xf32, #tpu.memory_space<smem>>
    %238 = vector.broadcast %237 : f32 to vector<8x256xf32>
    %239 = arith.mulf %238, %224 : vector<8x256xf32>
    %240 = arith.addf %214, %239 : vector<8x256xf32>
    %c52 = arith.constant 52 : index
    %241 = memref.load %arg2[%c52] : memref<168xf32, #tpu.memory_space<smem>>
    %242 = vector.broadcast %241 : f32 to vector<8x256xf32>
    %243 = arith.mulf %242, %224 : vector<8x256xf32>
    %244 = arith.addf %218, %243 : vector<8x256xf32>
    %c53 = arith.constant 53 : index
    %245 = memref.load %arg2[%c53] : memref<168xf32, #tpu.memory_space<smem>>
    %246 = vector.broadcast %245 : f32 to vector<8x256xf32>
    %247 = arith.mulf %246, %224 : vector<8x256xf32>
    %248 = arith.addf %222, %247 : vector<8x256xf32>
    %c240_i32 = arith.constant 240 : i32
    %249 = tpu.dynamic_rotate %0 by %c240_i32 dim 2 : vector<3x8x256xf32>, i32 -> vector<3x8x256xf32>
    %250 = vector.extract_strided_slice %249 {offsets = [0, 0, 0], sizes = [1, 8, 256], strides = [1, 1, 1]} : vector<3x8x256xf32> to vector<1x8x256xf32>
    %251 = vector.shape_cast %250 : vector<1x8x256xf32> to vector<8x256xf32>
    %c54 = arith.constant 54 : index
    %252 = memref.load %arg2[%c54] : memref<168xf32, #tpu.memory_space<smem>>
    %253 = vector.broadcast %252 : f32 to vector<8x256xf32>
    %254 = arith.mulf %253, %251 : vector<8x256xf32>
    %255 = arith.addf %228, %254 : vector<8x256xf32>
    %c55 = arith.constant 55 : index
    %256 = memref.load %arg2[%c55] : memref<168xf32, #tpu.memory_space<smem>>
    %257 = vector.broadcast %256 : f32 to vector<8x256xf32>
    %258 = arith.mulf %257, %251 : vector<8x256xf32>
    %259 = arith.addf %232, %258 : vector<8x256xf32>
    %c56 = arith.constant 56 : index
    %260 = memref.load %arg2[%c56] : memref<168xf32, #tpu.memory_space<smem>>
    %261 = vector.broadcast %260 : f32 to vector<8x256xf32>
    %262 = arith.mulf %261, %251 : vector<8x256xf32>
    %263 = arith.addf %236, %262 : vector<8x256xf32>
    %c57 = arith.constant 57 : index
    %264 = memref.load %arg2[%c57] : memref<168xf32, #tpu.memory_space<smem>>
    %265 = vector.broadcast %264 : f32 to vector<8x256xf32>
    %266 = arith.mulf %265, %251 : vector<8x256xf32>
    %267 = arith.addf %240, %266 : vector<8x256xf32>
    %c58 = arith.constant 58 : index
    %268 = memref.load %arg2[%c58] : memref<168xf32, #tpu.memory_space<smem>>
    %269 = vector.broadcast %268 : f32 to vector<8x256xf32>
    %270 = arith.mulf %269, %251 : vector<8x256xf32>
    %271 = arith.addf %244, %270 : vector<8x256xf32>
    %c59 = arith.constant 59 : index
    %272 = memref.load %arg2[%c59] : memref<168xf32, #tpu.memory_space<smem>>
    %273 = vector.broadcast %272 : f32 to vector<8x256xf32>
    %274 = arith.mulf %273, %251 : vector<8x256xf32>
    %275 = arith.addf %248, %274 : vector<8x256xf32>
    %276 = vector.extract_strided_slice %249 {offsets = [1, 0, 0], sizes = [1, 8, 256], strides = [1, 1, 1]} : vector<3x8x256xf32> to vector<1x8x256xf32>
    %277 = vector.shape_cast %276 : vector<1x8x256xf32> to vector<8x256xf32>
    %c60 = arith.constant 60 : index
    %278 = memref.load %arg2[%c60] : memref<168xf32, #tpu.memory_space<smem>>
    %279 = vector.broadcast %278 : f32 to vector<8x256xf32>
    %280 = arith.mulf %279, %277 : vector<8x256xf32>
    %281 = arith.addf %255, %280 : vector<8x256xf32>
    %c61 = arith.constant 61 : index
    %282 = memref.load %arg2[%c61] : memref<168xf32, #tpu.memory_space<smem>>
    %283 = vector.broadcast %282 : f32 to vector<8x256xf32>
    %284 = arith.mulf %283, %277 : vector<8x256xf32>
    %285 = arith.addf %259, %284 : vector<8x256xf32>
    %c62 = arith.constant 62 : index
    %286 = memref.load %arg2[%c62] : memref<168xf32, #tpu.memory_space<smem>>
    %287 = vector.broadcast %286 : f32 to vector<8x256xf32>
    %288 = arith.mulf %287, %277 : vector<8x256xf32>
    %289 = arith.addf %263, %288 : vector<8x256xf32>
    %c63 = arith.constant 63 : index
    %290 = memref.load %arg2[%c63] : memref<168xf32, #tpu.memory_space<smem>>
    %291 = vector.broadcast %290 : f32 to vector<8x256xf32>
    %292 = arith.mulf %291, %277 : vector<8x256xf32>
    %293 = arith.addf %267, %292 : vector<8x256xf32>
    %c64 = arith.constant 64 : index
    %294 = memref.load %arg2[%c64] : memref<168xf32, #tpu.memory_space<smem>>
    %295 = vector.broadcast %294 : f32 to vector<8x256xf32>
    %296 = arith.mulf %295, %277 : vector<8x256xf32>
    %297 = arith.addf %271, %296 : vector<8x256xf32>
    %c65 = arith.constant 65 : index
    %298 = memref.load %arg2[%c65] : memref<168xf32, #tpu.memory_space<smem>>
    %299 = vector.broadcast %298 : f32 to vector<8x256xf32>
    %300 = arith.mulf %299, %277 : vector<8x256xf32>
    %301 = arith.addf %275, %300 : vector<8x256xf32>
    %302 = vector.extract_strided_slice %249 {offsets = [2, 0, 0], sizes = [1, 8, 256], strides = [1, 1, 1]} : vector<3x8x256xf32> to vector<1x8x256xf32>
    %303 = vector.shape_cast %302 : vector<1x8x256xf32> to vector<8x256xf32>
    %c66 = arith.constant 66 : index
    %304 = memref.load %arg2[%c66] : memref<168xf32, #tpu.memory_space<smem>>
    %305 = vector.broadcast %304 : f32 to vector<8x256xf32>
    %306 = arith.mulf %305, %303 : vector<8x256xf32>
    %307 = arith.addf %281, %306 : vector<8x256xf32>
    %c67 = arith.constant 67 : index
    %308 = memref.load %arg2[%c67] : memref<168xf32, #tpu.memory_space<smem>>
    %309 = vector.broadcast %308 : f32 to vector<8x256xf32>
    %310 = arith.mulf %309, %303 : vector<8x256xf32>
    %311 = arith.addf %285, %310 : vector<8x256xf32>
    %c68 = arith.constant 68 : index
    %312 = memref.load %arg2[%c68] : memref<168xf32, #tpu.memory_space<smem>>
    %313 = vector.broadcast %312 : f32 to vector<8x256xf32>
    %314 = arith.mulf %313, %303 : vector<8x256xf32>
    %315 = arith.addf %289, %314 : vector<8x256xf32>
    %c69 = arith.constant 69 : index
    %316 = memref.load %arg2[%c69] : memref<168xf32, #tpu.memory_space<smem>>
    %317 = vector.broadcast %316 : f32 to vector<8x256xf32>
    %318 = arith.mulf %317, %303 : vector<8x256xf32>
    %319 = arith.addf %293, %318 : vector<8x256xf32>
    %c70 = arith.constant 70 : index
    %320 = memref.load %arg2[%c70] : memref<168xf32, #tpu.memory_space<smem>>
    %321 = vector.broadcast %320 : f32 to vector<8x256xf32>
    %322 = arith.mulf %321, %303 : vector<8x256xf32>
    %323 = arith.addf %297, %322 : vector<8x256xf32>
    %c71 = arith.constant 71 : index
    %324 = memref.load %arg2[%c71] : memref<168xf32, #tpu.memory_space<smem>>
    %325 = vector.broadcast %324 : f32 to vector<8x256xf32>
    %326 = arith.mulf %325, %303 : vector<8x256xf32>
    %327 = arith.addf %301, %326 : vector<8x256xf32>
    %c239_i32 = arith.constant 239 : i32
    %328 = tpu.dynamic_rotate %0 by %c239_i32 dim 2 : vector<3x8x256xf32>, i32 -> vector<3x8x256xf32>
    %329 = vector.extract_strided_slice %328 {offsets = [0, 0, 0], sizes = [1, 8, 256], strides = [1, 1, 1]} : vector<3x8x256xf32> to vector<1x8x256xf32>
    %330 = vector.shape_cast %329 : vector<1x8x256xf32> to vector<8x256xf32>
    %c72 = arith.constant 72 : index
    %331 = memref.load %arg2[%c72] : memref<168xf32, #tpu.memory_space<smem>>
    %332 = vector.broadcast %331 : f32 to vector<8x256xf32>
    %333 = arith.mulf %332, %330 : vector<8x256xf32>
    %334 = arith.addf %307, %333 : vector<8x256xf32>
    %c73 = arith.constant 73 : index
    %335 = memref.load %arg2[%c73] : memref<168xf32, #tpu.memory_space<smem>>
    %336 = vector.broadcast %335 : f32 to vector<8x256xf32>
    %337 = arith.mulf %336, %330 : vector<8x256xf32>
    %338 = arith.addf %311, %337 : vector<8x256xf32>
    %c74 = arith.constant 74 : index
    %339 = memref.load %arg2[%c74] : memref<168xf32, #tpu.memory_space<smem>>
    %340 = vector.broadcast %339 : f32 to vector<8x256xf32>
    %341 = arith.mulf %340, %330 : vector<8x256xf32>
    %342 = arith.addf %315, %341 : vector<8x256xf32>
    %c75 = arith.constant 75 : index
    %343 = memref.load %arg2[%c75] : memref<168xf32, #tpu.memory_space<smem>>
    %344 = vector.broadcast %343 : f32 to vector<8x256xf32>
    %345 = arith.mulf %344, %330 : vector<8x256xf32>
    %346 = arith.addf %319, %345 : vector<8x256xf32>
    %c76 = arith.constant 76 : index
    %347 = memref.load %arg2[%c76] : memref<168xf32, #tpu.memory_space<smem>>
    %348 = vector.broadcast %347 : f32 to vector<8x256xf32>
    %349 = arith.mulf %348, %330 : vector<8x256xf32>
    %350 = arith.addf %323, %349 : vector<8x256xf32>
    %c77 = arith.constant 77 : index
    %351 = memref.load %arg2[%c77] : memref<168xf32, #tpu.memory_space<smem>>
    %352 = vector.broadcast %351 : f32 to vector<8x256xf32>
    %353 = arith.mulf %352, %330 : vector<8x256xf32>
    %354 = arith.addf %327, %353 : vector<8x256xf32>
    %355 = vector.extract_strided_slice %328 {offsets = [1, 0, 0], sizes = [1, 8, 256], strides = [1, 1, 1]} : vector<3x8x256xf32> to vector<1x8x256xf32>
    %356 = vector.shape_cast %355 : vector<1x8x256xf32> to vector<8x256xf32>
    %c78 = arith.constant 78 : index
    %357 = memref.load %arg2[%c78] : memref<168xf32, #tpu.memory_space<smem>>
    %358 = vector.broadcast %357 : f32 to vector<8x256xf32>
    %359 = arith.mulf %358, %356 : vector<8x256xf32>
    %360 = arith.addf %334, %359 : vector<8x256xf32>
    %c79 = arith.constant 79 : index
    %361 = memref.load %arg2[%c79] : memref<168xf32, #tpu.memory_space<smem>>
    %362 = vector.broadcast %361 : f32 to vector<8x256xf32>
    %363 = arith.mulf %362, %356 : vector<8x256xf32>
    %364 = arith.addf %338, %363 : vector<8x256xf32>
    %c80 = arith.constant 80 : index
    %365 = memref.load %arg2[%c80] : memref<168xf32, #tpu.memory_space<smem>>
    %366 = vector.broadcast %365 : f32 to vector<8x256xf32>
    %367 = arith.mulf %366, %356 : vector<8x256xf32>
    %368 = arith.addf %342, %367 : vector<8x256xf32>
    %c81 = arith.constant 81 : index
    %369 = memref.load %arg2[%c81] : memref<168xf32, #tpu.memory_space<smem>>
    %370 = vector.broadcast %369 : f32 to vector<8x256xf32>
    %371 = arith.mulf %370, %356 : vector<8x256xf32>
    %372 = arith.addf %346, %371 : vector<8x256xf32>
    %c82 = arith.constant 82 : index
    %373 = memref.load %arg2[%c82] : memref<168xf32, #tpu.memory_space<smem>>
    %374 = vector.broadcast %373 : f32 to vector<8x256xf32>
    %375 = arith.mulf %374, %356 : vector<8x256xf32>
    %376 = arith.addf %350, %375 : vector<8x256xf32>
    %c83 = arith.constant 83 : index
    %377 = memref.load %arg2[%c83] : memref<168xf32, #tpu.memory_space<smem>>
    %378 = vector.broadcast %377 : f32 to vector<8x256xf32>
    %379 = arith.mulf %378, %356 : vector<8x256xf32>
    %380 = arith.addf %354, %379 : vector<8x256xf32>
    %381 = vector.extract_strided_slice %328 {offsets = [2, 0, 0], sizes = [1, 8, 256], strides = [1, 1, 1]} : vector<3x8x256xf32> to vector<1x8x256xf32>
    %382 = vector.shape_cast %381 : vector<1x8x256xf32> to vector<8x256xf32>
    %c84 = arith.constant 84 : index
    %383 = memref.load %arg2[%c84] : memref<168xf32, #tpu.memory_space<smem>>
    %384 = vector.broadcast %383 : f32 to vector<8x256xf32>
    %385 = arith.mulf %384, %382 : vector<8x256xf32>
    %386 = arith.addf %360, %385 : vector<8x256xf32>
    %c85 = arith.constant 85 : index
    %387 = memref.load %arg2[%c85] : memref<168xf32, #tpu.memory_space<smem>>
    %388 = vector.broadcast %387 : f32 to vector<8x256xf32>
    %389 = arith.mulf %388, %382 : vector<8x256xf32>
    %390 = arith.addf %364, %389 : vector<8x256xf32>
    %c86 = arith.constant 86 : index
    %391 = memref.load %arg2[%c86] : memref<168xf32, #tpu.memory_space<smem>>
    %392 = vector.broadcast %391 : f32 to vector<8x256xf32>
    %393 = arith.mulf %392, %382 : vector<8x256xf32>
    %394 = arith.addf %368, %393 : vector<8x256xf32>
    %c87 = arith.constant 87 : index
    %395 = memref.load %arg2[%c87] : memref<168xf32, #tpu.memory_space<smem>>
    %396 = vector.broadcast %395 : f32 to vector<8x256xf32>
    %397 = arith.mulf %396, %382 : vector<8x256xf32>
    %398 = arith.addf %372, %397 : vector<8x256xf32>
    %c88 = arith.constant 88 : index
    %399 = memref.load %arg2[%c88] : memref<168xf32, #tpu.memory_space<smem>>
    %400 = vector.broadcast %399 : f32 to vector<8x256xf32>
    %401 = arith.mulf %400, %382 : vector<8x256xf32>
    %402 = arith.addf %376, %401 : vector<8x256xf32>
    %c89 = arith.constant 89 : index
    %403 = memref.load %arg2[%c89] : memref<168xf32, #tpu.memory_space<smem>>
    %404 = vector.broadcast %403 : f32 to vector<8x256xf32>
    %405 = arith.mulf %404, %382 : vector<8x256xf32>
    %406 = arith.addf %380, %405 : vector<8x256xf32>
    %c238_i32 = arith.constant 238 : i32
    %407 = tpu.dynamic_rotate %0 by %c238_i32 dim 2 : vector<3x8x256xf32>, i32 -> vector<3x8x256xf32>
    %408 = vector.extract_strided_slice %407 {offsets = [0, 0, 0], sizes = [1, 8, 256], strides = [1, 1, 1]} : vector<3x8x256xf32> to vector<1x8x256xf32>
    %409 = vector.shape_cast %408 : vector<1x8x256xf32> to vector<8x256xf32>
    %c90 = arith.constant 90 : index
    %410 = memref.load %arg2[%c90] : memref<168xf32, #tpu.memory_space<smem>>
    %411 = vector.broadcast %410 : f32 to vector<8x256xf32>
    %412 = arith.mulf %411, %409 : vector<8x256xf32>
    %413 = arith.addf %386, %412 : vector<8x256xf32>
    %c91 = arith.constant 91 : index
    %414 = memref.load %arg2[%c91] : memref<168xf32, #tpu.memory_space<smem>>
    %415 = vector.broadcast %414 : f32 to vector<8x256xf32>
    %416 = arith.mulf %415, %409 : vector<8x256xf32>
    %417 = arith.addf %390, %416 : vector<8x256xf32>
    %c92 = arith.constant 92 : index
    %418 = memref.load %arg2[%c92] : memref<168xf32, #tpu.memory_space<smem>>
    %419 = vector.broadcast %418 : f32 to vector<8x256xf32>
    %420 = arith.mulf %419, %409 : vector<8x256xf32>
    %421 = arith.addf %394, %420 : vector<8x256xf32>
    %c93 = arith.constant 93 : index
    %422 = memref.load %arg2[%c93] : memref<168xf32, #tpu.memory_space<smem>>
    %423 = vector.broadcast %422 : f32 to vector<8x256xf32>
    %424 = arith.mulf %423, %409 : vector<8x256xf32>
    %425 = arith.addf %398, %424 : vector<8x256xf32>
    %c94 = arith.constant 94 : index
    %426 = memref.load %arg2[%c94] : memref<168xf32, #tpu.memory_space<smem>>
    %427 = vector.broadcast %426 : f32 to vector<8x256xf32>
    %428 = arith.mulf %427, %409 : vector<8x256xf32>
    %429 = arith.addf %402, %428 : vector<8x256xf32>
    %c95 = arith.constant 95 : index
    %430 = memref.load %arg2[%c95] : memref<168xf32, #tpu.memory_space<smem>>
    %431 = vector.broadcast %430 : f32 to vector<8x256xf32>
    %432 = arith.mulf %431, %409 : vector<8x256xf32>
    %433 = arith.addf %406, %432 : vector<8x256xf32>
    %434 = vector.extract_strided_slice %407 {offsets = [1, 0, 0], sizes = [1, 8, 256], strides = [1, 1, 1]} : vector<3x8x256xf32> to vector<1x8x256xf32>
    %435 = vector.shape_cast %434 : vector<1x8x256xf32> to vector<8x256xf32>
    %c96 = arith.constant 96 : index
    %436 = memref.load %arg2[%c96] : memref<168xf32, #tpu.memory_space<smem>>
    %437 = vector.broadcast %436 : f32 to vector<8x256xf32>
    %438 = arith.mulf %437, %435 : vector<8x256xf32>
    %439 = arith.addf %413, %438 : vector<8x256xf32>
    %c97 = arith.constant 97 : index
    %440 = memref.load %arg2[%c97] : memref<168xf32, #tpu.memory_space<smem>>
    %441 = vector.broadcast %440 : f32 to vector<8x256xf32>
    %442 = arith.mulf %441, %435 : vector<8x256xf32>
    %443 = arith.addf %417, %442 : vector<8x256xf32>
    %c98 = arith.constant 98 : index
    %444 = memref.load %arg2[%c98] : memref<168xf32, #tpu.memory_space<smem>>
    %445 = vector.broadcast %444 : f32 to vector<8x256xf32>
    %446 = arith.mulf %445, %435 : vector<8x256xf32>
    %447 = arith.addf %421, %446 : vector<8x256xf32>
    %c99 = arith.constant 99 : index
    %448 = memref.load %arg2[%c99] : memref<168xf32, #tpu.memory_space<smem>>
    %449 = vector.broadcast %448 : f32 to vector<8x256xf32>
    %450 = arith.mulf %449, %435 : vector<8x256xf32>
    %451 = arith.addf %425, %450 : vector<8x256xf32>
    %c100 = arith.constant 100 : index
    %452 = memref.load %arg2[%c100] : memref<168xf32, #tpu.memory_space<smem>>
    %453 = vector.broadcast %452 : f32 to vector<8x256xf32>
    %454 = arith.mulf %453, %435 : vector<8x256xf32>
    %455 = arith.addf %429, %454 : vector<8x256xf32>
    %c101 = arith.constant 101 : index
    %456 = memref.load %arg2[%c101] : memref<168xf32, #tpu.memory_space<smem>>
    %457 = vector.broadcast %456 : f32 to vector<8x256xf32>
    %458 = arith.mulf %457, %435 : vector<8x256xf32>
    %459 = arith.addf %433, %458 : vector<8x256xf32>
    %460 = vector.extract_strided_slice %407 {offsets = [2, 0, 0], sizes = [1, 8, 256], strides = [1, 1, 1]} : vector<3x8x256xf32> to vector<1x8x256xf32>
    %461 = vector.shape_cast %460 : vector<1x8x256xf32> to vector<8x256xf32>
    %c102 = arith.constant 102 : index
    %462 = memref.load %arg2[%c102] : memref<168xf32, #tpu.memory_space<smem>>
    %463 = vector.broadcast %462 : f32 to vector<8x256xf32>
    %464 = arith.mulf %463, %461 : vector<8x256xf32>
    %465 = arith.addf %439, %464 : vector<8x256xf32>
    %c103 = arith.constant 103 : index
    %466 = memref.load %arg2[%c103] : memref<168xf32, #tpu.memory_space<smem>>
    %467 = vector.broadcast %466 : f32 to vector<8x256xf32>
    %468 = arith.mulf %467, %461 : vector<8x256xf32>
    %469 = arith.addf %443, %468 : vector<8x256xf32>
    %c104 = arith.constant 104 : index
    %470 = memref.load %arg2[%c104] : memref<168xf32, #tpu.memory_space<smem>>
    %471 = vector.broadcast %470 : f32 to vector<8x256xf32>
    %472 = arith.mulf %471, %461 : vector<8x256xf32>
    %473 = arith.addf %447, %472 : vector<8x256xf32>
    %c105 = arith.constant 105 : index
    %474 = memref.load %arg2[%c105] : memref<168xf32, #tpu.memory_space<smem>>
    %475 = vector.broadcast %474 : f32 to vector<8x256xf32>
    %476 = arith.mulf %475, %461 : vector<8x256xf32>
    %477 = arith.addf %451, %476 : vector<8x256xf32>
    %c106 = arith.constant 106 : index
    %478 = memref.load %arg2[%c106] : memref<168xf32, #tpu.memory_space<smem>>
    %479 = vector.broadcast %478 : f32 to vector<8x256xf32>
    %480 = arith.mulf %479, %461 : vector<8x256xf32>
    %481 = arith.addf %455, %480 : vector<8x256xf32>
    %c107 = arith.constant 107 : index
    %482 = memref.load %arg2[%c107] : memref<168xf32, #tpu.memory_space<smem>>
    %483 = vector.broadcast %482 : f32 to vector<8x256xf32>
    %484 = arith.mulf %483, %461 : vector<8x256xf32>
    %485 = arith.addf %459, %484 : vector<8x256xf32>
    %c224_i32 = arith.constant 224 : i32
    %486 = tpu.dynamic_rotate %0 by %c224_i32 dim 2 : vector<3x8x256xf32>, i32 -> vector<3x8x256xf32>
    %487 = vector.extract_strided_slice %486 {offsets = [0, 0, 0], sizes = [1, 8, 256], strides = [1, 1, 1]} : vector<3x8x256xf32> to vector<1x8x256xf32>
    %488 = vector.shape_cast %487 : vector<1x8x256xf32> to vector<8x256xf32>
    %c108 = arith.constant 108 : index
    %489 = memref.load %arg2[%c108] : memref<168xf32, #tpu.memory_space<smem>>
    %490 = vector.broadcast %489 : f32 to vector<8x256xf32>
    %491 = arith.mulf %490, %488 : vector<8x256xf32>
    %492 = arith.addf %465, %491 : vector<8x256xf32>
    %c109 = arith.constant 109 : index
    %493 = memref.load %arg2[%c109] : memref<168xf32, #tpu.memory_space<smem>>
    %494 = vector.broadcast %493 : f32 to vector<8x256xf32>
    %495 = arith.mulf %494, %488 : vector<8x256xf32>
    %496 = arith.addf %469, %495 : vector<8x256xf32>
    %c110 = arith.constant 110 : index
    %497 = memref.load %arg2[%c110] : memref<168xf32, #tpu.memory_space<smem>>
    %498 = vector.broadcast %497 : f32 to vector<8x256xf32>
    %499 = arith.mulf %498, %488 : vector<8x256xf32>
    %500 = arith.addf %473, %499 : vector<8x256xf32>
    %c111 = arith.constant 111 : index
    %501 = memref.load %arg2[%c111] : memref<168xf32, #tpu.memory_space<smem>>
    %502 = vector.broadcast %501 : f32 to vector<8x256xf32>
    %503 = arith.mulf %502, %488 : vector<8x256xf32>
    %504 = arith.addf %477, %503 : vector<8x256xf32>
    %c112 = arith.constant 112 : index
    %505 = memref.load %arg2[%c112] : memref<168xf32, #tpu.memory_space<smem>>
    %506 = vector.broadcast %505 : f32 to vector<8x256xf32>
    %507 = arith.mulf %506, %488 : vector<8x256xf32>
    %508 = arith.addf %481, %507 : vector<8x256xf32>
    %c113 = arith.constant 113 : index
    %509 = memref.load %arg2[%c113] : memref<168xf32, #tpu.memory_space<smem>>
    %510 = vector.broadcast %509 : f32 to vector<8x256xf32>
    %511 = arith.mulf %510, %488 : vector<8x256xf32>
    %512 = arith.addf %485, %511 : vector<8x256xf32>
    %513 = vector.extract_strided_slice %486 {offsets = [1, 0, 0], sizes = [1, 8, 256], strides = [1, 1, 1]} : vector<3x8x256xf32> to vector<1x8x256xf32>
    %514 = vector.shape_cast %513 : vector<1x8x256xf32> to vector<8x256xf32>
    %c114 = arith.constant 114 : index
    %515 = memref.load %arg2[%c114] : memref<168xf32, #tpu.memory_space<smem>>
    %516 = vector.broadcast %515 : f32 to vector<8x256xf32>
    %517 = arith.mulf %516, %514 : vector<8x256xf32>
    %518 = arith.addf %492, %517 : vector<8x256xf32>
    %c115 = arith.constant 115 : index
    %519 = memref.load %arg2[%c115] : memref<168xf32, #tpu.memory_space<smem>>
    %520 = vector.broadcast %519 : f32 to vector<8x256xf32>
    %521 = arith.mulf %520, %514 : vector<8x256xf32>
    %522 = arith.addf %496, %521 : vector<8x256xf32>
    %c116 = arith.constant 116 : index
    %523 = memref.load %arg2[%c116] : memref<168xf32, #tpu.memory_space<smem>>
    %524 = vector.broadcast %523 : f32 to vector<8x256xf32>
    %525 = arith.mulf %524, %514 : vector<8x256xf32>
    %526 = arith.addf %500, %525 : vector<8x256xf32>
    %c117 = arith.constant 117 : index
    %527 = memref.load %arg2[%c117] : memref<168xf32, #tpu.memory_space<smem>>
    %528 = vector.broadcast %527 : f32 to vector<8x256xf32>
    %529 = arith.mulf %528, %514 : vector<8x256xf32>
    %530 = arith.addf %504, %529 : vector<8x256xf32>
    %c118 = arith.constant 118 : index
    %531 = memref.load %arg2[%c118] : memref<168xf32, #tpu.memory_space<smem>>
    %532 = vector.broadcast %531 : f32 to vector<8x256xf32>
    %533 = arith.mulf %532, %514 : vector<8x256xf32>
    %534 = arith.addf %508, %533 : vector<8x256xf32>
    %c119 = arith.constant 119 : index
    %535 = memref.load %arg2[%c119] : memref<168xf32, #tpu.memory_space<smem>>
    %536 = vector.broadcast %535 : f32 to vector<8x256xf32>
    %537 = arith.mulf %536, %514 : vector<8x256xf32>
    %538 = arith.addf %512, %537 : vector<8x256xf32>
    %539 = vector.extract_strided_slice %486 {offsets = [2, 0, 0], sizes = [1, 8, 256], strides = [1, 1, 1]} : vector<3x8x256xf32> to vector<1x8x256xf32>
    %540 = vector.shape_cast %539 : vector<1x8x256xf32> to vector<8x256xf32>
    %c120 = arith.constant 120 : index
    %541 = memref.load %arg2[%c120] : memref<168xf32, #tpu.memory_space<smem>>
    %542 = vector.broadcast %541 : f32 to vector<8x256xf32>
    %543 = arith.mulf %542, %540 : vector<8x256xf32>
    %544 = arith.addf %518, %543 : vector<8x256xf32>
    %c121 = arith.constant 121 : index
    %545 = memref.load %arg2[%c121] : memref<168xf32, #tpu.memory_space<smem>>
    %546 = vector.broadcast %545 : f32 to vector<8x256xf32>
    %547 = arith.mulf %546, %540 : vector<8x256xf32>
    %548 = arith.addf %522, %547 : vector<8x256xf32>
    %c122 = arith.constant 122 : index
    %549 = memref.load %arg2[%c122] : memref<168xf32, #tpu.memory_space<smem>>
    %550 = vector.broadcast %549 : f32 to vector<8x256xf32>
    %551 = arith.mulf %550, %540 : vector<8x256xf32>
    %552 = arith.addf %526, %551 : vector<8x256xf32>
    %c123 = arith.constant 123 : index
    %553 = memref.load %arg2[%c123] : memref<168xf32, #tpu.memory_space<smem>>
    %554 = vector.broadcast %553 : f32 to vector<8x256xf32>
    %555 = arith.mulf %554, %540 : vector<8x256xf32>
    %556 = arith.addf %530, %555 : vector<8x256xf32>
    %c124 = arith.constant 124 : index
    %557 = memref.load %arg2[%c124] : memref<168xf32, #tpu.memory_space<smem>>
    %558 = vector.broadcast %557 : f32 to vector<8x256xf32>
    %559 = arith.mulf %558, %540 : vector<8x256xf32>
    %560 = arith.addf %534, %559 : vector<8x256xf32>
    %c125 = arith.constant 125 : index
    %561 = memref.load %arg2[%c125] : memref<168xf32, #tpu.memory_space<smem>>
    %562 = vector.broadcast %561 : f32 to vector<8x256xf32>
    %563 = arith.mulf %562, %540 : vector<8x256xf32>
    %564 = arith.addf %538, %563 : vector<8x256xf32>
    %c223_i32 = arith.constant 223 : i32
    %565 = tpu.dynamic_rotate %0 by %c223_i32 dim 2 : vector<3x8x256xf32>, i32 -> vector<3x8x256xf32>
    %566 = vector.extract_strided_slice %565 {offsets = [0, 0, 0], sizes = [1, 8, 256], strides = [1, 1, 1]} : vector<3x8x256xf32> to vector<1x8x256xf32>
    %567 = vector.shape_cast %566 : vector<1x8x256xf32> to vector<8x256xf32>
    %c126 = arith.constant 126 : index
    %568 = memref.load %arg2[%c126] : memref<168xf32, #tpu.memory_space<smem>>
    %569 = vector.broadcast %568 : f32 to vector<8x256xf32>
    %570 = arith.mulf %569, %567 : vector<8x256xf32>
    %571 = arith.addf %544, %570 : vector<8x256xf32>
    %c127 = arith.constant 127 : index
    %572 = memref.load %arg2[%c127] : memref<168xf32, #tpu.memory_space<smem>>
    %573 = vector.broadcast %572 : f32 to vector<8x256xf32>
    %574 = arith.mulf %573, %567 : vector<8x256xf32>
    %575 = arith.addf %548, %574 : vector<8x256xf32>
    %c128 = arith.constant 128 : index
    %576 = memref.load %arg2[%c128] : memref<168xf32, #tpu.memory_space<smem>>
    %577 = vector.broadcast %576 : f32 to vector<8x256xf32>
    %578 = arith.mulf %577, %567 : vector<8x256xf32>
    %579 = arith.addf %552, %578 : vector<8x256xf32>
    %c129 = arith.constant 129 : index
    %580 = memref.load %arg2[%c129] : memref<168xf32, #tpu.memory_space<smem>>
    %581 = vector.broadcast %580 : f32 to vector<8x256xf32>
    %582 = arith.mulf %581, %567 : vector<8x256xf32>
    %583 = arith.addf %556, %582 : vector<8x256xf32>
    %c130 = arith.constant 130 : index
    %584 = memref.load %arg2[%c130] : memref<168xf32, #tpu.memory_space<smem>>
    %585 = vector.broadcast %584 : f32 to vector<8x256xf32>
    %586 = arith.mulf %585, %567 : vector<8x256xf32>
    %587 = arith.addf %560, %586 : vector<8x256xf32>
    %c131 = arith.constant 131 : index
    %588 = memref.load %arg2[%c131] : memref<168xf32, #tpu.memory_space<smem>>
    %589 = vector.broadcast %588 : f32 to vector<8x256xf32>
    %590 = arith.mulf %589, %567 : vector<8x256xf32>
    %591 = arith.addf %564, %590 : vector<8x256xf32>
    %592 = vector.extract_strided_slice %565 {offsets = [1, 0, 0], sizes = [1, 8, 256], strides = [1, 1, 1]} : vector<3x8x256xf32> to vector<1x8x256xf32>
    %593 = vector.shape_cast %592 : vector<1x8x256xf32> to vector<8x256xf32>
    %c132 = arith.constant 132 : index
    %594 = memref.load %arg2[%c132] : memref<168xf32, #tpu.memory_space<smem>>
    %595 = vector.broadcast %594 : f32 to vector<8x256xf32>
    %596 = arith.mulf %595, %593 : vector<8x256xf32>
    %597 = arith.addf %571, %596 : vector<8x256xf32>
    %c133 = arith.constant 133 : index
    %598 = memref.load %arg2[%c133] : memref<168xf32, #tpu.memory_space<smem>>
    %599 = vector.broadcast %598 : f32 to vector<8x256xf32>
    %600 = arith.mulf %599, %593 : vector<8x256xf32>
    %601 = arith.addf %575, %600 : vector<8x256xf32>
    %c134 = arith.constant 134 : index
    %602 = memref.load %arg2[%c134] : memref<168xf32, #tpu.memory_space<smem>>
    %603 = vector.broadcast %602 : f32 to vector<8x256xf32>
    %604 = arith.mulf %603, %593 : vector<8x256xf32>
    %605 = arith.addf %579, %604 : vector<8x256xf32>
    %c135 = arith.constant 135 : index
    %606 = memref.load %arg2[%c135] : memref<168xf32, #tpu.memory_space<smem>>
    %607 = vector.broadcast %606 : f32 to vector<8x256xf32>
    %608 = arith.mulf %607, %593 : vector<8x256xf32>
    %609 = arith.addf %583, %608 : vector<8x256xf32>
    %c136 = arith.constant 136 : index
    %610 = memref.load %arg2[%c136] : memref<168xf32, #tpu.memory_space<smem>>
    %611 = vector.broadcast %610 : f32 to vector<8x256xf32>
    %612 = arith.mulf %611, %593 : vector<8x256xf32>
    %613 = arith.addf %587, %612 : vector<8x256xf32>
    %c137 = arith.constant 137 : index
    %614 = memref.load %arg2[%c137] : memref<168xf32, #tpu.memory_space<smem>>
    %615 = vector.broadcast %614 : f32 to vector<8x256xf32>
    %616 = arith.mulf %615, %593 : vector<8x256xf32>
    %617 = arith.addf %591, %616 : vector<8x256xf32>
    %618 = vector.extract_strided_slice %565 {offsets = [2, 0, 0], sizes = [1, 8, 256], strides = [1, 1, 1]} : vector<3x8x256xf32> to vector<1x8x256xf32>
    %619 = vector.shape_cast %618 : vector<1x8x256xf32> to vector<8x256xf32>
    %c138 = arith.constant 138 : index
    %620 = memref.load %arg2[%c138] : memref<168xf32, #tpu.memory_space<smem>>
    %621 = vector.broadcast %620 : f32 to vector<8x256xf32>
    %622 = arith.mulf %621, %619 : vector<8x256xf32>
    %623 = arith.addf %597, %622 : vector<8x256xf32>
    %c139 = arith.constant 139 : index
    %624 = memref.load %arg2[%c139] : memref<168xf32, #tpu.memory_space<smem>>
    %625 = vector.broadcast %624 : f32 to vector<8x256xf32>
    %626 = arith.mulf %625, %619 : vector<8x256xf32>
    %627 = arith.addf %601, %626 : vector<8x256xf32>
    %c140 = arith.constant 140 : index
    %628 = memref.load %arg2[%c140] : memref<168xf32, #tpu.memory_space<smem>>
    %629 = vector.broadcast %628 : f32 to vector<8x256xf32>
    %630 = arith.mulf %629, %619 : vector<8x256xf32>
    %631 = arith.addf %605, %630 : vector<8x256xf32>
    %c141 = arith.constant 141 : index
    %632 = memref.load %arg2[%c141] : memref<168xf32, #tpu.memory_space<smem>>
    %633 = vector.broadcast %632 : f32 to vector<8x256xf32>
    %634 = arith.mulf %633, %619 : vector<8x256xf32>
    %635 = arith.addf %609, %634 : vector<8x256xf32>
    %c142 = arith.constant 142 : index
    %636 = memref.load %arg2[%c142] : memref<168xf32, #tpu.memory_space<smem>>
    %637 = vector.broadcast %636 : f32 to vector<8x256xf32>
    %638 = arith.mulf %637, %619 : vector<8x256xf32>
    %639 = arith.addf %613, %638 : vector<8x256xf32>
    %c143 = arith.constant 143 : index
    %640 = memref.load %arg2[%c143] : memref<168xf32, #tpu.memory_space<smem>>
    %641 = vector.broadcast %640 : f32 to vector<8x256xf32>
    %642 = arith.mulf %641, %619 : vector<8x256xf32>
    %643 = arith.addf %617, %642 : vector<8x256xf32>
    %c222_i32 = arith.constant 222 : i32
    %644 = tpu.dynamic_rotate %0 by %c222_i32 dim 2 : vector<3x8x256xf32>, i32 -> vector<3x8x256xf32>
    %645 = vector.extract_strided_slice %644 {offsets = [0, 0, 0], sizes = [1, 8, 256], strides = [1, 1, 1]} : vector<3x8x256xf32> to vector<1x8x256xf32>
    %646 = vector.shape_cast %645 : vector<1x8x256xf32> to vector<8x256xf32>
    %c144 = arith.constant 144 : index
    %647 = memref.load %arg2[%c144] : memref<168xf32, #tpu.memory_space<smem>>
    %648 = vector.broadcast %647 : f32 to vector<8x256xf32>
    %649 = arith.mulf %648, %646 : vector<8x256xf32>
    %650 = arith.addf %623, %649 : vector<8x256xf32>
    %c145 = arith.constant 145 : index
    %651 = memref.load %arg2[%c145] : memref<168xf32, #tpu.memory_space<smem>>
    %652 = vector.broadcast %651 : f32 to vector<8x256xf32>
    %653 = arith.mulf %652, %646 : vector<8x256xf32>
    %654 = arith.addf %627, %653 : vector<8x256xf32>
    %c146 = arith.constant 146 : index
    %655 = memref.load %arg2[%c146] : memref<168xf32, #tpu.memory_space<smem>>
    %656 = vector.broadcast %655 : f32 to vector<8x256xf32>
    %657 = arith.mulf %656, %646 : vector<8x256xf32>
    %658 = arith.addf %631, %657 : vector<8x256xf32>
    %c147 = arith.constant 147 : index
    %659 = memref.load %arg2[%c147] : memref<168xf32, #tpu.memory_space<smem>>
    %660 = vector.broadcast %659 : f32 to vector<8x256xf32>
    %661 = arith.mulf %660, %646 : vector<8x256xf32>
    %662 = arith.addf %635, %661 : vector<8x256xf32>
    %c148 = arith.constant 148 : index
    %663 = memref.load %arg2[%c148] : memref<168xf32, #tpu.memory_space<smem>>
    %664 = vector.broadcast %663 : f32 to vector<8x256xf32>
    %665 = arith.mulf %664, %646 : vector<8x256xf32>
    %666 = arith.addf %639, %665 : vector<8x256xf32>
    %c149 = arith.constant 149 : index
    %667 = memref.load %arg2[%c149] : memref<168xf32, #tpu.memory_space<smem>>
    %668 = vector.broadcast %667 : f32 to vector<8x256xf32>
    %669 = arith.mulf %668, %646 : vector<8x256xf32>
    %670 = arith.addf %643, %669 : vector<8x256xf32>
    %671 = vector.extract_strided_slice %644 {offsets = [1, 0, 0], sizes = [1, 8, 256], strides = [1, 1, 1]} : vector<3x8x256xf32> to vector<1x8x256xf32>
    %672 = vector.shape_cast %671 : vector<1x8x256xf32> to vector<8x256xf32>
    %c150 = arith.constant 150 : index
    %673 = memref.load %arg2[%c150] : memref<168xf32, #tpu.memory_space<smem>>
    %674 = vector.broadcast %673 : f32 to vector<8x256xf32>
    %675 = arith.mulf %674, %672 : vector<8x256xf32>
    %676 = arith.addf %650, %675 : vector<8x256xf32>
    %c151 = arith.constant 151 : index
    %677 = memref.load %arg2[%c151] : memref<168xf32, #tpu.memory_space<smem>>
    %678 = vector.broadcast %677 : f32 to vector<8x256xf32>
    %679 = arith.mulf %678, %672 : vector<8x256xf32>
    %680 = arith.addf %654, %679 : vector<8x256xf32>
    %c152 = arith.constant 152 : index
    %681 = memref.load %arg2[%c152] : memref<168xf32, #tpu.memory_space<smem>>
    %682 = vector.broadcast %681 : f32 to vector<8x256xf32>
    %683 = arith.mulf %682, %672 : vector<8x256xf32>
    %684 = arith.addf %658, %683 : vector<8x256xf32>
    %c153 = arith.constant 153 : index
    %685 = memref.load %arg2[%c153] : memref<168xf32, #tpu.memory_space<smem>>
    %686 = vector.broadcast %685 : f32 to vector<8x256xf32>
    %687 = arith.mulf %686, %672 : vector<8x256xf32>
    %688 = arith.addf %662, %687 : vector<8x256xf32>
    %c154 = arith.constant 154 : index
    %689 = memref.load %arg2[%c154] : memref<168xf32, #tpu.memory_space<smem>>
    %690 = vector.broadcast %689 : f32 to vector<8x256xf32>
    %691 = arith.mulf %690, %672 : vector<8x256xf32>
    %692 = arith.addf %666, %691 : vector<8x256xf32>
    %c155 = arith.constant 155 : index
    %693 = memref.load %arg2[%c155] : memref<168xf32, #tpu.memory_space<smem>>
    %694 = vector.broadcast %693 : f32 to vector<8x256xf32>
    %695 = arith.mulf %694, %672 : vector<8x256xf32>
    %696 = arith.addf %670, %695 : vector<8x256xf32>
    %697 = vector.extract_strided_slice %644 {offsets = [2, 0, 0], sizes = [1, 8, 256], strides = [1, 1, 1]} : vector<3x8x256xf32> to vector<1x8x256xf32>
    %698 = vector.shape_cast %697 : vector<1x8x256xf32> to vector<8x256xf32>
    %c156 = arith.constant 156 : index
    %699 = memref.load %arg2[%c156] : memref<168xf32, #tpu.memory_space<smem>>
    %700 = vector.broadcast %699 : f32 to vector<8x256xf32>
    %701 = arith.mulf %700, %698 : vector<8x256xf32>
    %702 = arith.addf %676, %701 : vector<8x256xf32>
    %c157 = arith.constant 157 : index
    %703 = memref.load %arg2[%c157] : memref<168xf32, #tpu.memory_space<smem>>
    %704 = vector.broadcast %703 : f32 to vector<8x256xf32>
    %705 = arith.mulf %704, %698 : vector<8x256xf32>
    %706 = arith.addf %680, %705 : vector<8x256xf32>
    %c158 = arith.constant 158 : index
    %707 = memref.load %arg2[%c158] : memref<168xf32, #tpu.memory_space<smem>>
    %708 = vector.broadcast %707 : f32 to vector<8x256xf32>
    %709 = arith.mulf %708, %698 : vector<8x256xf32>
    %710 = arith.addf %684, %709 : vector<8x256xf32>
    %c159 = arith.constant 159 : index
    %711 = memref.load %arg2[%c159] : memref<168xf32, #tpu.memory_space<smem>>
    %712 = vector.broadcast %711 : f32 to vector<8x256xf32>
    %713 = arith.mulf %712, %698 : vector<8x256xf32>
    %714 = arith.addf %688, %713 : vector<8x256xf32>
    %c160 = arith.constant 160 : index
    %715 = memref.load %arg2[%c160] : memref<168xf32, #tpu.memory_space<smem>>
    %716 = vector.broadcast %715 : f32 to vector<8x256xf32>
    %717 = arith.mulf %716, %698 : vector<8x256xf32>
    %718 = arith.addf %692, %717 : vector<8x256xf32>
    %c161 = arith.constant 161 : index
    %719 = memref.load %arg2[%c161] : memref<168xf32, #tpu.memory_space<smem>>
    %720 = vector.broadcast %719 : f32 to vector<8x256xf32>
    %721 = arith.mulf %720, %698 : vector<8x256xf32>
    %722 = arith.addf %696, %721 : vector<8x256xf32>
    %c0_3 = arith.constant 0 : index
    %c0_4 = arith.constant 0 : index
    %c0_5 = arith.constant 0 : index
    %723 = vector.load %arg3[%c0_3, %c0_4, %c0_5] : memref<6x8x256xf32, #tpu.memory_space<vmem>>, vector<1x8x256xf32>
    %724 = vector.shape_cast %723 : vector<1x8x256xf32> to vector<8x256xf32>
    %725 = vector.shape_cast %702 : vector<8x256xf32> to vector<1x8x256xf32>
    tpu.vector_store %arg3[%c0_3, %c0_4, %c0_5], %725 {strides = array<i32>} : memref<6x8x256xf32, #tpu.memory_space<vmem>>, vector<1x8x256xf32>,
    %c1_6 = arith.constant 1 : index
    %c0_7 = arith.constant 0 : index
    %c0_8 = arith.constant 0 : index
    %726 = vector.load %arg3[%c1_6, %c0_7, %c0_8] : memref<6x8x256xf32, #tpu.memory_space<vmem>>, vector<1x8x256xf32>
    %727 = vector.shape_cast %726 : vector<1x8x256xf32> to vector<8x256xf32>
    %728 = vector.shape_cast %706 : vector<8x256xf32> to vector<1x8x256xf32>
    tpu.vector_store %arg3[%c1_6, %c0_7, %c0_8], %728 {strides = array<i32>} : memref<6x8x256xf32, #tpu.memory_space<vmem>>, vector<1x8x256xf32>,
    %c2_9 = arith.constant 2 : index
    %c0_10 = arith.constant 0 : index
    %c0_11 = arith.constant 0 : index
    %729 = vector.load %arg3[%c2_9, %c0_10, %c0_11] : memref<6x8x256xf32, #tpu.memory_space<vmem>>, vector<1x8x256xf32>
    %730 = vector.shape_cast %729 : vector<1x8x256xf32> to vector<8x256xf32>
    %731 = vector.shape_cast %710 : vector<8x256xf32> to vector<1x8x256xf32>
    tpu.vector_store %arg3[%c2_9, %c0_10, %c0_11], %731 {strides = array<i32>} : memref<6x8x256xf32, #tpu.memory_space<vmem>>, vector<1x8x256xf32>,
    %c3_12 = arith.constant 3 : index
    %c0_13 = arith.constant 0 : index
    %c0_14 = arith.constant 0 : index
    %732 = vector.load %arg3[%c3_12, %c0_13, %c0_14] : memref<6x8x256xf32, #tpu.memory_space<vmem>>, vector<1x8x256xf32>
    %733 = vector.shape_cast %732 : vector<1x8x256xf32> to vector<8x256xf32>
    %734 = vector.shape_cast %714 : vector<8x256xf32> to vector<1x8x256xf32>
    tpu.vector_store %arg3[%c3_12, %c0_13, %c0_14], %734 {strides = array<i32>} : memref<6x8x256xf32, #tpu.memory_space<vmem>>, vector<1x8x256xf32>,
    %c4_15 = arith.constant 4 : index
    %c0_16 = arith.constant 0 : index
    %c0_17 = arith.constant 0 : index
    %735 = vector.load %arg3[%c4_15, %c0_16, %c0_17] : memref<6x8x256xf32, #tpu.memory_space<vmem>>, vector<1x8x256xf32>
    %736 = vector.shape_cast %735 : vector<1x8x256xf32> to vector<8x256xf32>
    %737 = vector.shape_cast %718 : vector<8x256xf32> to vector<1x8x256xf32>
    tpu.vector_store %arg3[%c4_15, %c0_16, %c0_17], %737 {strides = array<i32>} : memref<6x8x256xf32, #tpu.memory_space<vmem>>, vector<1x8x256xf32>,
    %c5_18 = arith.constant 5 : index
    %c0_19 = arith.constant 0 : index
    %c0_20 = arith.constant 0 : index
    %738 = vector.load %arg3[%c5_18, %c0_19, %c0_20] : memref<6x8x256xf32, #tpu.memory_space<vmem>>, vector<1x8x256xf32>
    %739 = vector.shape_cast %738 : vector<1x8x256xf32> to vector<8x256xf32>
    %740 = vector.shape_cast %722 : vector<8x256xf32> to vector<1x8x256xf32>
    tpu.vector_store %arg3[%c5_18, %c0_19, %c0_20], %740 {strides = array<i32>} : memref<6x8x256xf32, #tpu.memory_space<vmem>>, vector<1x8x256xf32>,
    return
  }
  func.func @transform_0(%arg0: i32) -> (i32, i32, i32) {
    %c0_i32 = arith.constant 0 : i32
    %c0_i32_0 = arith.constant 0 : i32
    %c0_i32_1 = arith.constant 0 : i32
    return %c0_i32, %arg0, %c0_i32_0 : i32, i32, i32
  }
  func.func @transform_1(%arg0: i32) -> i32 {
    %c0_i32 = arith.constant 0 : i32
    %c0_i32_0 = arith.constant 0 : i32
    return %c0_i32 : i32
  }
  func.func @transform_2(%arg0: i32) -> (i32, i32, i32) {
    %c0_i32 = arith.constant 0 : i32
    %c0_i32_0 = arith.constant 0 : i32
    %c0_i32_1 = arith.constant 0 : i32
    return %c0_i32, %arg0, %c0_i32_0 : i32, i32, i32
  }
}

</mosaic_0001>

<bundles_post_ra>
// kernel: tpu_custom_call.1
= control target key start
LH: loop header
LB: loop body
LE: loop exit
PB: predicated region body
PF: predicated region fallthrough
CT: control target
= control target key end

     0   :  { %s2836_s0 = inlined_call_operand.hbm [shape: f32[3,8,256], index: 0, kind: input, shape index: {}]   ;;  %s2837_s1 = inlined_call_operand.vmem [shape: f32[168], index: 1, kind: input, shape index: {}]   ;;  %s2838_s2 = inlined_call_operand.hbm [shape: f32[6,8,256], index: 2, kind: output, shape index: {}]  }
   0x1   :  { %2984 = sst [smem:[#allocation112_spill]] %s2838_s2 }
   0x2   :  { %7 = vsyncpa [#allocation3], 0 }
   0x3   :  { %8 = vsyncpa [#allocation5], 0 }
   0x4   :  { %9 = vsyncpa [#allocation4], 0  ;;  %s1460_s9 = smov [#allocation2]   ;;  %s28_s13 = sshll.u32 %s2837_s1, 4  ;;  %s29_s13 = int_to_ptr.vmem [resolvable:$true] %s28_s13 }
   0x5   :  { %s15_s10 = sshll.u32 %s1460_s9, 4  ;;  %s1398_s16 = scalar_lea.hbm %s2836_s0, 768  ;;  %s16_s10 = int_to_ptr.vmem [resolvable:$true] %s15_s10 }
   0x6   :  { %p1399_p0 = scmp.ne.s32.totalorder %s2836_s0, %s1398_s16  ;;  %p1402_p1 = scmp.lt.u32.totalorder %s1398_s16, %s2836_s0 }
   0x8   :  { %p1404_p2 = pnand %p1402_p1, %p1399_p0 }
   0xa   :  { %1407 = shalt.err (!%p1404_p2)
}
   0xb   :  { %s1408_s21 = scalar_lea.vmem %s16_s10, 768  ;;  %p1413_p4 = scmp.lt.s32.totalorder %s16_s10, %s16_s10 }
   0xc   :  { %p1409_p3 = scmp.ne.s32.totalorder %s16_s10, %s1408_s21  ;;  %p1414_p5 = scmp.lt.s32.totalorder %s1408_s21, %s1408_s21 }
   0xe   :  { %p1415_p6 = por %p1414_p5, %p1413_p4 }
  0x10   :  { %p1416_p7 = pnand %p1415_p6, %p1409_p3 }
  0x12   :  { %1419 = shalt.err (!%p1416_p7)
}
  0x13   :  { %s2839_s1 = smov 256   ;;  %s2840_s22 = smov 16  }
  0x14   :  { %21 = dma.hbm_to_vmem [thread:$0]  %s2836_s0, 768, %s16_s10, [#allocation3], %s2839_s1, %s2839_s1, %s2840_s22  }
  0x15   :  { %s1420_s25 = scalar_lea.vmem %s29_s13, 32  ;;  %p1425_p9 = scmp.lt.s32.totalorder %s29_s13, %s29_s13 }
  0x16   :  { %p1421_p8 = scmp.ne.s32.totalorder %s29_s13, %s1420_s25  ;;  %p1426_p10 = scmp.lt.s32.totalorder %s1420_s25, %s1420_s25 }
  0x18   :  { %p1427_p11 = por %p1426_p10, %p1425_p9 }
  0x1a   :  { %p1428_p12 = pnand %p1427_p11, %p1421_p8 }
  0x1c   :  { %1431 = shalt.err (!%p1428_p12)
}
  0x1d   :  { %s1463_s26 = smov [#allocation6]  }
  0x1e   :  { %31 = dma.vmem_to_smem %s29_s13, 32, %s1463_s26, [#allocation5]  }
  0x1f   :  { %1454 = dma.done.wait [#allocation3], 768  }
  0x20   :  { %1455 = vsyncadd [#allocation3], 4294966528 }
  0x21   :  { %1456 = dma.done.wait [#allocation5], 32  }
  0x22   :  { %1457 = vsyncadd [#allocation5], 4294967264 }
  0x23   :  { %38 = sfence }
  0x24   :  { %v1506_v0 = vld [vmem:[#allocation2 + $0x10] sm:$0xff]  ;;  %v1508_v1 = vld [vmem:[#allocation2] sm:$0xff]  ;;  %s1464_s0 = smov 127   ;;  %v1512_v2 = vld [vmem:[#allocation2 + $0x18] sm:$0xff]  ;;  %s1465_s27 = smov 126   ;;  %v177_v6 = vlaneseq }
  0x25   :  { %167 = vrot.lane.b32.xlu1 %v1506_v0, %s1464_s0  ;;  %165 = vrot.lane.b32.xlu0 %v1508_v1, %s1464_s0  ;;  %v1514_v3 = vld [vmem:[#allocation2 + $0x8] sm:$0xff]  ;;  %v1520_v5 = vld [vmem:[#allocation2 + $0x20] sm:$0xff]  ;;  %s1466_s28 = smov 112   ;;  %s1467_s29 = smov 111  }
  0x26   :  { %v1518_v4 = vld [vmem:[#allocation2 + $0x28] sm:$0xff]  ;;  %s1540_s30 = sld [smem:[#allocation6 + $0x18]]  ;;  %s1542_s3 = sld [smem:[#allocation6 + $0x19]]  ;;  %v1682_v19 = vand.u32 127, %v177_v6 }
  0x27   :  { %s1544_s4 = sld [smem:[#allocation6 + $0x1a]]  ;;  %s1546_s5 = sld [smem:[#allocation6 + $0x1b]] }
  0x28   :  { %s1548_s6 = sld [smem:[#allocation6 + $0x1c]]  ;;  %s1550_s7 = sld [smem:[#allocation6 + $0x1d]]  ;;  %vm179_vm0 = vcmp.lt.s32.totalorder %v1682_v19, 127  ;;  %vm306_vm1 = vcmp.lt.s32.totalorder %v1682_v19, 126  ;;  %vm433_vm2 = vcmp.lt.s32.totalorder %v1682_v19, 112  ;;  %vm560_vm3 = vcmp.lt.s32.totalorder %v1682_v19, 111 }
  0x29   :  { %173 = vrot.lane.b32.xlu1 %v1512_v2, %s1464_s0  ;;  %171 = vrot.lane.b32.xlu0 %v1514_v3, %s1464_s0  ;;  %s1554_s8 = sld [smem:[#allocation6 + $0xa2]]  ;;  %s1556_s9 = sld [smem:[#allocation6 + $0xa3]]  ;;  %vm687_vm4 = vcmp.lt.s32.totalorder %v1682_v19, 110  ;;  %vm814_vm5 = vcmp.lt.s32.totalorder %v1682_v19, 96  ;;  %vm941_vm6 = vcmp.lt.s32.totalorder %v1682_v19, 95  ;;  %vm1068_vm7 = vcmp.lt.s32.totalorder %v1682_v19, 94 }
  0x2a   :  { %s1558_s10 = sld [smem:[#allocation6 + $0xa4]]  ;;  %s1560_s11 = sld [smem:[#allocation6 + $0xa5]] }
  0x2b   :  { %s1562_s12 = sld [smem:[#allocation6 + $0xa6]]  ;;  %s1564_s13 = sld [smem:[#allocation6 + $0xa7]] }
  0x2c   :  { %2985 = sst [smem:[#allocation11_spill]] %s1540_s30  ;;  %s1568_s15 = sld [smem:[#allocation6 + $0x1]]  ;;  %v223_v8 = vstv %s1540_s30  ;;  %v229_v9 = vstv %s1542_s3 }
  0x2d   :  { %175 = vrot.lane.b32.xlu1 %v1518_v4, %s1464_s0  ;;  %169 = vrot.lane.b32.xlu0 %v1520_v5, %s1464_s0  ;;  %2986 = sst [smem:[#allocation12_spill]] %s1542_s3  ;;  %s1566_s14 = sld [smem:[#allocation6]]  ;;  %v235_v11 = vstv %s1544_s4  ;;  %v241_v12 = vstv %s1546_s5 }
  0x2e   :  { %2987 = sst [smem:[#allocation13_spill]] %s1544_s4  ;;  %s1468_s16 = smov 110  }
  0x2f   :  { %2988 = sst [smem:[#allocation14_spill]] %s1546_s5  ;;  %s1572_s17 = sld [smem:[#allocation6 + $0x2]]  ;;  %v46_v15 = vstv %s1554_s8  ;;  %v48_v20 = vstv %s1556_s9 }
  0x30   :  { %2989 = sst [smem:[#allocation15_spill]] %s1548_s6  ;;  %s1574_s18 = sld [smem:[#allocation6 + $0x3]]  ;;  %v50_v21 = vstv %s1558_s10  ;;  %v52_v27 = vstv %s1560_s11 }
  0x31   :  { %300 = vrot.lane.b32.xlu1 %v1514_v3, %s1465_s27  ;;  %294 = vrot.lane.b32.xlu0 %v1508_v1, %s1465_s27  ;;  %2990 = sst [smem:[#allocation16_spill]] %s1550_s7  ;;  %s1576_s19 = sld [smem:[#allocation6 + $0x4]]  ;;  %v54_v31 = vstv %s1562_s12  ;;  %v56_v32 = vstv %s1564_s13 }
  0x32   :  { %s1578_s20 = sld [smem:[#allocation6 + $0x5]]  ;;  %s1580_s21 = sld [smem:[#allocation6 + $0x6]]  ;;  %v64_v10 = vstv %s1568_s15 }
  0x33   :  { %s1582_s23 = sld [smem:[#allocation6 + $0x7]]  ;;  %s1584_s24 = sld [smem:[#allocation6 + $0x8]]  ;;  %v58_v7 = vstv %s1566_s14  ;;  %v66_v22 = vmul.f32 %v64_v10, %v1514_v3 }
  0x34   :  { %s1586_s25 = sld [smem:[#allocation6 + $0x9]]  ;;  %s1590_s26 = sld [smem:[#allocation6 + $0xa]]  ;;  %v60_v16 = vmul.f32 %v58_v7, %v1514_v3 }
  0x35   :  { %302 = vrot.lane.b32.xlu1 %v1512_v2, %s1465_s27  ;;  %296 = vrot.lane.b32.xlu0 %v1506_v0, %s1465_s27  ;;  %s1592_s0 = sld [smem:[#allocation6 + $0xb]]  ;;  %s1600_s1 = sld [smem:[#allocation6 + $0xf]]  ;;  %v70_v13 = vstv %s1572_s17  ;;  %v68_v35 = vadd.f32 %v66_v22, %v48_v20 }
  0x36   :  { %s1602_s22 = sld [smem:[#allocation6 + $0x10]]  ;;  %s1604_s2 = sld [smem:[#allocation6 + $0x11]]  ;;  %v76_v14 = vstv %s1574_s18  ;;  %v72_v23 = vmul.f32 %v70_v13, %v1514_v3  ;;  %v62_v33 = vadd.f32 %v60_v16, %v46_v15 }
  0x37   :  { %s1608_s7 = sld [smem:[#allocation6 + $0x12]]  ;;  %s1610_s6 = sld [smem:[#allocation6 + $0x13]]  ;;  %v82_v17 = vstv %s1576_s19  ;;  %v78_v24 = vmul.f32 %v76_v14, %v1514_v3 }
  0x38   :  { %v88_v18 = vstv %s1578_s20  ;;  %s1674_s4 = sld [smem:[#allocation6 + $0x2e]]  ;;  %s1676_s5 = sld [smem:[#allocation6 + $0x2f]]  ;;  %v94_v25 = vstv %s1580_s21  ;;  %v84_v28 = vmul.f32 %v82_v17, %v1514_v3  ;;  %v74_v40 = vadd.f32 %v72_v23, %v50_v21 }
  0x39   :  { %304 = vrot.lane.b32.xlu1 %v1518_v4, %s1465_s27  ;;  %298 = vrot.lane.b32.xlu0 %v1520_v5, %s1465_s27  ;;  %s1594_s27 = sld [smem:[#allocation6 + $0xc]]  ;;  %s1689_s3 = sld [smem:[#allocation6 + $0x30]]  ;;  %v100_v26 = vstv %s1582_s23  ;;  %v90_v29 = vmul.f32 %v88_v18, %v1514_v3  ;;  %v106_v30 = vstv %s1584_s24  ;;  %v96_v36 = vmul.f32 %v94_v25, %v1512_v2 }
  0x3a   :  { %s1691_s30 = sld [smem:[#allocation6 + $0x31]]  ;;  %s3029_s21 = sld [smem:[#allocation15_spill]]  ;;  %v112_v34 = vstv %s1586_s25  ;;  %v102_v37 = vmul.f32 %v100_v26, %v1512_v2  ;;  %v118_v38 = vstv %s1590_s26  ;;  %v80_v41 = vadd.f32 %v78_v24, %v52_v27 }
  0x3b   :  { %2991 = sst [smem:[#allocation17_spill]] %s1592_s0  ;;  %s1612_s0 = sld [smem:[#allocation6 + $0x14]]  ;;  %v108_v42 = vmul.f32 %v106_v30, %v1512_v2  ;;  %v86_v43 = vadd.f32 %v84_v28, %v54_v31  ;;  %v92_v44 = vadd.f32 %v90_v29, %v56_v32  ;;  %v114_v45 = vmul.f32 %v112_v34, %v1512_v2 }
  0x3c   :  { %2995 = sst [smem:[#allocation21_spill]] %s1600_s1  ;;  %s1620_s1 = sld [smem:[#allocation6 + $0x1e]]  ;;  %v1760_v47 = vmul.f32 %v94_v25, %v1506_v0  ;;  %v1763_v48 = vmul.f32 %v100_v26, %v1506_v0  ;;  %v120_v49 = vmul.f32 %v118_v38, %v1512_v2  ;;  %v98_v51 = vadd.f32 %v96_v36, %v62_v33 }
  0x3d   :  { %427 = vrot.lane.b32.xlu1 %v1514_v3, %s1466_s28  ;;  %421 = vrot.lane.b32.xlu0 %v1508_v1, %s1466_s28  ;;  %2996 = sst [smem:[#allocation22_spill]] %s1602_s22  ;;  %s2850_s22 = smov 96   ;;  %v104_v52 = vadd.f32 %v102_v37, %v68_v35  ;;  %v1776_v53 = vmul.f32 %v106_v30, %v1506_v0  ;;  %v110_v55 = vadd.f32 %v108_v42, %v74_v40 }
  0x3e   :  { %2997 = sst [smem:[#allocation23_spill]] %s1604_s2  ;;  %s1622_s2 = sld [smem:[#allocation6 + $0x1f]]  ;;  %v1784_v56 = vmul.f32 %v112_v34, %v1506_v0  ;;  %v1787_v57 = vmul.f32 %v118_v38, %v1506_v0  ;;  %v116_v59 = vadd.f32 %v114_v45, %v80_v41  ;;  %v122_v63 = vadd.f32 %v120_v49, %v86_v43 }
  0x3f   :  { %2992 = sst [smem:[#allocation18_spill]] %s1594_s27  ;;  %s1614_s27 = sld [smem:[#allocation6 + $0x15]]  ;;  %v59_v24 = vmul.f32 %v58_v7, %v1508_v1  ;;  %v65_v25 = vmul.f32 %v64_v10, %v1508_v1  ;;  %v71_v26 = vmul.f32 %v70_v13, %v1508_v1  ;;  %v77_v29 = vmul.f32 %v76_v14, %v1508_v1 }
  0x40   :  { %2998 = sst [smem:[#allocation24_spill]] %s1608_s7  ;;  %s1722_s23 = sld [smem:[#allocation6 + $0x36]]  ;;  %v247_v39 = vstv %s3029_s21  ;;  %v83_v30 = vmul.f32 %v82_v17, %v1508_v1  ;;  %v89_v7 = vmul.f32 %v88_v18, %v1508_v1  ;;  %v187_v43 = vstv %s1608_s7 }
  0x41   :  { %429 = vrot.lane.b32.xlu1 %v1512_v2, %s1466_s28  ;;  %423 = vrot.lane.b32.xlu0 %v1506_v0, %s1466_s28  ;;  %2999 = sst [smem:[#allocation25_spill]] %s1610_s6  ;;  %s1735_s25 = sld [smem:[#allocation6 + $0x38]]  ;;  %v61_v37 = vadd.f32 %v59_v24, %v46_v15  ;;  %v67_v38 = vadd.f32 %v65_v25, %v48_v20  ;;  %v73_v40 = vadd.f32 %v71_v26, %v50_v21 }
  0x42   :  { %3000 = sst [smem:[#allocation26_spill]] %s1612_s0  ;;  %s1640_s0 = sld [smem:[#allocation6 + $0x26]]  ;;  %v85_v42 = vadd.f32 %v83_v30, %v54_v31 }
  0x43   :  { %3004 = sst [smem:[#allocation30_spill]] %s1620_s1  ;;  %s3032_s24 = sld [smem:[#allocation17_spill]]  ;;  %v103_v49 = vadd.f32 %v1763_v48, %v67_v38 }
  0x44   :  { %3005 = sst [smem:[#allocation31_spill]] %s1622_s2  ;;  %s1634_s1 = sld [smem:[#allocation6 + $0x23]] }
  0x45   :  { %431 = vrot.lane.b32.xlu1 %v1518_v4, %s1466_s28  ;;  %425 = vrot.lane.b32.xlu0 %v1520_v5, %s1466_s28  ;;  %s1596_s28 = sld [smem:[#allocation6 + $0xd]]  ;;  %3001 = sst [smem:[#allocation27_spill]] %s1614_s27 }
  0x46   :  { %s1636_s2 = sld [smem:[#allocation6 + $0x24]]  ;;  %s1638_s27 = sld [smem:[#allocation6 + $0x25]] }
  0x47   :  { %3021 = sst [smem:[#allocation46_spill]] %s1674_s4  ;;  %s1757_s21 = sld [smem:[#allocation6 + $0x3d]] }
  0x48   :  { %3012 = sst [smem:[#allocation38_spill]] %s1640_s0  ;;  %s3060_s15 = sld [smem:[#allocation16_spill]] }
  0x49   :  { %554 = vrot.lane.b32.xlu1 %v1514_v3, %s1467_s29  ;;  %548 = vrot.lane.b32.xlu0 %v1508_v1, %s1467_s29  ;;  %s1658_s0 = sld [smem:[#allocation6 + $0x2b]]  ;;  %3022 = sst [smem:[#allocation47_spill]] %s1676_s5  ;;  %v124_v46 = vstv %s3032_s24 }
  0x4a   :  { %3009 = sst [smem:[#allocation35_spill]] %s1634_s1  ;;  %s1664_s1 = sld [smem:[#allocation6 + $0x2c]]  ;;  %v126_v58 = vmul.f32 %v124_v46, %v1512_v2  ;;  %v1795_v60 = vmul.f32 %v124_v46, %v1506_v0  ;;  %v97_v46 = vadd.f32 %v1760_v47, %v61_v37 }
  0x4b   :  { %2993 = sst [smem:[#allocation19_spill]] %s1596_s28  ;;  %s1616_s28 = sld [smem:[#allocation6 + $0x16]] }
  0x4c   :  { %3010 = sst [smem:[#allocation36_spill]] %s1636_s2  ;;  %s1649_s2 = sld [smem:[#allocation6 + $0x28]]  ;;  %v128_v28 = vadd.f32 %v126_v58, %v92_v44  ;;  %v193_v44 = vstv %s1610_s6 }
  0x4d   :  { %556 = vrot.lane.b32.xlu1 %v1512_v2, %s1467_s29  ;;  %550 = vrot.lane.b32.xlu0 %v1506_v0, %s1467_s29  ;;  %3011 = sst [smem:[#allocation37_spill]] %s1638_s27  ;;  %s1651_s27 = sld [smem:[#allocation6 + $0x29]] }
  0x4e   :  { %3023 = sst [smem:[#allocation48_spill]] %s1689_s3  ;;  %s1703_s5 = sld [smem:[#allocation6 + $0x33]]  ;;  %v253_v36 = vstv %s3060_s15 }
  0x4f   :  { %3018 = sst [smem:[#allocation43_spill]] %s1658_s0  ;;  %s1715_s3 = sld [smem:[#allocation6 + $0x35]] }
  0x50   :  { %3019 = sst [smem:[#allocation44_spill]] %s1664_s1  ;;  %s3038_s26 = sld [smem:[#allocation19_spill]] }
  0x51   :  { %558 = vrot.lane.b32.xlu1 %v1518_v4, %s1467_s29  ;;  %552 = vrot.lane.b32.xlu0 %v1520_v5, %s1467_s29  ;;  %s1598_s29 = sld [smem:[#allocation6 + $0xe]]  ;;  %3002 = sst [smem:[#allocation28_spill]] %s1616_s28 }
  0x52   :  { %s1630_s28 = sld [smem:[#allocation6 + $0x21]]  ;;  %3015 = sst [smem:[#allocation40_spill]] %s1649_s2 }
  0x53   :  { %3016 = sst [smem:[#allocation41_spill]] %s1651_s27  ;;  %s1666_s2 = sld [smem:[#allocation6 + $0x2d]]  ;;  %v344_v25 = vstv %s1651_s27 }
  0x54   :  { %3024 = sst [smem:[#allocation49_spill]] %s1691_s30  ;;  %s1713_s30 = sld [smem:[#allocation6 + $0x34]] }
  0x55   :  { %681 = vrot.lane.b32.xlu1 %v1514_v3, %s1468_s16  ;;  %675 = vrot.lane.b32.xlu0 %v1508_v1, %s1468_s16  ;;  %3026 = sst [smem:[#allocation51_spill]] %s1703_s5  ;;  %s1724_s5 = sld [smem:[#allocation6 + $0x37]] }
  0x56   :  { %3028 = sst [smem:[#allocation53_spill]] %s1715_s3  ;;  %s1747_s3 = sld [smem:[#allocation6 + $0x3b]]  ;;  %v136_v54 = vstv %s3038_s26 }
  0x57   :  { %2994 = sst [smem:[#allocation20_spill]] %s1598_s29  ;;  %s1618_s29 = sld [smem:[#allocation6 + $0x17]]  ;;  %v138_v6 = vmul.f32 %v136_v54, %v1518_v4  ;;  %v1846_v13 = vmul.f32 %v136_v54, %v1520_v5 }
  0x58   :  { %3007 = sst [smem:[#allocation33_spill]] %s1630_s28  ;;  %s1779_s24 = sld [smem:[#allocation6 + $0x40]] }
  0x59   :  { %683 = vrot.lane.b32.xlu1 %v1512_v2, %s1468_s16  ;;  %677 = vrot.lane.b32.xlu0 %v1506_v0, %s1468_s16  ;;  %3020 = sst [smem:[#allocation45_spill]] %s1666_s2  ;;  %s1801_s26 = sld [smem:[#allocation6 + $0x44]]  ;;  %v1856_v18 = vadd.f32 %v138_v6, %v104_v52  ;;  %v368_v30 = vstv %s1666_s2 }
  0x5a   :  { %3027 = sst [smem:[#allocation52_spill]] %s1713_s30  ;;  %s1792_s30 = sld [smem:[#allocation6 + $0x43]] }
  0x5b   :  { %3030 = sst [smem:[#allocation54_spill]] %s1722_s23  ;;  %s3035_s23 = sld [smem:[#allocation18_spill]] }
  0x5c   :  { %3031 = sst [smem:[#allocation55_spill]] %s1724_s5  ;;  %s1737_s5 = sld [smem:[#allocation6 + $0x39]] }
  0x5d   :  { %685 = vrot.lane.b32.xlu1 %v1518_v4, %s1468_s16  ;;  %679 = vrot.lane.b32.xlu0 %v1520_v5, %s1468_s16  ;;  %3003 = sst [smem:[#allocation29_spill]] %s1618_s29  ;;  %s1628_s16 = sld [smem:[#allocation6 + $0x20]] }
  0x5e   :  { %s1632_s29 = sld [smem:[#allocation6 + $0x22]]  ;;  %3033 = sst [smem:[#allocation17_spill]] %s1735_s25 }
  0x5f   :  { %3037 = sst [smem:[#allocation57_spill]] %s1747_s3  ;;  %s3043_s25 = smov 95  }
  0x60   :  { %3040 = sst [smem:[#allocation58_spill]] %s1757_s21  ;;  %s1767_s3 = sld [smem:[#allocation6 + $0x3e]] }
  0x61   :  { %808 = vrot.lane.b32.xlu1 %v1514_v3, %s2850_s22  ;;  %802 = vrot.lane.b32.xlu0 %v1508_v1, %s2850_s22  ;;  %s1642_s22 = sld [smem:[#allocation6 + $0x27]]  ;;  %v130_v50 = vstv %s3035_s23  ;;  %3044 = sst [smem:[#allocation61_spill]] %s1779_s24 }
  0x62   :  { %3034 = sst [smem:[#allocation56_spill]] %s1737_s5  ;;  %s1755_s5 = sld [smem:[#allocation6 + $0x3c]]  ;;  %v1798_v61 = vmul.f32 %v130_v50, %v1520_v5  ;;  %v132_v62 = vmul.f32 %v130_v50, %v1518_v4  ;;  %v109_v50 = vadd.f32 %v1776_v53, %v73_v40 }
  0x63   :  { %3006 = sst [smem:[#allocation32_spill]] %s1628_s16  ;;  %s3014_s16 = smov 96  }
  0x64   :  { %3008 = sst [smem:[#allocation34_spill]] %s1632_s29  ;;  %s3045_s21 = sld [smem:[#allocation20_spill]]  ;;  %v1843_v10 = vadd.f32 %v132_v62, %v98_v51  ;;  %v283_v58 = vstv %s1632_s29 }
  0x65   :  { %810 = vrot.lane.b32.xlu1 %v1512_v2, %s3014_s16  ;;  %804 = vrot.lane.b32.xlu0 %v1506_v0, %s3014_s16  ;;  %s1781_s23 = sld [smem:[#allocation6 + $0x41]]  ;;  %3051 = sst [smem:[#allocation62_spill]] %s1801_s26 }
  0x66   :  { %3041 = sst [smem:[#allocation59_spill]] %s1767_s3  ;;  %s3047_s3 = sld [smem:[#allocation21_spill]] }
  0x67   :  { %3013 = sst [smem:[#allocation39_spill]] %s1642_s22  ;;  %s1656_s22 = sld [smem:[#allocation6 + $0x2a]] }
  0x68   :  { %3039 = sst [smem:[#allocation19_spill]] %s1755_s5  ;;  %s3049_s5 = sld [smem:[#allocation22_spill]] }
  0x69   :  { %812 = vrot.lane.b32.xlu1 %v1518_v4, %s3014_s16  ;;  %806 = vrot.lane.b32.xlu0 %v1520_v5, %s3014_s16  ;;  %s1701_s16 = sld [smem:[#allocation6 + $0x32]]  ;;  %3050 = sst [smem:[#allocation22_spill]] %s1792_s30 }
  0x6a   :  { %v142_v16 = vstv %s3045_s21  ;;  %s1808_s30 = sld [smem:[#allocation6 + $0x46]]  ;;  %s1828_s21 = sld [smem:[#allocation6 + $0x49]] }
  0x6b   :  { %3046 = sst [smem:[#allocation20_spill]] %s1781_s23  ;;  %s1803_s23 = sld [smem:[#allocation6 + $0x45]]  ;;  %v1849_v14 = vmul.f32 %v142_v16, %v1520_v5  ;;  %v144_v17 = vmul.f32 %v142_v16, %v1518_v4 }
  0x6c   :  { %v148_v22 = vstv %s3047_s3  ;;  %s1826_s3 = sld [smem:[#allocation6 + $0x48]]  ;;  %s1841_s14 = sld [smem:[#allocation6 + $0x4b]] }
  0x6d   :  { %3017 = sst [smem:[#allocation42_spill]] %s1656_s22  ;;  %s1852_s17 = sld [smem:[#allocation6 + $0x4c]]  ;;  %v150_v33 = vmul.f32 %v148_v22, %v1518_v4  ;;  %v149_v41 = vmul.f32 %v148_v22, %v1520_v5  ;;  %v1891_v15 = vadd.f32 %v144_v17, %v110_v55  ;;  %v1958_v62 = vadd.f32 %v1849_v14, %v109_v50 }
  0x6e   :  { %v154_v23 = vstv %s3049_s5  ;;  %s1839_s5 = sld [smem:[#allocation6 + $0x4a]]  ;;  %s1854_s18 = sld [smem:[#allocation6 + $0x4d]]  ;;  %v350_v26 = vstv %s1656_s22 }
  0x6f   :  { %3025 = sst [smem:[#allocation50_spill]] %s1701_s16  ;;  %s2874_s16 = smov 95   ;;  %v156_v34 = vmul.f32 %v154_v23, %v1518_v4  ;;  %v155_v20 = vmul.f32 %v154_v23, %v1520_v5 }
  0x70   :  { %935 = vrot.lane.b32.xlu1 %v1514_v3, %s2874_s16  ;;  %929 = vrot.lane.b32.xlu0 %v1508_v1, %s2874_s16  ;;  %s1745_s16 = sld [smem:[#allocation6 + $0x3a]]  ;;  %3053 = sst [smem:[#allocation64_spill]] %s1808_s30 }
  0x71   :  { %3052 = sst [smem:[#allocation63_spill]] %s1803_s23  ;;  %s1861_s19 = sld [smem:[#allocation6 + $0x4e]]  ;;  %v1902_v31 = vadd.f32 %v156_v34, %v122_v63 }
  0x72   :  { %3055 = sst [smem:[#allocation66_spill]] %s1826_s3  ;;  %s1889_s9 = sld [smem:[#allocation6 + $0x53]] }
  0x73   :  { %3056 = sst [smem:[#allocation67_spill]] %s1828_s21  ;;  %s1863_s20 = sld [smem:[#allocation6 + $0x4f]] }
  0x74   :  { %937 = vrot.lane.b32.xlu1 %v1512_v2, %s3043_s25  ;;  %931 = vrot.lane.b32.xlu0 %v1506_v0, %s3043_s25  ;;  %3059 = sst [smem:[#allocation68_spill]] %s1841_s14  ;;  %s3068_s8 = sld [smem:[#allocation26_spill]] }
  0x75   :  { %3061 = sst [smem:[#allocation69_spill]] %s1852_s17  ;;  %s1896_s10 = sld [smem:[#allocation6 + $0x54]] }
  0x76   :  { %3036 = sst [smem:[#allocation18_spill]] %s1745_s16  ;;  %s3071_s11 = sld [smem:[#allocation27_spill]] }
  0x77   :  { %s1769_s16 = sld [smem:[#allocation6 + $0x3f]]  ;;  %3062 = sst [smem:[#allocation70_spill]] %s1854_s18 }
  0x78   :  { %939 = vrot.lane.b32.xlu1 %v1518_v4, %s3043_s25  ;;  %933 = vrot.lane.b32.xlu0 %v1520_v5, %s3043_s25  ;;  %3063 = sst [smem:[#allocation71_spill]] %s1861_s19  ;;  %s2891_s25 = smov 94  }
  0x79   :  { %3064 = sst [smem:[#allocation72_spill]] %s1863_s20  ;;  %s1878_s19 = sld [smem:[#allocation6 + $0x51]] }
  0x7a   :  { %3069 = sst [smem:[#allocation76_spill]] %s1889_s9  ;;  %s1898_s15 = sld [smem:[#allocation6 + $0x55]]  ;;  %v199_v45 = vstv %s3068_s8 }
  0x7b   :  { %3070 = sst [smem:[#allocation77_spill]] %s1896_s10  ;;  %s1906_s12 = sld [smem:[#allocation6 + $0x56]] }
  0x7c   :  { %1062 = vrot.lane.b32.xlu1 %v1514_v3, %s2891_s25  ;;  %1056 = vrot.lane.b32.xlu0 %v1508_v1, %s2891_s25  ;;  %v79_v3 = vadd.f32 %v77_v29, %v52_v27  ;;  %v91_v1 = vadd.f32 %v89_v7, %v56_v32  ;;  %s1887_s25 = sld [smem:[#allocation6 + $0x52]]  ;;  %v1900_v27 = vadd.f32 %v150_v33, %v116_v59  ;;  %s1908_s13 = sld [smem:[#allocation6 + $0x57]]  ;;  %v362_v29 = vstv %s1664_s1 }
  0x7d   :  { %3042 = sst [smem:[#allocation60_spill]] %s1769_s16  ;;  %s1790_s16 = sld [smem:[#allocation6 + $0x42]]  ;;  %v1952_v59 = vadd.f32 %v1798_v61, %v97_v46  ;;  %v374_v7 = vstv %s1674_s4 }
  0x7e   :  { %s3075_s9 = smov 94   ;;  %s3077_s7 = sld [smem:[#allocation29_spill]]  ;;  %v115_v51 = vadd.f32 %v1784_v56, %v79_v3  ;;  %v127_v52 = vadd.f32 %v1795_v60, %v91_v1  ;;  %v1955_v60 = vadd.f32 %v1846_v13, %v103_v49 }
  0x7f   :  { %3066 = sst [smem:[#allocation74_spill]] %s1878_s19  ;;  %s3079_s6 = sld [smem:[#allocation31_spill]] }
  0x80   :  { %3072 = sst [smem:[#allocation78_spill]] %s1898_s15  ;;  %1064 = vrot.lane.b32.xlu1 %v1512_v2, %s3075_s9  ;;  %1058 = vrot.lane.b32.xlu0 %v1506_v0, %s3075_s9  ;;  %s1918_s10 = sld [smem:[#allocation6 + $0x58]]  ;;  %v205_v2 = vstv %s3071_s11  ;;  %v121_v0 = vadd.f32 %v1787_v57, %v85_v42  ;;  %v277_v57 = vstv %s1630_s28 }
  0x81   :  { %3073 = sst [smem:[#allocation79_spill]] %s1906_s12  ;;  %s3078_s15 = sld [smem:[#allocation30_spill]] }
  0x82   :  { %3067 = sst [smem:[#allocation75_spill]] %s1887_s25  ;;  %s3076_s25 = sld [smem:[#allocation28_spill]] }
  0x83   :  { %3048 = sst [smem:[#allocation21_spill]] %s1790_s16  ;;  %s1810_s16 = sld [smem:[#allocation6 + $0x47]] }
  0x84   :  { %3074 = sst [smem:[#allocation80_spill]] %s1908_s13  ;;  %s1920_s13 = sld [smem:[#allocation6 + $0x59]]  ;;  %v217_v53 = vstv %s3077_s7  ;;  %1066 = vrot.lane.b32.xlu1 %v1518_v4, %s3075_s9  ;;  %1060 = vrot.lane.b32.xlu0 %v1520_v5, %s3075_s9 }
  0x85   :  { %s3080_s12 = sld [smem:[#allocation32_spill]]  ;;  %s1926_s8 = sld [smem:[#allocation6 + $0x5a]]  ;;  %v265_v55 = vstv %s3079_s6 }
  0x86   :  { %3081 = sst [smem:[#allocation81_spill]] %s1918_s10  ;;  %s1928_s19 = sld [smem:[#allocation6 + $0x5b]] }
  0x87   :  { %v259_v54 = vstv %s3078_s15  ;;  %s1935_s10 = sld [smem:[#allocation6 + $0x5c]]  ;;  %s3088_s11 = sld [smem:[#allocation36_spill]] }
  0x88   :  { %v211_v48 = vstv %s3076_s25  ;;  %s1943_s20 = sld [smem:[#allocation6 + $0x5e]]  ;;  %s1945_s18 = sld [smem:[#allocation6 + $0x5f]] }
  0x89   :  { %3054 = sst [smem:[#allocation65_spill]] %s1810_s16  ;;  %s3057_s16 = sld [smem:[#allocation23_spill]] }
  0x8a   :  { %3058 = sst [smem:[#allocation23_spill]] %s1839_s5  ;;  %s3092_s25 = sld [smem:[#allocation38_spill]] }
  0x8b   :  { %3082 = sst [smem:[#allocation82_spill]] %s1920_s13  ;;  %s1937_s13 = sld [smem:[#allocation6 + $0x5d]]  ;;  %v271_v56 = vstv %s3080_s12 }
  0x8c   :  { %3083 = sst [smem:[#allocation83_spill]] %s1926_s8  ;;  %s3090_s8 = sld [smem:[#allocation37_spill]] }
  0x8d   :  { %3084 = sst [smem:[#allocation84_spill]] %s1928_s19  ;;  %s3093_s15 = sld [smem:[#allocation39_spill]]  ;;  %v314_v6 = vstv %s3088_s11 }
  0x8e   :  { %3086 = sst [smem:[#allocation85_spill]] %s1935_s10  ;;  %s3094_s7 = sld [smem:[#allocation40_spill]] }
  0x8f   :  { %v160_v35 = vstv %s3057_s16  ;;  %s1876_s16 = sld [smem:[#allocation6 + $0x50]]  ;;  %3089 = sst [smem:[#allocation87_spill]] %s1943_s20 }
  0x90   :  { %v162_v21 = vmul.f32 %v160_v35, %v1518_v4  ;;  %v161_v32 = vmul.f32 %v160_v35, %v1520_v5  ;;  %3091 = sst [smem:[#allocation88_spill]] %s1945_s18  ;;  %s1961_s29 = sld [smem:[#allocation6 + $0x60]]  ;;  %v1965_v4 = vadd.f32 %v149_v41, %v115_v51  ;;  %v1967_v5 = vadd.f32 %v155_v20, %v121_v0 }
  0x91   :  { %3087 = sst [smem:[#allocation86_spill]] %s1937_s13  ;;  %s1963_s28 = sld [smem:[#allocation6 + $0x61]]  ;;  %v326_v22 = vstv %s3092_s25 }
  0x92   :  { %v1930_v47 = vadd.f32 %v162_v21, %v128_v28  ;;  %v1969_v61 = vadd.f32 %v161_v32, %v127_v52  ;;  %s1972_s9 = sld [smem:[#allocation6 + $0x62]]  ;;  %v320_v16 = vstv %s3090_s8  ;;  %s1980_s18 = sld [smem:[#allocation6 + $0x64]]  ;;  %v356_v28 = vstv %s1658_s0 }
  0x93   :  { %v332_v23 = vstv %s3093_s15  ;;  %s1982_s13 = sld [smem:[#allocation6 + $0x65]]  ;;  %s1990_s25 = sld [smem:[#allocation6 + $0x67]] }
  0x94   :  { %v338_v24 = vstv %s3094_s7  ;;  %s1998_s22 = sld [smem:[#allocation6 + $0x69]]  ;;  %s2006_s4 = sld [smem:[#allocation6 + $0x6b]] }
  0x95   :  { %3065 = sst [smem:[#allocation73_spill]] %s1876_s16  ;;  %s3085_s16 = sld [smem:[#allocation35_spill]] }
  0x96   :  { %3095 = sst [smem:[#allocation89_spill]] %s1961_s29  ;;  %s2014_s29 = sld [smem:[#allocation6 + $0x6d]] }
  0x97   :  { %3096 = sst [smem:[#allocation90_spill]] %s1963_s28  ;;  %s2020_s10 = sld [smem:[#allocation6 + $0x6e]]  ;;  %v168_v32 = vpop.permute.xlu1 %167  ;;  %v166_v49 = vpop.permute.xlu0 %165 }
  0x98   :  { %3097 = sst [smem:[#allocation91_spill]] %s1972_s9  ;;  %s2022_s9 = sld [smem:[#allocation6 + $0x6f]] }
  0x99   :  { %3103 = sst [smem:[#allocation93_spill]] %s1980_s18  ;;  %s2028_s15 = sld [smem:[#allocation6 + $0x70]] }
  0x9a   :  { %3105 = sst [smem:[#allocation94_spill]] %s1982_s13  ;;  %s1996_s13 = sld [smem:[#allocation6 + $0x68]] }
  0x9b   :  { %v289_v63 = vstv %s3085_s16  ;;  %s1974_s16 = sld [smem:[#allocation6 + $0x63]]  ;;  %3111 = sst [smem:[#allocation96_spill]] %s1990_s25  ;;  %v174_v42 = vpop.permute.xlu1 %173  ;;  %v172_v50 = vpop.permute.xlu0 %171 }
  0x9c   :  { %3117 = sst [smem:[#allocation98_spill]] %s1998_s22  ;;  %s2004_s25 = sld [smem:[#allocation6 + $0x6a]]  ;;  %v181_v38 = vsel %vm179_vm0, %v168_v32, %v174_v42  ;;  %v184_v1 = vsel %vm179_vm0, %v174_v42, %v168_v32  ;;  %v180_v20 = vsel %vm179_vm0, %v166_v49, %v172_v50  ;;  %v183_v52 = vsel %vm179_vm0, %v172_v50, %v166_v49 }
  0x9d   :  { %3122 = sst [smem:[#allocation99_spill]] %s2006_s4  ;;  %s2012_s22 = sld [smem:[#allocation6 + $0x6c]]  ;;  %v224_v0 = vmul.f32 %v223_v8, %v181_v38  ;;  %v225_v21 = vmul.f32 %v223_v8, %v184_v1  ;;  %v230_v41 = vmul.f32 %v229_v9, %v181_v38  ;;  %v231_v42 = vmul.f32 %v229_v9, %v184_v1 }
  0x9e   :  { %s2030_s18 = sld [smem:[#allocation6 + $0x71]]  ;;  %s2036_s7 = sld [smem:[#allocation6 + $0x72]]  ;;  %v236_v32 = vmul.f32 %v235_v11, %v181_v38  ;;  %v237_v51 = vmul.f32 %v235_v11, %v184_v1  ;;  %v242_v40 = vmul.f32 %v241_v12, %v181_v38  ;;  %v243_v3 = vmul.f32 %v241_v12, %v184_v1 }
  0x9f   :  { %s2044_s20 = sld [smem:[#allocation6 + $0x74]]  ;;  %s2046_s12 = sld [smem:[#allocation6 + $0x75]]  ;;  %v248_v8 = vmul.f32 %v247_v39, %v181_v38  ;;  %v249_v46 = vmul.f32 %v247_v39, %v184_v1  ;;  %v254_v37 = vmul.f32 %v253_v36, %v181_v38  ;;  %v188_v49 = vmul.f32 %v187_v43, %v180_v20 }
  0xa0   :  { %3115 = sst [smem:[#allocation97_spill]] %s1996_s13  ;;  %s2054_s30 = sld [smem:[#allocation6 + $0x77]]  ;;  %v189_v50 = vmul.f32 %v187_v43, %v183_v52  ;;  %v194_v9 = vmul.f32 %v193_v44, %v180_v20  ;;  %v195_v11 = vmul.f32 %v193_v44, %v183_v52  ;;  %v200_v35 = vmul.f32 %v199_v45, %v180_v20 }
  0xa1   :  { %3099 = sst [smem:[#allocation92_spill]] %s1974_s16  ;;  %s1988_s16 = sld [smem:[#allocation6 + $0x66]]  ;;  %v201_v12 = vmul.f32 %v199_v45, %v183_v52  ;;  %v206_v39 = vmul.f32 %v205_v2, %v180_v20  ;;  %v207_v38 = vmul.f32 %v205_v2, %v183_v52  ;;  %v255_v34 = vmul.f32 %v253_v36, %v184_v1  ;;  %v176_v1 = vpop.permute.xlu1 %175 }
  0xa2   :  { %s2062_s5 = sld [smem:[#allocation6 + $0x79]]  ;;  %s2068_s21 = sld [smem:[#allocation6 + $0x7a]]  ;;  %v190_v43 = vadd.f32 %v188_v49, %v1952_v59  ;;  %v191_v33 = vadd.f32 %v189_v50, %v1843_v10  ;;  %v197_v17 = vadd.f32 %v195_v11, %v1856_v18  ;;  %v196_v44 = vadd.f32 %v194_v9, %v1955_v60  ;;  %v170_v18 = vpop.permute.xlu0 %169 }
  0xa3   :  { %s2070_s0 = sld [smem:[#allocation6 + $0x7b]]  ;;  %s2078_s24 = sld [smem:[#allocation6 + $0x7d]]  ;;  %v202_v14 = vadd.f32 %v200_v35, %v1958_v62  ;;  %v203_v13 = vadd.f32 %v201_v12, %v1891_v15  ;;  %v209_v45 = vadd.f32 %v207_v38, %v1900_v27  ;;  %v212_v2 = vmul.f32 %v211_v48, %v180_v20 }
  0xa4   :  { %3129 = sst [smem:[#allocation100_spill]] %s2036_s7  ;;  %s2093_s3 = sld [smem:[#allocation6 + $0x80]]  ;;  %v213_v36 = vmul.f32 %v211_v48, %v183_v52  ;;  %v218_v59 = vmul.f32 %v217_v53, %v180_v20  ;;  %v219_v10 = vmul.f32 %v217_v53, %v183_v52  ;;  %v208_v60 = vadd.f32 %v206_v39, %v1965_v4 }
  0xa5   :  { %3135 = sst [smem:[#allocation102_spill]] %s2044_s20  ;;  %s2095_s14 = sld [smem:[#allocation6 + $0x81]]  ;;  %v227_v49 = vadd.f32 %v225_v21, %v191_v33  ;;  %v233_v62 = vadd.f32 %v231_v42, %v197_v17  ;;  %v239_v15 = vadd.f32 %v237_v51, %v203_v13  ;;  %v214_v27 = vadd.f32 %v212_v2, %v1967_v5 }
  0xa6   :  { %3137 = sst [smem:[#allocation103_spill]] %s2046_s12  ;;  %s2060_s12 = sld [smem:[#allocation6 + $0x78]]  ;;  %v215_v35 = vadd.f32 %v213_v36, %v1902_v31  ;;  %v221_v48 = vadd.f32 %v219_v10, %v1930_v47  ;;  %v245_v20 = vadd.f32 %v243_v3, %v209_v45  ;;  %v220_v53 = vadd.f32 %v218_v59, %v1969_v61 }
  0xa7   :  { %3109 = sst [smem:[#allocation95_spill]] %s1988_s16  ;;  %s2038_s16 = sld [smem:[#allocation6 + $0x73]]  ;;  %v182_v4 = vsel %vm179_vm0, %v170_v18, %v176_v1  ;;  %v185_v13 = vsel %vm179_vm0, %v176_v1, %v170_v18  ;;  %v226_v17 = vadd.f32 %v224_v0, %v190_v43  ;;  %v232_v31 = vadd.f32 %v230_v41, %v196_v44  ;;  %v301_v0 = vpop.permute.xlu1 %300 }
  0xa8   :  { %3142 = sst [smem:[#allocation104_spill]] %s2054_s30  ;;  %s2101_s19 = sld [smem:[#allocation6 + $0x82]]  ;;  %v251_v5 = vadd.f32 %v249_v46, %v215_v35  ;;  %v257_v33 = vadd.f32 %v255_v34, %v221_v48  ;;  %v238_v21 = vadd.f32 %v236_v32, %v202_v14  ;;  %v244_v51 = vadd.f32 %v242_v40, %v208_v60 }
  0xa9   :  { %3147 = sst [smem:[#allocation106_spill]] %s2062_s5  ;;  %s2103_s30 = sld [smem:[#allocation6 + $0x83]]  ;;  %v250_v47 = vadd.f32 %v248_v8, %v214_v27  ;;  %v260_v3 = vmul.f32 %v259_v54, %v182_v4  ;;  %v261_v52 = vmul.f32 %v259_v54, %v185_v13  ;;  %v266_v61 = vmul.f32 %v265_v55, %v182_v4  ;;  %v295_v54 = vpop.permute.xlu0 %294 }
  0xaa   :  { %3150 = sst [smem:[#allocation107_spill]] %s2068_s21  ;;  %s2086_s21 = sld [smem:[#allocation6 + $0x7f]]  ;;  %v267_v42 = vmul.f32 %v265_v55, %v185_v13  ;;  %v272_v50 = vmul.f32 %v271_v56, %v182_v4  ;;  %v273_v46 = vmul.f32 %v271_v56, %v185_v13  ;;  %v256_v34 = vadd.f32 %v254_v37, %v220_v53 }
  0xab   :  { %3152 = sst [smem:[#allocation108_spill]] %s2070_s0  ;;  %s2084_s0 = sld [smem:[#allocation6 + $0x7e]]  ;;  %v262_v14 = vadd.f32 %v260_v3, %v226_v17  ;;  %v278_v40 = vmul.f32 %v277_v57, %v182_v4  ;;  %v279_v41 = vmul.f32 %v277_v57, %v185_v13  ;;  %v263_v32 = vadd.f32 %v261_v52, %v227_v49  ;;  %v303_v35 = vpop.permute.xlu1 %302 }
  0xac   :  { %3146 = sst [smem:[#allocation105_spill]] %s2060_s12  ;;  %s2076_s12 = sld [smem:[#allocation6 + $0x7c]]  ;;  %v268_v8 = vadd.f32 %v266_v61, %v232_v31  ;;  %v269_v55 = vadd.f32 %v267_v42, %v233_v62  ;;  %v274_v9 = vadd.f32 %v272_v50, %v238_v21  ;;  %v275_v11 = vadd.f32 %v273_v46, %v239_v15 }
  0xad   :  { %3131 = sst [smem:[#allocation101_spill]] %s2038_s16  ;;  %s2052_s16 = sld [smem:[#allocation6 + $0x76]]  ;;  %v280_v12 = vadd.f32 %v278_v40, %v244_v51  ;;  %v284_v56 = vmul.f32 %v283_v58, %v182_v4  ;;  %v285_v37 = vmul.f32 %v283_v58, %v185_v13  ;;  %v290_v57 = vmul.f32 %v289_v63, %v182_v4  ;;  %v297_v48 = vpop.permute.xlu0 %296 }
  0xae   :  { %3164 = sst [smem:[#allocation110_spill]] %s2095_s14  ;;  %s3166_s2 = sld [smem:[#allocation100_spill]]  ;;  %v291_v39 = vmul.f32 %v289_v63, %v185_v13  ;;  %v307_v38 = vsel %vm306_vm1, %v295_v54, %v301_v0  ;;  %v310_v43 = vsel %vm306_vm1, %v301_v0, %v295_v54  ;;  %v281_v44 = vadd.f32 %v279_v41, %v245_v20 }
  0xaf   :  { %3165 = sst [smem:[#allocation111_spill]] %s2103_s30  ;;  %s3168_s27 = sld [smem:[#allocation101_spill]]  ;;  %v286_v45 = vadd.f32 %v284_v56, %v250_v47  ;;  %v315_v2 = vmul.f32 %v314_v6, %v307_v38  ;;  %v316_v36 = vmul.f32 %v314_v6, %v310_v43  ;;  %v287_v58 = vadd.f32 %v285_v37, %v251_v5 }
  0xb0   :  { %s2109_s1 = sld [smem:[#allocation6 + $0x84]]  ;;  %s2111_s5 = sld [smem:[#allocation6 + $0x85]]  ;;  %v292_v59 = vadd.f32 %v290_v57, %v256_v34  ;;  %v321_v63 = vmul.f32 %v320_v16, %v307_v38  ;;  %v322_v10 = vmul.f32 %v320_v16, %v310_v43  ;;  %v293_v1 = vadd.f32 %v291_v39, %v257_v33 }
  0xb1   :  { %3160 = sst [smem:[#allocation109_spill]] %s2084_s0  ;;  %s2117_s17 = sld [smem:[#allocation6 + $0x86]]  ;;  %v317_v18 = vadd.f32 %v315_v2, %v262_v14  ;;  %v327_v60 = vmul.f32 %v326_v22, %v307_v38  ;;  %v328_v49 = vmul.f32 %v326_v22, %v310_v43  ;;  %v318_v62 = vadd.f32 %v316_v36, %v263_v32  ;;  %v305_v14 = vpop.permute.xlu1 %304  ;;  %v299_v40 = vpop.permute.xlu0 %298 }
  0xb2   :  { %s3171_s8 = sld [smem:[#allocation104_spill]]  ;;  %s2119_s26 = sld [smem:[#allocation6 + $0x87]]  ;;  %v323_v15 = vadd.f32 %v321_v63, %v268_v8  ;;  %v333_v6 = vmul.f32 %v332_v23, %v307_v38  ;;  %v334_v27 = vmul.f32 %v332_v23, %v310_v43  ;;  %v324_v20 = vadd.f32 %v322_v10, %v269_v55 }
  0xb3   :  { %s3174_s13 = sld [smem:[#allocation106_spill]]  ;;  %s3176_s7 = sld [smem:[#allocation108_spill]]  ;;  %v329_v16 = vadd.f32 %v327_v60, %v274_v9  ;;  %v339_v53 = vmul.f32 %v338_v24, %v307_v38  ;;  %v340_v4 = vmul.f32 %v338_v24, %v310_v43  ;;  %v330_v22 = vadd.f32 %v328_v49, %v275_v11 }
  0xb4   :  { %s2125_s23 = sld [smem:[#allocation6 + $0x88]]  ;;  %s2127_s4 = sld [smem:[#allocation6 + $0x89]]  ;;  %v335_v13 = vadd.f32 %v333_v6, %v280_v12  ;;  %v345_v17 = vmul.f32 %v344_v25, %v307_v38  ;;  %v346_v23 = vmul.f32 %v344_v25, %v310_v43  ;;  %v336_v5 = vadd.f32 %v334_v27, %v281_v44 }
  0xb5   :  { %v341_v33 = vadd.f32 %v339_v53, %v286_v45  ;;  %v308_v31 = vsel %vm306_vm1, %v297_v48, %v303_v35  ;;  %v311_v21 = vsel %vm306_vm1, %v303_v35, %v297_v48  ;;  %v342_v51 = vadd.f32 %v340_v4, %v287_v58  ;;  %s3207_s11 = sld [smem:[#allocation47_spill]]  ;;  %s3208_s6 = sld [smem:[#allocation48_spill]]  ;;  %v422_v53 = vpop.permute.xlu0 %421 }
  0xb6   :  { %3167 = sst [smem:[#allocation100_spill]] %s2109_s1  ;;  %v347_v47 = vadd.f32 %v345_v17, %v292_v59  ;;  %v351_v24 = vmul.f32 %v350_v26, %v308_v31  ;;  %v352_v3 = vmul.f32 %v350_v26, %v311_v21  ;;  %v357_v52 = vmul.f32 %v356_v28, %v308_v31  ;;  %s3209_s28 = sld [smem:[#allocation49_spill]] }
  0xb7   :  { %v358_v25 = vmul.f32 %v356_v28, %v311_v21  ;;  %v363_v61 = vmul.f32 %v362_v29, %v308_v31  ;;  %v364_v42 = vmul.f32 %v362_v29, %v311_v21  ;;  %v348_v50 = vadd.f32 %v346_v23, %v293_v1  ;;  %s3210_s1 = sld [smem:[#allocation50_spill]]  ;;  %s3213_s30 = sld [smem:[#allocation51_spill]] }
  0xb8   :  { %3172 = sst [smem:[#allocation101_spill]] %s2119_s26  ;;  %v353_v46 = vadd.f32 %v351_v24, %v317_v18  ;;  %v369_v34 = vmul.f32 %v368_v30, %v308_v31  ;;  %v370_v26 = vmul.f32 %v368_v30, %v311_v21  ;;  %v354_v28 = vadd.f32 %v352_v3, %v318_v62  ;;  %s3216_s0 = sld [smem:[#allocation52_spill]] }
  0xb9   :  { %v359_v41 = vadd.f32 %v357_v52, %v323_v15  ;;  %v360_v0 = vadd.f32 %v358_v25, %v324_v20  ;;  %v365_v54 = vadd.f32 %v363_v61, %v329_v16  ;;  %v366_v29 = vadd.f32 %v364_v42, %v330_v22  ;;  %v428_v16 = vpop.permute.xlu1 %427  ;;  %s3224_s26 = sld [smem:[#allocation54_spill]]  ;;  %s3225_s14 = sld [smem:[#allocation55_spill]] }
  0xba   :  { %3177 = sst [smem:[#allocation104_spill]] %s2125_s23  ;;  %v371_v32 = vadd.f32 %v369_v34, %v335_v13  ;;  %v375_v8 = vmul.f32 %v374_v7, %v308_v31  ;;  %v376_v55 = vmul.f32 %v374_v7, %v311_v21  ;;  %v309_v56 = vsel %vm306_vm1, %v299_v40, %v305_v14  ;;  %s3219_s23 = sld [smem:[#allocation53_spill]] }
  0xbb   :  { %v3211_v9 = vstv %s3207_s11  ;;  %v312_v37 = vsel %vm306_vm1, %v305_v14, %v299_v40  ;;  %v372_v57 = vadd.f32 %v370_v26, %v336_v5  ;;  %v3214_v38 = vstv %s3208_s6  ;;  %s3228_s20 = sld [smem:[#allocation17_spill]]  ;;  %s3231_s11 = sld [smem:[#allocation56_spill]] }
  0xbc   :  { %v381_v30 = vmul.f32 %v3211_v9, %v308_v31  ;;  %v3212_v11 = vmov %v3211_v9  ;;  %v377_v39 = vadd.f32 %v375_v8, %v341_v33  ;;  %v387_v43 = vmul.f32 %v3214_v38, %v309_v56  ;;  %s3236_s6 = sld [smem:[#allocation18_spill]] }
  0xbd   :  { %v382_v12 = vmul.f32 %v3212_v11, %v311_v21  ;;  %v3215_v44 = vmov %v3214_v38  ;;  %v378_v7 = vadd.f32 %v376_v55, %v342_v51  ;;  %v3217_v36 = vstv %s3209_s28  ;;  %s3239_s28 = sld [smem:[#allocation57_spill]] }
  0xbe   :  { %v388_v45 = vmul.f32 %v3215_v44, %v312_v37  ;;  %v383_v2 = vadd.f32 %v381_v30, %v347_v47  ;;  %v393_v58 = vmul.f32 %v3217_v36, %v309_v56  ;;  %v3218_v59 = vmov %v3217_v36 }
  0xbf   :  { %v394_v63 = vmul.f32 %v3218_v59, %v312_v37  ;;  %v384_v10 = vadd.f32 %v382_v12, %v348_v50  ;;  %v389_v1 = vadd.f32 %v387_v43, %v353_v46  ;;  %v3220_v18 = vstv %s3210_s1  ;;  %s3242_s1 = sld [smem:[#allocation19_spill]] }
  0xc0   :  { %v399_v60 = vmul.f32 %v3220_v18, %v309_v56  ;;  %v3221_v49 = vmov %v3220_v18  ;;  %v390_v15 = vadd.f32 %v388_v45, %v354_v28  ;;  %v395_v6 = vadd.f32 %v393_v58, %v359_v41 }
  0xc1   :  { %v400_v62 = vmul.f32 %v3221_v49, %v312_v37  ;;  %v3222_v27 = vstv %s3213_s30  ;;  %v396_v4 = vadd.f32 %v394_v63, %v360_v0  ;;  %v3226_v13 = vstv %s3216_s0  ;;  %s3243_s30 = sld [smem:[#allocation58_spill]]  ;;  %s3247_s0 = sld [smem:[#allocation59_spill]] }
  0xc2   :  { %v405_v35 = vmul.f32 %v3222_v27, %v309_v56  ;;  %v3223_v48 = vmov %v3222_v27  ;;  %v401_v22 = vadd.f32 %v399_v60, %v365_v54  ;;  %v411_v17 = vmul.f32 %v3226_v13, %v309_v56 }
  0xc3   :  { %v406_v20 = vmul.f32 %v3223_v48, %v312_v37  ;;  %v3227_v23 = vmov %v3226_v13  ;;  %v402_v33 = vadd.f32 %v400_v62, %v366_v29  ;;  %v3229_v21 = vstv %s3219_s23  ;;  %s3249_s23 = sld [smem:[#allocation60_spill]] }
  0xc4   :  { %v412_v5 = vmul.f32 %v3227_v23, %v312_v37  ;;  %v407_v31 = vadd.f32 %v405_v35, %v371_v32  ;;  %v417_v51 = vmul.f32 %v3229_v21, %v309_v56  ;;  %v3230_v47 = vmov %v3229_v21 }
  0xc5   :  { %v418_v24 = vmul.f32 %v3230_v47, %v312_v37  ;;  %v408_v3 = vadd.f32 %v406_v20, %v372_v57  ;;  %v413_v52 = vadd.f32 %v411_v17, %v377_v39  ;;  %v434_v25 = vsel %vm433_vm2, %v422_v53, %v428_v16  ;;  %v430_v37 = vpop.permute.xlu1 %429  ;;  %v424_v57 = vpop.permute.xlu0 %423 }
  0xc6   :  { %v437_v61 = vsel %vm433_vm2, %v428_v16, %v422_v53  ;;  %v414_v42 = vadd.f32 %v412_v5, %v378_v7  ;;  %v419_v50 = vadd.f32 %v417_v51, %v383_v2  ;;  %v3232_v46 = vstv %s3224_s26  ;;  %s3253_s26 = sld [smem:[#allocation61_spill]] }
  0xc7   :  { %v442_v34 = vmul.f32 %v3232_v46, %v434_v25  ;;  %v3233_v26 = vmov %v3232_v46  ;;  %v3234_v40 = vstv %s3225_s14  ;;  %v3237_v54 = vstv %s3228_s20  ;;  %s3255_s14 = sld [smem:[#allocation20_spill]]  ;;  %s3260_s20 = sld [smem:[#allocation21_spill]] }
  0xc8   :  { %v443_v14 = vmul.f32 %v3233_v26, %v437_v61  ;;  %v448_v28 = vmul.f32 %v3234_v40, %v434_v25  ;;  %v3235_v41 = vmov %v3234_v40  ;;  %v454_v29 = vmul.f32 %v3237_v54, %v434_v25 }
  0xc9   :  { %v449_v0 = vmul.f32 %v3235_v41, %v437_v61  ;;  %v3238_v32 = vmov %v3237_v54  ;;  %v420_v55 = vadd.f32 %v418_v24, %v384_v10  ;;  %v444_v9 = vadd.f32 %v442_v34, %v389_v1 }
  0xca   :  { %v455_v8 = vmul.f32 %v3238_v32, %v437_v61  ;;  %v3240_v30 = vstv %s3231_s11  ;;  %v445_v39 = vadd.f32 %v443_v14, %v390_v15  ;;  %v450_v38 = vadd.f32 %v448_v28, %v395_v6  ;;  %s3261_s11 = sld [smem:[#allocation22_spill]] }
  0xcb   :  { %v460_v11 = vmul.f32 %v3240_v30, %v434_v25  ;;  %v3241_v12 = vmov %v3240_v30  ;;  %v451_v43 = vadd.f32 %v449_v0, %v396_v4  ;;  %v456_v44 = vadd.f32 %v454_v29, %v401_v22 }
  0xcc   :  { %v461_v56 = vmul.f32 %v3241_v12, %v437_v61  ;;  %v457_v45 = vadd.f32 %v455_v8, %v402_v33  ;;  %v3244_v2 = vstv %s3236_s6  ;;  %v3246_v63 = vstv %s3239_s28  ;;  %s3264_s6 = sld [smem:[#allocation62_spill]]  ;;  %s3267_s28 = sld [smem:[#allocation63_spill]] }
  0xcd   :  { %v462_v7 = vadd.f32 %v460_v11, %v407_v31  ;;  %v466_v36 = vmul.f32 %v3244_v2, %v434_v25  ;;  %v3245_v58 = vmov %v3244_v2  ;;  %v472_v10 = vmul.f32 %v3246_v63, %v434_v25 }
  0xce   :  { %v467_v59 = vmul.f32 %v3245_v58, %v437_v61  ;;  %v3248_v1 = vmov %v3246_v63  ;;  %v435_v60 = vsel %vm433_vm2, %v424_v57, %v430_v37  ;;  %v438_v49 = vsel %vm433_vm2, %v430_v37, %v424_v57 }
  0xcf   :  { %v473_v18 = vmul.f32 %v3248_v1, %v437_v61  ;;  %v463_v62 = vadd.f32 %v461_v56, %v408_v3  ;;  %v468_v15 = vadd.f32 %v466_v36, %v413_v52  ;;  %v3250_v6 = vstv %s3242_s1  ;;  %v432_v61 = vpop.permute.xlu1 %431  ;;  %s3272_s1 = sld [smem:[#allocation64_spill]] }
  0xd0   :  { %v478_v27 = vmul.f32 %v3250_v6, %v435_v60  ;;  %v3251_v35 = vmov %v3250_v6  ;;  %v469_v20 = vadd.f32 %v467_v59, %v414_v42  ;;  %v474_v16 = vadd.f32 %v472_v10, %v419_v50  ;;  %v426_v42 = vpop.permute.xlu0 %425 }
  0xd1   :  { %v479_v48 = vmul.f32 %v3251_v35, %v438_v49  ;;  %v3252_v53 = vstv %s3243_s30  ;;  %v475_v17 = vadd.f32 %v473_v18, %v420_v55  ;;  %v3256_v5 = vstv %s3247_s0  ;;  %s3275_s30 = sld [smem:[#allocation65_spill]]  ;;  %s3278_s0 = sld [smem:[#allocation66_spill]] }
  0xd2   :  { %v484_v4 = vmul.f32 %v3252_v53, %v435_v60  ;;  %v3254_v22 = vmov %v3252_v53  ;;  %v480_v23 = vadd.f32 %v478_v27, %v444_v9  ;;  %v490_v33 = vmul.f32 %v3256_v5, %v435_v60 }
  0xd3   :  { %v485_v13 = vmul.f32 %v3254_v22, %v438_v49  ;;  %v3257_v31 = vmov %v3256_v5  ;;  %v481_v51 = vadd.f32 %v479_v48, %v445_v39  ;;  %v3258_v24 = vstv %s3249_s23  ;;  %s3279_s23 = sld [smem:[#allocation67_spill]] }
  0xd4   :  { %v491_v21 = vmul.f32 %v3257_v31, %v438_v49  ;;  %v486_v47 = vadd.f32 %v484_v4, %v450_v38  ;;  %v496_v3 = vmul.f32 %v3258_v24, %v435_v60  ;;  %v3259_v52 = vmov %v3258_v24 }
  0xd5   :  { %v497_v25 = vmul.f32 %v3259_v52, %v438_v49  ;;  %v487_v50 = vadd.f32 %v485_v13, %v451_v43  ;;  %v492_v46 = vadd.f32 %v490_v33, %v456_v44  ;;  %v3262_v34 = vstv %s3253_s26  ;;  %s3282_s26 = sld [smem:[#allocation23_spill]] }
  0xd6   :  { %v502_v26 = vmul.f32 %v3262_v34, %v435_v60  ;;  %v3263_v14 = vmov %v3262_v34  ;;  %v493_v28 = vadd.f32 %v491_v21, %v457_v45  ;;  %v498_v41 = vadd.f32 %v496_v3, %v462_v7 }
  0xd7   :  { %v503_v40 = vmul.f32 %v3263_v14, %v438_v49  ;;  %v3265_v0 = vstv %s3255_s14  ;;  %v499_v8 = vadd.f32 %v497_v25, %v463_v62  ;;  %v436_v9 = vsel %vm433_vm2, %v426_v42, %v432_v61  ;;  %v549_v62 = vpop.permute.xlu0 %548  ;;  %s3285_s14 = sld [smem:[#allocation68_spill]] }
  0xd8   :  { %v508_v54 = vmul.f32 %v3265_v0, %v435_v60  ;;  %v3266_v29 = vmov %v3265_v0  ;;  %v504_v55 = vadd.f32 %v502_v26, %v468_v15  ;;  %v439_v30 = vsel %vm433_vm2, %v432_v61, %v426_v42 }
  0xd9   :  { %v509_v32 = vmul.f32 %v3266_v29, %v438_v49  ;;  %v505_v11 = vadd.f32 %v503_v40, %v469_v20  ;;  %v3268_v56 = vstv %s3260_s20  ;;  %v3270_v38 = vstv %s3261_s11  ;;  %v555_v49 = vpop.permute.xlu1 %554  ;;  %s3288_s20 = sld [smem:[#allocation69_spill]]  ;;  %s3291_s11 = sld [smem:[#allocation70_spill]] }
  0xda   :  { %v510_v12 = vadd.f32 %v508_v54, %v474_v16  ;;  %v514_v37 = vmul.f32 %v3268_v56, %v436_v9  ;;  %v3269_v57 = vmov %v3268_v56  ;;  %v520_v43 = vmul.f32 %v3270_v38, %v436_v9 }
  0xdb   :  { %v515_v39 = vmul.f32 %v3269_v57, %v439_v30  ;;  %v3271_v44 = vmov %v3270_v38  ;;  %v3273_v7 = vstv %s3264_s6  ;;  %v511_v59 = vadd.f32 %v509_v32, %v475_v17  ;;  %s3296_s6 = sld [smem:[#allocation71_spill]] }
  0xdc   :  { %v521_v45 = vmul.f32 %v3271_v44, %v439_v30  ;;  %v526_v2 = vmul.f32 %v3273_v7, %v436_v9  ;;  %v3274_v36 = vmov %v3273_v7  ;;  %v516_v63 = vadd.f32 %v514_v37, %v480_v23 }
  0xdd   :  { %v527_v58 = vmul.f32 %v3274_v36, %v439_v30  ;;  %v3276_v10 = vstv %s3267_s28  ;;  %v517_v15 = vadd.f32 %v515_v39, %v481_v51  ;;  %v522_v6 = vadd.f32 %v520_v43, %v486_v47  ;;  %s3297_s28 = sld [smem:[#allocation72_spill]] }
  0xde   :  { %v532_v1 = vmul.f32 %v3276_v10, %v436_v9  ;;  %v3277_v18 = vmov %v3276_v10  ;;  %v523_v27 = vadd.f32 %v521_v45, %v487_v50  ;;  %v528_v35 = vadd.f32 %v526_v2, %v492_v46 }
  0xdf   :  { %v533_v60 = vmul.f32 %v3277_v18, %v439_v30  ;;  %v529_v48 = vadd.f32 %v527_v58, %v493_v28  ;;  %v3280_v16 = vstv %s3272_s1  ;;  %v3283_v13 = vstv %s3275_s30  ;;  %s3300_s1 = sld [smem:[#allocation73_spill]]  ;;  %s3303_s30 = sld [smem:[#allocation74_spill]] }
  0xe0   :  { %v534_v20 = vadd.f32 %v532_v1, %v498_v41  ;;  %v538_v53 = vmul.f32 %v3280_v16, %v436_v9  ;;  %v3281_v4 = vmov %v3280_v16  ;;  %v544_v17 = vmul.f32 %v3283_v13, %v436_v9 }
  0xe1   :  { %v539_v22 = vmul.f32 %v3281_v4, %v439_v30  ;;  %v3284_v23 = vmov %v3283_v13  ;;  %v561_v33 = vsel %vm560_vm3, %v549_v62, %v555_v49  ;;  %v564_v31 = vsel %vm560_vm3, %v555_v49, %v549_v62 }
  0xe2   :  { %v545_v5 = vmul.f32 %v3284_v23, %v439_v30  ;;  %v535_v21 = vadd.f32 %v533_v60, %v499_v8  ;;  %v540_v51 = vadd.f32 %v538_v53, %v504_v55  ;;  %v3286_v47 = vstv %s3278_s0  ;;  %v557_v30 = vpop.permute.xlu1 %556  ;;  %s3309_s0 = sld [smem:[#allocation75_spill]] }
  0xe3   :  { %v569_v24 = vmul.f32 %v3286_v47, %v561_v33  ;;  %v3287_v3 = vmov %v3286_v47  ;;  %v541_v25 = vadd.f32 %v539_v22, %v505_v11  ;;  %v546_v61 = vadd.f32 %v544_v17, %v510_v12  ;;  %v551_v11 = vpop.permute.xlu0 %550 }
  0xe4   :  { %v570_v52 = vmul.f32 %v3287_v3, %v564_v31  ;;  %v3289_v42 = vstv %s3279_s23  ;;  %v547_v26 = vadd.f32 %v545_v5, %v511_v59  ;;  %v3292_v40 = vstv %s3282_s26  ;;  %s3311_s23 = sld [smem:[#allocation76_spill]]  ;;  %s3314_s26 = sld [smem:[#allocation77_spill]] }
  0xe5   :  { %v575_v50 = vmul.f32 %v3289_v42, %v561_v33  ;;  %v3290_v46 = vmov %v3289_v42  ;;  %v571_v14 = vadd.f32 %v569_v24, %v516_v63  ;;  %v581_v28 = vmul.f32 %v3292_v40, %v561_v33 }
  0xe6   :  { %v576_v34 = vmul.f32 %v3290_v46, %v564_v31  ;;  %v3293_v41 = vmov %v3292_v40  ;;  %v572_v54 = vadd.f32 %v570_v52, %v517_v15  ;;  %v3294_v32 = vstv %s3285_s14  ;;  %s3315_s14 = sld [smem:[#allocation78_spill]] }
  0xe7   :  { %v582_v0 = vmul.f32 %v3293_v41, %v564_v31  ;;  %v577_v29 = vadd.f32 %v575_v50, %v522_v6  ;;  %v587_v8 = vmul.f32 %v3294_v32, %v561_v33  ;;  %v3295_v55 = vmov %v3294_v32 }
  0xe8   :  { %v588_v9 = vmul.f32 %v3295_v55, %v564_v31  ;;  %v578_v12 = vadd.f32 %v576_v34, %v523_v27  ;;  %v583_v56 = vadd.f32 %v581_v28, %v528_v35  ;;  %v3298_v37 = vstv %s3288_s20  ;;  %s3318_s20 = sld [smem:[#allocation79_spill]] }
  0xe9   :  { %v593_v57 = vmul.f32 %v3298_v37, %v561_v33  ;;  %v3299_v39 = vmov %v3298_v37  ;;  %v584_v43 = vadd.f32 %v582_v0, %v529_v48  ;;  %v589_v44 = vadd.f32 %v587_v8, %v534_v20 }
  0xea   :  { %v594_v38 = vmul.f32 %v3299_v39, %v564_v31  ;;  %v3301_v45 = vstv %s3291_s11  ;;  %v590_v58 = vadd.f32 %v588_v9, %v535_v21  ;;  %v562_v63 = vsel %vm560_vm3, %v551_v11, %v557_v30  ;;  %v553_v21 = vpop.permute.xlu0 %552  ;;  %s3321_s11 = sld [smem:[#allocation80_spill]] }
  0xeb   :  { %v599_v7 = vmul.f32 %v3301_v45, %v561_v33  ;;  %v3302_v2 = vmov %v3301_v45  ;;  %v595_v59 = vadd.f32 %v593_v57, %v540_v51  ;;  %v565_v10 = vsel %vm560_vm3, %v557_v30, %v551_v11 }
  0xec   :  { %v600_v36 = vmul.f32 %v3302_v2, %v564_v31  ;;  %v596_v1 = vadd.f32 %v594_v38, %v541_v25  ;;  %v3304_v60 = vstv %s3296_s6  ;;  %v3306_v6 = vstv %s3297_s28  ;;  %v559_v31 = vpop.permute.xlu1 %558  ;;  %s3324_s6 = sld [smem:[#allocation81_spill]]  ;;  %s3327_s28 = sld [smem:[#allocation82_spill]] }
  0xed   :  { %v601_v18 = vadd.f32 %v599_v7, %v546_v61  ;;  %v605_v49 = vmul.f32 %v3304_v60, %v562_v63  ;;  %v3305_v62 = vmov %v3304_v60  ;;  %v611_v27 = vmul.f32 %v3306_v6, %v562_v63 }
  0xee   :  { %v606_v15 = vmul.f32 %v3305_v62, %v565_v10  ;;  %v3307_v35 = vmov %v3306_v6  ;;  %v3308_v20 = vstv %s3300_s1  ;;  %v602_v22 = vadd.f32 %v600_v36, %v547_v26  ;;  %s3332_s1 = sld [smem:[#allocation83_spill]] }
  0xef   :  { %v612_v48 = vmul.f32 %v3307_v35, %v565_v10  ;;  %v617_v16 = vmul.f32 %v3308_v20, %v562_v63  ;;  %v3310_v53 = vmov %v3308_v20  ;;  %v607_v13 = vadd.f32 %v605_v49, %v571_v14 }
  0xf0   :  { %v618_v4 = vmul.f32 %v3310_v53, %v565_v10  ;;  %v3312_v17 = vstv %s3303_s30  ;;  %v608_v51 = vadd.f32 %v606_v15, %v572_v54  ;;  %v613_v47 = vadd.f32 %v611_v27, %v577_v29  ;;  %s3333_s30 = sld [smem:[#allocation84_spill]] }
  0xf1   :  { %v623_v23 = vmul.f32 %v3312_v17, %v562_v63  ;;  %v3313_v5 = vmov %v3312_v17  ;;  %v614_v24 = vadd.f32 %v612_v48, %v578_v12  ;;  %v619_v3 = vadd.f32 %v617_v16, %v583_v56 }
  0xf2   :  { %v624_v33 = vmul.f32 %v3313_v5, %v565_v10  ;;  %v620_v52 = vadd.f32 %v618_v4, %v584_v43  ;;  %v3316_v61 = vstv %s3309_s0  ;;  %v3319_v34 = vstv %s3311_s23  ;;  %s3336_s0 = sld [smem:[#allocation85_spill]]  ;;  %s3339_s23 = sld [smem:[#allocation86_spill]] }
  0xf3   :  { %v625_v25 = vadd.f32 %v623_v23, %v589_v44  ;;  %v629_v42 = vmul.f32 %v3316_v61, %v562_v63  ;;  %v3317_v50 = vmov %v3316_v61  ;;  %v635_v26 = vmul.f32 %v3319_v34, %v562_v63 }
  0xf4   :  { %v630_v46 = vmul.f32 %v3317_v50, %v565_v10  ;;  %v3320_v14 = vmov %v3319_v34  ;;  %v563_v28 = vsel %vm560_vm3, %v553_v21, %v559_v31  ;;  %v566_v41 = vsel %vm560_vm3, %v559_v31, %v553_v21 }
  0xf5   :  { %v636_v40 = vmul.f32 %v3320_v14, %v565_v10  ;;  %v626_v0 = vadd.f32 %v624_v33, %v590_v58  ;;  %v631_v54 = vadd.f32 %v629_v42, %v595_v59  ;;  %v3322_v29 = vstv %s3314_s26  ;;  %v682_v10 = vpop.permute.xlu1 %681  ;;  %s3344_s26 = sld [smem:[#allocation87_spill]] }
  0xf6   :  { %v641_v32 = vmul.f32 %v3322_v29, %v563_v28  ;;  %v3323_v8 = vmov %v3322_v29  ;;  %v632_v9 = vadd.f32 %v630_v46, %v596_v1  ;;  %v637_v30 = vadd.f32 %v635_v26, %v601_v18  ;;  %v676_v1 = vpop.permute.xlu0 %675 }
  0xf7   :  { %v642_v55 = vmul.f32 %v3323_v8, %v566_v41  ;;  %v3325_v11 = vstv %s3315_s14  ;;  %v638_v57 = vadd.f32 %v636_v40, %v602_v22  ;;  %v3328_v38 = vstv %s3318_s20  ;;  %s3347_s14 = sld [smem:[#allocation88_spill]]  ;;  %s3350_s20 = sld [smem:[#allocation89_spill]] }
  0xf8   :  { %v647_v12 = vmul.f32 %v3325_v11, %v563_v28  ;;  %v3326_v56 = vmov %v3325_v11  ;;  %v643_v39 = vadd.f32 %v641_v32, %v607_v13  ;;  %v653_v43 = vmul.f32 %v3328_v38, %v563_v28 }
  0xf9   :  { %v648_v37 = vmul.f32 %v3326_v56, %v566_v41  ;;  %v3329_v44 = vmov %v3328_v38  ;;  %v644_v7 = vadd.f32 %v642_v55, %v608_v51  ;;  %v3330_v36 = vstv %s3321_s11  ;;  %s3351_s11 = sld [smem:[#allocation90_spill]] }
  0xfa   :  { %v654_v45 = vmul.f32 %v3329_v44, %v566_v41  ;;  %v649_v2 = vadd.f32 %v647_v12, %v613_v47  ;;  %v659_v58 = vmul.f32 %v3330_v36, %v563_v28  ;;  %v3331_v59 = vmov %v3330_v36 }
  0xfb   :  { %v660_v63 = vmul.f32 %v3331_v59, %v566_v41  ;;  %v650_v18 = vadd.f32 %v648_v37, %v614_v24  ;;  %v655_v60 = vadd.f32 %v653_v43, %v619_v3  ;;  %v3334_v49 = vstv %s3324_s6  ;;  %s3355_s6 = sld [smem:[#allocation91_spill]] }
  0xfc   :  { %v665_v62 = vmul.f32 %v3334_v49, %v563_v28  ;;  %v3335_v15 = vmov %v3334_v49  ;;  %v656_v27 = vadd.f32 %v654_v45, %v620_v52  ;;  %v661_v35 = vadd.f32 %v659_v58, %v625_v25 }
  0xfd   :  { %v666_v6 = vmul.f32 %v3335_v15, %v566_v41  ;;  %v3337_v48 = vstv %s3327_s28  ;;  %v662_v4 = vadd.f32 %v660_v63, %v626_v0  ;;  %v688_v13 = vsel %vm687_vm4, %v676_v1, %v682_v10  ;;  %v678_v0 = vpop.permute.xlu0 %677  ;;  %s3357_s28 = sld [smem:[#allocation92_spill]] }
  0xfe   :  { %v671_v20 = vmul.f32 %v3337_v48, %v563_v28  ;;  %v3338_v16 = vmov %v3337_v48  ;;  %v667_v22 = vadd.f32 %v665_v62, %v631_v54  ;;  %v691_v17 = vsel %vm687_vm4, %v682_v10, %v676_v1 }
  0xff   :  { %v672_v53 = vmul.f32 %v3338_v16, %v566_v41  ;;  %v668_v23 = vadd.f32 %v666_v6, %v632_v9  ;;  %v3340_v33 = vstv %s3332_s1  ;;  %v3342_v47 = vstv %s3333_s30  ;;  %v684_v41 = vpop.permute.xlu1 %683  ;;  %s3361_s1 = sld [smem:[#allocation93_spill]]  ;;  %s3363_s30 = sld [smem:[#allocation94_spill]] }
 0x100   :  { %v673_v5 = vadd.f32 %v671_v20, %v637_v30  ;;  %v696_v31 = vmul.f32 %v3340_v33, %v688_v13  ;;  %v3341_v21 = vmov %v3340_v33  ;;  %v702_v24 = vmul.f32 %v3342_v47, %v688_v13 }
 0x101   :  { %v697_v51 = vmul.f32 %v3341_v21, %v691_v17  ;;  %v3343_v3 = vmov %v3342_v47  ;;  %v3345_v25 = vstv %s3336_s0  ;;  %v674_v46 = vadd.f32 %v672_v53, %v638_v57  ;;  %s3368_s0 = sld [smem:[#allocation95_spill]] }
 0x102   :  { %v703_v52 = vmul.f32 %v3343_v3, %v691_v17  ;;  %v708_v61 = vmul.f32 %v3345_v25, %v688_v13  ;;  %v3346_v42 = vmov %v3345_v25  ;;  %v698_v34 = vadd.f32 %v696_v31, %v643_v39 }
 0x103   :  { %v709_v50 = vmul.f32 %v3346_v42, %v691_v17  ;;  %v3348_v26 = vstv %s3339_s23  ;;  %v699_v54 = vadd.f32 %v697_v51, %v644_v7  ;;  %v704_v29 = vadd.f32 %v702_v24, %v649_v2  ;;  %s3369_s23 = sld [smem:[#allocation96_spill]] }
 0x104   :  { %v714_v14 = vmul.f32 %v3348_v26, %v688_v13  ;;  %v3349_v40 = vmov %v3348_v26  ;;  %v705_v32 = vadd.f32 %v703_v52, %v650_v18  ;;  %v710_v8 = vadd.f32 %v708_v61, %v655_v60 }
 0x105   :  { %v715_v28 = vmul.f32 %v3349_v40, %v691_v17  ;;  %v711_v55 = vadd.f32 %v709_v50, %v656_v27  ;;  %v3352_v30 = vstv %s3344_s26  ;;  %v3354_v37 = vstv %s3347_s14  ;;  %s3372_s26 = sld [smem:[#allocation97_spill]]  ;;  %s3375_s14 = sld [smem:[#allocation98_spill]] }
 0x106   :  { %v716_v9 = vadd.f32 %v714_v14, %v661_v35  ;;  %v720_v11 = vmul.f32 %v3352_v30, %v688_v13  ;;  %v3353_v12 = vmov %v3352_v30  ;;  %v726_v57 = vmul.f32 %v3354_v37, %v688_v13 }
 0x107   :  { %v721_v56 = vmul.f32 %v3353_v12, %v691_v17  ;;  %v3356_v39 = vmov %v3354_v37  ;;  %v689_v43 = vsel %vm687_vm4, %v678_v0, %v684_v41  ;;  %v692_v44 = vsel %vm687_vm4, %v684_v41, %v678_v0 }
 0x108   :  { %v727_v38 = vmul.f32 %v3356_v39, %v691_v17  ;;  %v717_v45 = vadd.f32 %v715_v28, %v662_v4  ;;  %v722_v7 = vadd.f32 %v720_v11, %v667_v22  ;;  %v3358_v2 = vstv %s3350_s20  ;;  %v686_v17 = vpop.permute.xlu1 %685  ;;  %s3382_s20 = sld [smem:[#allocation99_spill]] }
 0x109   :  { %v732_v36 = vmul.f32 %v3358_v2, %v689_v43  ;;  %v3359_v58 = vmov %v3358_v2  ;;  %v723_v63 = vadd.f32 %v721_v56, %v668_v23  ;;  %v728_v10 = vadd.f32 %v726_v57, %v673_v5  ;;  %v680_v23 = vpop.permute.xlu0 %679 }
 0x10a   :  { %v733_v59 = vmul.f32 %v3359_v58, %v692_v44  ;;  %v3360_v1 = vstv %s3351_s11  ;;  %v729_v62 = vadd.f32 %v727_v38, %v674_v46  ;;  %v3364_v6 = vstv %s3355_s6  ;;  %s2764_s11 = sld [smem:[#allocation6 + $0x95]]  ;;  %s2766_s6 = sld [smem:[#allocation6 + $0x96]] }
 0x10b   :  { %v738_v18 = vmul.f32 %v3360_v1, %v689_v43  ;;  %v3362_v60 = vmov %v3360_v1  ;;  %v734_v15 = vadd.f32 %v732_v36, %v698_v34  ;;  %v744_v27 = vmul.f32 %v3364_v6, %v689_v43 }
 0x10c   :  { %v739_v49 = vmul.f32 %v3362_v60, %v692_v44  ;;  %v3365_v35 = vmov %v3364_v6  ;;  %v735_v20 = vadd.f32 %v733_v59, %v699_v54  ;;  %v3366_v53 = vstv %s3357_s28  ;;  %s2772_s28 = sld [smem:[#allocation6 + $0x97]] }
 0x10d   :  { %v745_v48 = vmul.f32 %v3365_v35, %v692_v44  ;;  %v740_v16 = vadd.f32 %v738_v18, %v704_v29  ;;  %v750_v4 = vmul.f32 %v3366_v53, %v689_v43  ;;  %v3367_v22 = vmov %v3366_v53 }
 0x10e   :  { %v751_v13 = vmul.f32 %v3367_v22, %v692_v44  ;;  %v741_v5 = vadd.f32 %v739_v49, %v705_v32  ;;  %v746_v33 = vadd.f32 %v744_v27, %v710_v8  ;;  %v3370_v31 = vstv %s3361_s1  ;;  %s2774_s1 = sld [smem:[#allocation6 + $0x98]] }
 0x10f   :  { %v756_v21 = vmul.f32 %v3370_v31, %v689_v43  ;;  %v3371_v51 = vmov %v3370_v31  ;;  %v747_v24 = vadd.f32 %v745_v48, %v711_v55  ;;  %v752_v3 = vadd.f32 %v750_v4, %v716_v9 }
 0x110   :  { %v757_v47 = vmul.f32 %v3371_v51, %v692_v44  ;;  %v3373_v52 = vstv %s3363_s30  ;;  %v753_v50 = vadd.f32 %v751_v13, %v717_v45  ;;  %v690_v34 = vsel %vm687_vm4, %v680_v23, %v686_v17  ;;  %v803_v45 = vpop.permute.xlu0 %802  ;;  %s2776_s30 = sld [smem:[#allocation6 + $0x99]] }
 0x111   :  { %v762_v25 = vmul.f32 %v3373_v52, %v689_v43  ;;  %v3374_v61 = vmov %v3373_v52  ;;  %v758_v46 = vadd.f32 %v756_v21, %v722_v7  ;;  %v693_v26 = vsel %vm687_vm4, %v686_v17, %v680_v23 }
 0x112   :  { %v763_v42 = vmul.f32 %v3374_v61, %v692_v44  ;;  %v759_v14 = vadd.f32 %v757_v47, %v723_v63  ;;  %v3376_v28 = vstv %s3368_s0  ;;  %v3378_v29 = vstv %s3369_s23  ;;  %v809_v44 = vpop.permute.xlu1 %808  ;;  %s2783_s0 = sld [smem:[#allocation6 + $0x9a]]  ;;  %s2785_s23 = sld [smem:[#allocation6 + $0x9b]] }
 0x113   :  { %v764_v40 = vadd.f32 %v762_v25, %v728_v10  ;;  %v768_v41 = vmul.f32 %v3376_v28, %v690_v34  ;;  %v3377_v0 = vmov %v3376_v28  ;;  %v774_v32 = vmul.f32 %v3378_v29, %v690_v34 }
 0x114   :  { %v769_v54 = vmul.f32 %v3377_v0, %v693_v26  ;;  %v3379_v8 = vmov %v3378_v29  ;;  %v3380_v9 = vstv %s3372_s26  ;;  %v765_v56 = vadd.f32 %v763_v42, %v729_v62  ;;  %s2789_s26 = sld [smem:[#allocation6 + $0x9c]] }
 0x115   :  { %v775_v55 = vmul.f32 %v3379_v8, %v693_v26  ;;  %v780_v30 = vmul.f32 %v3380_v9, %v690_v34  ;;  %v3381_v11 = vmov %v3380_v9  ;;  %v770_v37 = vadd.f32 %v768_v41, %v734_v15 }
 0x116   :  { %v781_v12 = vmul.f32 %v3381_v11, %v693_v26  ;;  %v3383_v57 = vstv %s3375_s14  ;;  %v771_v7 = vadd.f32 %v769_v54, %v735_v20  ;;  %v776_v2 = vadd.f32 %v774_v32, %v740_v16  ;;  %s2794_s14 = sld [smem:[#allocation6 + $0x9d]] }
 0x117   :  { %v786_v39 = vmul.f32 %v3383_v57, %v690_v34  ;;  %v3384_v38 = vmov %v3383_v57  ;;  %v777_v36 = vadd.f32 %v775_v55, %v741_v5  ;;  %v782_v58 = vadd.f32 %v780_v30, %v746_v33 }
 0x118   :  { %v787_v43 = vmul.f32 %v3384_v38, %v693_v26  ;;  %v783_v59 = vadd.f32 %v781_v12, %v747_v24  ;;  %v3385_v10 = vstv %s2004_s25  ;;  %v3387_v49 = vstv %s3382_s20  ;;  %s2714_s25 = sld [smem:[#allocation6 + $0x8d]]  ;;  %s2796_s20 = sld [smem:[#allocation6 + $0x9e]] }
 0x119   :  { %v788_v63 = vadd.f32 %v786_v39, %v752_v3  ;;  %v792_v1 = vmul.f32 %v3385_v10, %v690_v34  ;;  %v3386_v18 = vmov %v3385_v10  ;;  %v798_v62 = vmul.f32 %v3387_v49, %v690_v34 }
 0x11a   :  { %v793_v60 = vmul.f32 %v3386_v18, %v693_v26  ;;  %v3388_v15 = vmov %v3387_v49  ;;  %v815_v27 = vsel %vm814_vm5, %v803_v45, %v809_v44  ;;  %v818_v35 = vsel %vm814_vm5, %v809_v44, %v803_v45 }
 0x11b   :  { %v799_v6 = vmul.f32 %v3388_v15, %v693_v26  ;;  %v789_v48 = vadd.f32 %v787_v43, %v753_v50  ;;  %v794_v20 = vadd.f32 %v792_v1, %v758_v46  ;;  %v3389_v16 = vstv %s2012_s22  ;;  %v811_v26 = vpop.permute.xlu1 %810  ;;  %s3399_s22 = sld [smem:[#allocation102_spill]] }
 0x11c   :  { %v823_v53 = vmul.f32 %v3389_v16, %v815_v27  ;;  %v3390_v4 = vmov %v3389_v16  ;;  %v795_v13 = vadd.f32 %v793_v60, %v759_v14  ;;  %v800_v17 = vadd.f32 %v798_v62, %v764_v40  ;;  %v805_v14 = vpop.permute.xlu0 %804 }
 0x11d   :  { %v824_v22 = vmul.f32 %v3390_v4, %v818_v35  ;;  %v3391_v23 = vstv %s2014_s29  ;;  %v801_v21 = vadd.f32 %v799_v6, %v765_v56  ;;  %v3393_v47 = vstv %s2020_s10  ;;  %s3402_s29 = sld [smem:[#allocation103_spill]]  ;;  %s3448_s10 = sld [smem:[#allocation104_spill]] }
 0x11e   :  { %v829_v5 = vmul.f32 %v3391_v23, %v815_v27  ;;  %v3392_v33 = vmov %v3391_v23  ;;  %v825_v51 = vadd.f32 %v823_v53, %v770_v37  ;;  %v835_v24 = vmul.f32 %v3393_v47, %v815_v27 }
 0x11f   :  { %v830_v31 = vmul.f32 %v3392_v33, %v818_v35  ;;  %v3394_v3 = vmov %v3393_v47  ;;  %v826_v25 = vadd.f32 %v824_v22, %v771_v7  ;;  %v3395_v42 = vstv %s2022_s9  ;;  %s2754_s9 = sld [smem:[#allocation6 + $0x93]] }
 0x120   :  { %v836_v52 = vmul.f32 %v3394_v3, %v818_v35  ;;  %v831_v61 = vadd.f32 %v829_v5, %v776_v2  ;;  %v841_v50 = vmul.f32 %v3395_v42, %v815_v27  ;;  %v3396_v46 = vmov %v3395_v42 }
 0x121   :  { %v842_v34 = vmul.f32 %v3396_v46, %v818_v35  ;;  %v832_v40 = vadd.f32 %v830_v31, %v777_v36  ;;  %v837_v28 = vadd.f32 %v835_v24, %v782_v58  ;;  %v3397_v41 = vstv %s2028_s15  ;;  %s3425_s15 = sld [smem:[#allocation109_spill]] }
 0x122   :  { %v847_v0 = vmul.f32 %v3397_v41, %v815_v27  ;;  %v3398_v54 = vmov %v3397_v41  ;;  %v838_v32 = vadd.f32 %v836_v52, %v783_v59  ;;  %v843_v8 = vadd.f32 %v841_v50, %v788_v63 }
 0x123   :  { %v848_v29 = vmul.f32 %v3398_v54, %v818_v35  ;;  %v3400_v55 = vstv %s2030_s18  ;;  %v844_v12 = vadd.f32 %v842_v34, %v789_v48  ;;  %v816_v37 = vsel %vm814_vm5, %v805_v14, %v811_v26  ;;  %v807_v48 = vpop.permute.xlu0 %806  ;;  %s2702_s18 = sld [smem:[#allocation6 + $0x8b]] }
 0x124   :  { %v853_v9 = vmul.f32 %v3400_v55, %v815_v27  ;;  %v3401_v30 = vmov %v3400_v55  ;;  %v849_v56 = vadd.f32 %v847_v0, %v794_v20  ;;  %v819_v57 = vsel %vm814_vm5, %v811_v26, %v805_v14 }
 0x125   :  { %v854_v11 = vmul.f32 %v3401_v30, %v818_v35  ;;  %v850_v39 = vadd.f32 %v848_v29, %v795_v13  ;;  %v3403_v43 = vstv %s3166_s2  ;;  %v3405_v2 = vstv %s3168_s27  ;;  %v813_v35 = vpop.permute.xlu1 %812  ;;  %s3411_s2 = sld [smem:[#allocation105_spill]]  ;;  %s3414_s27 = sld [smem:[#allocation107_spill]] }
 0x126   :  { %v855_v38 = vadd.f32 %v853_v9, %v800_v17  ;;  %v859_v44 = vmul.f32 %v3403_v43, %v816_v37  ;;  %v3404_v45 = vmov %v3403_v43  ;;  %v865_v36 = vmul.f32 %v3405_v2, %v816_v37 }
 0x127   :  { %v860_v7 = vmul.f32 %v3404_v45, %v819_v57  ;;  %v3406_v58 = vmov %v3405_v2  ;;  %v3407_v63 = vstv %s3399_s22  ;;  %v856_v60 = vadd.f32 %v854_v11, %v801_v21  ;;  %s2799_s22 = sld [smem:[#allocation6 + $0x9f]] }
 0x128   :  { %v866_v59 = vmul.f32 %v3406_v58, %v819_v57  ;;  %v871_v10 = vmul.f32 %v3407_v63, %v816_v37  ;;  %v3408_v1 = vmov %v3407_v63  ;;  %v861_v49 = vadd.f32 %v859_v44, %v825_v51 }
 0x129   :  { %v872_v18 = vmul.f32 %v3408_v1, %v819_v57  ;;  %v3409_v62 = vstv %s3402_s29  ;;  %v862_v20 = vadd.f32 %v860_v7, %v826_v25  ;;  %v867_v16 = vadd.f32 %v865_v36, %v831_v61  ;;  %s2805_s29 = sld [smem:[#allocation6 + $0xa0]] }
 0x12a   :  { %v877_v15 = vmul.f32 %v3409_v62, %v816_v37  ;;  %v3410_v6 = vmov %v3409_v62  ;;  %v868_v53 = vadd.f32 %v866_v59, %v832_v40  ;;  %v873_v4 = vadd.f32 %v871_v10, %v837_v28 }
 0x12b   :  { %v878_v27 = vmul.f32 %v3410_v6, %v819_v57  ;;  %v874_v22 = vadd.f32 %v872_v18, %v838_v32  ;;  %v3412_v17 = vstv %s2052_s16  ;;  %v3415_v31 = vstv %s3171_s8  ;;  %s3445_s16 = sld [smem:[#allocation101_spill]]  ;;  %s2720_s8 = sld [smem:[#allocation6 + $0x8e]] }
 0x12c   :  { %v879_v13 = vadd.f32 %v877_v15, %v843_v8  ;;  %v883_v23 = vmul.f32 %v3412_v17, %v816_v37  ;;  %v3413_v5 = vmov %v3412_v17  ;;  %v889_v21 = vmul.f32 %v3415_v31, %v816_v37 }
 0x12d   :  { %v884_v33 = vmul.f32 %v3413_v5, %v819_v57  ;;  %v3416_v51 = vmov %v3415_v31  ;;  %v817_v24 = vsel %vm814_vm5, %v807_v48, %v813_v35  ;;  %v820_v3 = vsel %vm814_vm5, %v813_v35, %v807_v48 }
 0x12e   :  { %v890_v47 = vmul.f32 %v3416_v51, %v819_v57  ;;  %v880_v52 = vadd.f32 %v878_v27, %v844_v12  ;;  %v885_v25 = vadd.f32 %v883_v23, %v849_v56  ;;  %v3417_v61 = vstv %s3411_s2  ;;  %v936_v57 = vpop.permute.xlu1 %935  ;;  %s2807_s2 = sld [smem:[#allocation6 + $0xa1]] }
 0x12f   :  { %v895_v42 = vmul.f32 %v3417_v61, %v817_v24  ;;  %v3418_v50 = vmov %v3417_v61  ;;  %v886_v34 = vadd.f32 %v884_v33, %v850_v39  ;;  %v891_v26 = vadd.f32 %v889_v21, %v855_v38  ;;  %v930_v39 = vpop.permute.xlu0 %929 }
 0x130   :  { %v896_v46 = vmul.f32 %v3418_v50, %v820_v3  ;;  %v3419_v14 = vstv %s3174_s13  ;;  %v892_v0 = vadd.f32 %v890_v47, %v856_v60  ;;  %v3421_v29 = vstv %s3414_s27  ;;  %s2750_s13 = sld [smem:[#allocation6 + $0x92]]  ;;  %s1472_s27 = smov [#allocation7]  }
 0x131   :  { %v901_v40 = vmul.f32 %v3419_v14, %v817_v24  ;;  %v3420_v28 = vmov %v3419_v14  ;;  %v897_v54 = vadd.f32 %v895_v42, %v861_v49  ;;  %v907_v32 = vmul.f32 %v3421_v29, %v817_v24 }
 0x132   :  { %v902_v41 = vmul.f32 %v3420_v28, %v820_v3  ;;  %v3422_v8 = vmov %v3421_v29  ;;  %v898_v9 = vadd.f32 %v896_v46, %v862_v20  ;;  %v3423_v11 = vstv %s3176_s7  ;;  %s3430_s7 = sld [smem:[#allocation110_spill]] }
 0x133   :  { %v908_v55 = vmul.f32 %v3422_v8, %v820_v3  ;;  %v903_v30 = vadd.f32 %v901_v40, %v867_v16  ;;  %v913_v12 = vmul.f32 %v3423_v11, %v817_v24  ;;  %v3424_v56 = vmov %v3423_v11 }
 0x134   :  { %v914_v37 = vmul.f32 %v3424_v56, %v820_v3  ;;  %v904_v38 = vadd.f32 %v902_v41, %v868_v53  ;;  %v909_v43 = vadd.f32 %v907_v32, %v873_v4  ;;  %v3426_v44 = vstv %s2076_s12  ;;  %s2722_s12 = sld [smem:[#allocation6 + $0x8f]] }
 0x135   :  { %v919_v45 = vmul.f32 %v3426_v44, %v817_v24  ;;  %v3427_v7 = vmov %v3426_v44  ;;  %v910_v36 = vadd.f32 %v908_v55, %v874_v22  ;;  %v915_v58 = vadd.f32 %v913_v12, %v879_v13 }
 0x136   :  { %v920_v2 = vmul.f32 %v3427_v7, %v820_v3  ;;  %v3428_v59 = vstv %s2078_s24  ;;  %v916_v18 = vadd.f32 %v914_v37, %v880_v52  ;;  %v942_v49 = vsel %vm941_vm6, %v930_v39, %v936_v57  ;;  %s3437_s24 = sld [smem:[#allocation111_spill]]  ;;  %v932_v52 = vpop.permute.xlu0 %931 }
 0x137   :  { %v925_v63 = vmul.f32 %v3428_v59, %v817_v24  ;;  %v3429_v10 = vmov %v3428_v59  ;;  %v921_v60 = vadd.f32 %v919_v45, %v885_v25  ;;  %v945_v62 = vsel %vm941_vm6, %v936_v57, %v930_v39 }
 0x138   :  { %v926_v1 = vmul.f32 %v3429_v10, %v820_v3  ;;  %v922_v15 = vadd.f32 %v920_v2, %v886_v34  ;;  %v3431_v27 = vstv %s3425_s15  ;;  %v3433_v16 = vstv %s2086_s21  ;;  %v938_v3 = vpop.permute.xlu1 %937  ;;  %s3440_s21 = sld [smem:[#allocation100_spill]]  ;;  %s1205_s15 = sshll.u32 %s1472_s27, 4  ;;  %s1206_s15 = int_to_ptr.vmem [resolvable:$true] %s1205_s15 }
 0x139   :  { %v927_v6 = vadd.f32 %v925_v63, %v891_v26  ;;  %v950_v35 = vmul.f32 %v3431_v27, %v942_v49  ;;  %v3432_v48 = vmov %v3431_v27  ;;  %v956_v53 = vmul.f32 %v3433_v16, %v942_v49  ;;  %p1437_p0 = scmp.lt.s32.totalorder %s1206_s15, %s1206_s15 }
 0x13a   :  { %v951_v20 = vmul.f32 %v3432_v48, %v945_v62  ;;  %v3434_v4 = vmov %v3433_v16  ;;  %v3435_v13 = vstv %s2093_s3  ;;  %v928_v33 = vadd.f32 %v926_v1, %v892_v0  ;;  %s2700_s3 = sld [smem:[#allocation6 + $0x8a]] }
 0x13b   :  { %v957_v22 = vmul.f32 %v3434_v4, %v945_v62  ;;  %v962_v17 = vmul.f32 %v3435_v13, %v942_v49  ;;  %v3436_v23 = vmov %v3435_v13  ;;  %v952_v31 = vadd.f32 %v950_v35, %v897_v54 }
 0x13c   :  { %v963_v5 = vmul.f32 %v3436_v23, %v945_v62  ;;  %v3438_v21 = vstv %s3430_s7  ;;  %v953_v25 = vadd.f32 %v951_v20, %v898_v9  ;;  %v958_v61 = vadd.f32 %v956_v53, %v903_v30  ;;  %v940_v13 = vpop.permute.xlu1 %939  ;;  %s1432_s7 = scalar_lea.vmem %s1206_s15, 1536 }
 0x13d   :  { %v968_v51 = vmul.f32 %v3438_v21, %v942_v49  ;;  %v3439_v47 = vmov %v3438_v21  ;;  %v959_v42 = vadd.f32 %v957_v22, %v904_v38  ;;  %v964_v50 = vadd.f32 %v962_v17, %v909_v43  ;;  %v934_v17 = vpop.permute.xlu0 %933  ;;  %p1433_p13 = scmp.ne.s32.totalorder %s1206_s15, %s1432_s7  ;;  %p1438_p1 = scmp.lt.s32.totalorder %s1432_s7, %s1432_s7 }
 0x13e   :  { %v969_v24 = vmul.f32 %v3439_v47, %v945_v62  ;;  %v965_v46 = vadd.f32 %v963_v5, %v910_v36  ;;  %v3441_v26 = vstv %s2101_s19  ;;  %v3443_v41 = vstv %s3437_s24  ;;  %s2712_s19 = sld [smem:[#allocation6 + $0x8c]] }
 0x13f   :  { %v970_v34 = vadd.f32 %v968_v51, %v915_v58  ;;  %v974_v14 = vmul.f32 %v3441_v26, %v942_v49  ;;  %v3442_v40 = vmov %v3441_v26  ;;  %v980_v0 = vmul.f32 %v3443_v41, %v942_v49  ;;  %p1439_p2 = por %p1438_p1, %p1437_p0 }
 0x140   :  { %v975_v28 = vmul.f32 %v3442_v40, %v945_v62  ;;  %v3444_v54 = vmov %v3443_v41  ;;  %v943_v32 = vsel %vm941_vm6, %v932_v52, %v938_v3  ;;  %v946_v8 = vsel %vm941_vm6, %v938_v3, %v932_v52 }
 0x141   :  { %v981_v29 = vmul.f32 %v3444_v54, %v945_v62  ;;  %v971_v55 = vadd.f32 %v969_v24, %v916_v18  ;;  %v976_v9 = vadd.f32 %v974_v14, %v921_v60  ;;  %v3446_v30 = vstv %s3440_s21  ;;  %p1440_p3 = pnand %p1439_p2, %p1433_p13 }
 0x142   :  { %v986_v11 = vmul.f32 %v3446_v30, %v943_v32  ;;  %v3447_v12 = vmov %v3446_v30  ;;  %v977_v37 = vadd.f32 %v975_v28, %v922_v15  ;;  %v982_v57 = vadd.f32 %v980_v0, %v927_v6 }
 0x143   :  { %v987_v56 = vmul.f32 %v3447_v12, %v946_v8  ;;  %v3449_v39 = vstv %s2111_s5  ;;  %v983_v45 = vadd.f32 %v981_v29, %v928_v33  ;;  %v3451_v2 = vstv %s2117_s17  ;;  %s2742_s5 = sld [smem:[#allocation6 + $0x90]]  ;;  %s2748_s17 = sld [smem:[#allocation6 + $0x91]] }
 0x144   :  { %v992_v38 = vmul.f32 %v3449_v39, %v943_v32  ;;  %v3450_v43 = vmov %v3449_v39  ;;  %v988_v7 = vadd.f32 %v986_v11, %v952_v31  ;;  %v998_v36 = vmul.f32 %v3451_v2, %v943_v32  ;;  %v1057_v39 = vpop.permute.xlu0 %1056 }
 0x145   :  { %v993_v44 = vmul.f32 %v3450_v43, %v946_v8  ;;  %v3452_v58 = vmov %v3451_v2  ;;  %v989_v63 = vadd.f32 %v987_v56, %v953_v25  ;;  %v3453_v1 = vstv %s3445_s16 }
 0x146   :  { %v999_v59 = vmul.f32 %v3452_v58, %v946_v8  ;;  %v994_v10 = vadd.f32 %v992_v38, %v958_v61  ;;  %v1004_v18 = vmul.f32 %v3453_v1, %v943_v32  ;;  %v3454_v60 = vmov %v3453_v1 }
 0x147   :  { %v1005_v49 = vmul.f32 %v3454_v60, %v946_v8  ;;  %v995_v62 = vadd.f32 %v993_v44, %v959_v42  ;;  %v1000_v15 = vadd.f32 %v998_v36, %v964_v50  ;;  %v3455_v6 = vstv %s3448_s10 }
 0x148   :  { %v1010_v27 = vmul.f32 %v3455_v6, %v943_v32  ;;  %v3456_v35 = vmov %v3455_v6  ;;  %v1001_v20 = vadd.f32 %v999_v59, %v965_v46  ;;  %v1006_v16 = vadd.f32 %v1004_v18, %v970_v34 }
 0x149   :  { %v1011_v48 = vmul.f32 %v3456_v35, %v946_v8  ;;  %v1007_v53 = vadd.f32 %v1005_v49, %v971_v55  ;;  %v3457_v4 = vstv %s2127_s4  ;;  %v1021_v31 = vstv %s2700_s3  ;;  %s2762_s4 = sld [smem:[#allocation6 + $0x94]] }
 0x14a   :  { %v1016_v22 = vmul.f32 %v3457_v4, %v943_v32  ;;  %v1012_v23 = vadd.f32 %v1010_v27, %v976_v9  ;;  %v3458_v5 = vmov %v3457_v4  ;;  %v1027_v21 = vstv %s2702_s18 }
 0x14b   :  { %v1017_v33 = vmul.f32 %v3458_v5, %v946_v8  ;;  %v1013_v51 = vadd.f32 %v1011_v48, %v977_v37  ;;  %v1033_v24 = vstv %s2712_s19  ;;  %v1039_v3 = vstv %s2714_s25 }
 0x14c   :  { %v1018_v47 = vadd.f32 %v1016_v22, %v982_v57  ;;  %v1045_v52 = vstv %s2720_s8  ;;  %v1051_v25 = vstv %s2722_s12  ;;  %v944_v61 = vsel %vm941_vm6, %v934_v17, %v940_v13  ;;  %v1063_v57 = vpop.permute.xlu1 %1062 }
 0x14d   :  { %v947_v42 = vsel %vm941_vm6, %v940_v13, %v934_v17  ;;  %v1022_v50 = vmul.f32 %v1021_v31, %v944_v61  ;;  %v1028_v34 = vmul.f32 %v1027_v21, %v944_v61  ;;  %v1034_v14 = vmul.f32 %v1033_v24, %v944_v61 }
 0x14e   :  { %v1023_v46 = vmul.f32 %v1021_v31, %v947_v42  ;;  %v1029_v26 = vmul.f32 %v1027_v21, %v947_v42  ;;  %v1035_v40 = vmul.f32 %v1033_v24, %v947_v42  ;;  %v1040_v28 = vmul.f32 %v1039_v3, %v944_v61  ;;  %v1059_v21 = vpop.permute.xlu0 %1058 }
 0x14f   :  { %v1041_v41 = vmul.f32 %v1039_v3, %v947_v42  ;;  %v1019_v0 = vadd.f32 %v1017_v33, %v983_v45  ;;  %v1024_v54 = vadd.f32 %v1022_v50, %v988_v7  ;;  %v1030_v32 = vadd.f32 %v1028_v34, %v994_v10 }
 0x150   :  { %v1025_v29 = vadd.f32 %v1023_v46, %v989_v63  ;;  %v1031_v8 = vadd.f32 %v1029_v26, %v995_v62  ;;  %v1036_v55 = vadd.f32 %v1034_v14, %v1000_v15  ;;  %v1037_v9 = vadd.f32 %v1035_v40, %v1001_v20  ;;  %v1065_v31 = vpop.permute.xlu1 %1064 }
 0x151   :  { %v1042_v30 = vadd.f32 %v1040_v28, %v1006_v16  ;;  %v1043_v11 = vadd.f32 %v1041_v41, %v1007_v53  ;;  %v1046_v12 = vmul.f32 %v1045_v52, %v944_v61  ;;  %v1047_v56 = vmul.f32 %v1045_v52, %v947_v42 }
 0x152   :  { %v1052_v37 = vmul.f32 %v1051_v25, %v944_v61  ;;  %v1076_v38 = vstv %s2742_s5  ;;  %v1082_v43 = vstv %s2748_s17  ;;  %v1088_v44 = vstv %s2750_s13 }
 0x153   :  { %v1048_v45 = vadd.f32 %v1046_v12, %v1012_v23  ;;  %v1049_v7 = vadd.f32 %v1047_v56, %v1013_v51  ;;  %v1053_v2 = vmul.f32 %v1051_v25, %v947_v42  ;;  %v1094_v58 = vstv %s2754_s9 }
 0x154   :  { %v1054_v36 = vadd.f32 %v1052_v37, %v1018_v47  ;;  %v1100_v59 = vstv %s2762_s4  ;;  %v1106_v63 = vstv %s2764_s11  ;;  %v1069_v10 = vsel %vm1068_vm7, %v1057_v39, %v1063_v57 }
 0x155   :  { %v1072_v1 = vsel %vm1068_vm7, %v1063_v57, %v1057_v39  ;;  %v1077_v18 = vmul.f32 %v1076_v38, %v1069_v10  ;;  %v1083_v60 = vmul.f32 %v1082_v43, %v1069_v10  ;;  %v1089_v49 = vmul.f32 %v1088_v44, %v1069_v10 }
 0x156   :  { %v1078_v62 = vmul.f32 %v1076_v38, %v1072_v1  ;;  %v1084_v15 = vmul.f32 %v1082_v43, %v1072_v1  ;;  %v1090_v6 = vmul.f32 %v1088_v44, %v1072_v1  ;;  %v1095_v27 = vmul.f32 %v1094_v58, %v1069_v10  ;;  %v1067_v44 = vpop.permute.xlu1 %1066 }
 0x157   :  { %v1055_v35 = vadd.f32 %v1053_v2, %v1019_v0  ;;  %v1079_v48 = vadd.f32 %v1077_v18, %v1024_v54  ;;  %v1085_v20 = vadd.f32 %v1083_v60, %v1030_v32  ;;  %v1096_v16 = vmul.f32 %v1094_v58, %v1072_v1 }
 0x158   :  { %v1080_v53 = vadd.f32 %v1078_v62, %v1025_v29  ;;  %v1086_v4 = vadd.f32 %v1084_v15, %v1031_v8  ;;  %v1091_v22 = vadd.f32 %v1089_v49, %v1036_v55  ;;  %v1092_v13 = vadd.f32 %v1090_v6, %v1037_v9 }
 0x159   :  { %v1097_v17 = vadd.f32 %v1095_v27, %v1042_v30  ;;  %v1101_v23 = vmul.f32 %v1100_v59, %v1069_v10  ;;  %v1102_v5 = vmul.f32 %v1100_v59, %v1072_v1  ;;  %v1107_v33 = vmul.f32 %v1106_v63, %v1069_v10 }
 0x15a   :  { %v1098_v51 = vadd.f32 %v1096_v16, %v1043_v11  ;;  %v1112_v47 = vstv %s2766_s6  ;;  %v1118_v24 = vstv %s2772_s28  ;;  %v1124_v3 = vstv %s2774_s1 }
 0x15b   :  { %v1103_v52 = vadd.f32 %v1101_v23, %v1048_v45  ;;  %v1104_v25 = vadd.f32 %v1102_v5, %v1049_v7  ;;  %v1108_v61 = vmul.f32 %v1106_v63, %v1072_v1  ;;  %v1130_v42 = vstv %s2776_s30  ;;  %v1061_v45 = vpop.permute.xlu0 %1060 }
 0x15c   :  { %v1109_v50 = vadd.f32 %v1107_v33, %v1054_v36  ;;  %v1136_v46 = vstv %s2783_s0  ;;  %v1142_v34 = vstv %s2785_s23  ;;  %v1070_v26 = vsel %vm1068_vm7, %v1059_v21, %v1065_v31 }
 0x15d   :  { %v1073_v14 = vsel %vm1068_vm7, %v1065_v31, %v1059_v21  ;;  %v1113_v40 = vmul.f32 %v1112_v47, %v1070_v26  ;;  %v1119_v28 = vmul.f32 %v1118_v24, %v1070_v26  ;;  %v1125_v41 = vmul.f32 %v1124_v3, %v1070_v26 }
 0x15e   :  { %v1114_v0 = vmul.f32 %v1112_v47, %v1073_v14  ;;  %v1120_v54 = vmul.f32 %v1118_v24, %v1073_v14  ;;  %v1126_v29 = vmul.f32 %v1124_v3, %v1073_v14  ;;  %v1131_v32 = vmul.f32 %v1130_v42, %v1070_v26 }
 0x15f   :  { %v1110_v8 = vadd.f32 %v1108_v61, %v1055_v35  ;;  %v1115_v55 = vadd.f32 %v1113_v40, %v1079_v48  ;;  %v1121_v9 = vadd.f32 %v1119_v28, %v1085_v20  ;;  %v1132_v30 = vmul.f32 %v1130_v42, %v1073_v14 }
 0x160   :  { %v1116_v11 = vadd.f32 %v1114_v0, %v1080_v53  ;;  %v1122_v12 = vadd.f32 %v1120_v54, %v1086_v4  ;;  %v1127_v56 = vadd.f32 %v1125_v41, %v1091_v22  ;;  %v1128_v37 = vadd.f32 %v1126_v29, %v1092_v13 }
 0x161   :  { %v1133_v57 = vadd.f32 %v1131_v32, %v1097_v17  ;;  %v1137_v39 = vmul.f32 %v1136_v46, %v1070_v26  ;;  %v1138_v38 = vmul.f32 %v1136_v46, %v1073_v14  ;;  %v1143_v43 = vmul.f32 %v1142_v34, %v1070_v26 }
 0x162   :  { %v1134_v7 = vadd.f32 %v1132_v30, %v1098_v51  ;;  %v1148_v2 = vstv %s2789_s26  ;;  %v1154_v36 = vstv %s2794_s14  ;;  %v1160_v58 = vstv %s2796_s20 }
 0x163   :  { %v1139_v59 = vadd.f32 %v1137_v39, %v1103_v52  ;;  %v1140_v63 = vadd.f32 %v1138_v38, %v1104_v25  ;;  %v1144_v10 = vmul.f32 %v1142_v34, %v1073_v14  ;;  %v1166_v1 = vstv %s2799_s22 }
 0x164   :  { %v1145_v18 = vadd.f32 %v1143_v43, %v1109_v50  ;;  %v1172_v60 = vstv %s2805_s29  ;;  %v1178_v49 = vstv %s2807_s2  ;;  %v1071_v62 = vsel %vm1068_vm7, %v1061_v45, %v1067_v44 }
 0x165   :  { %v1074_v15 = vsel %vm1068_vm7, %v1067_v44, %v1061_v45  ;;  %v1149_v6 = vmul.f32 %v1148_v2, %v1071_v62  ;;  %v1155_v27 = vmul.f32 %v1154_v36, %v1071_v62  ;;  %v1161_v35 = vmul.f32 %v1160_v58, %v1071_v62 }
 0x166   :  { %v1150_v48 = vmul.f32 %v1148_v2, %v1074_v15  ;;  %v1156_v20 = vmul.f32 %v1154_v36, %v1074_v15  ;;  %v1162_v16 = vmul.f32 %v1160_v58, %v1074_v15  ;;  %v1167_v53 = vmul.f32 %v1166_v1, %v1071_v62 }
 0x167   :  { %v1151_v4 = vadd.f32 %v1149_v6, %v1115_v55  ;;  %v1157_v22 = vadd.f32 %v1155_v27, %v1121_v9  ;;  %v1163_v13 = vadd.f32 %v1161_v35, %v1127_v56  ;;  %v1168_v17 = vmul.f32 %v1166_v1, %v1074_v15 }
 0x168   :  { %v1152_v23 = vadd.f32 %v1150_v48, %v1116_v11  ;;  %v1158_v5 = vadd.f32 %v1156_v20, %v1122_v12  ;;  %v1164_v33 = vadd.f32 %v1162_v16, %v1128_v37  ;;  %v1169_v31 = vadd.f32 %v1167_v53, %v1133_v57 }
 0x169   :  { %v1170_v21 = vadd.f32 %v1168_v17, %v1134_v7  ;;  %v1173_v51 = vmul.f32 %v1172_v60, %v1071_v62  ;;  %v1174_v47 = vmul.f32 %v1172_v60, %v1074_v15  ;;  %v1179_v19 = vmul.f32 %v1178_v49, %v1071_v62  ;;  %1183 = vst [vmem:[#allocation7] sm:$0xff] %v1151_v4 }
 0x16a   :  { %1186 = vst [vmem:[#allocation7 + $0x10] sm:$0xff] %v1157_v22  ;;  %1189 = vst [vmem:[#allocation7 + $0x20] sm:$0xff] %v1163_v13  ;;  %v1146_v24 = vadd.f32 %v1144_v10, %v1110_v8  ;;  %v1180_v3 = vmul.f32 %v1178_v49, %v1074_v15 }
 0x16b   :  { %1184 = vst [vmem:[#allocation7 + $0x8] sm:$0xff] %v1152_v23  ;;  %1187 = vst [vmem:[#allocation7 + $0x18] sm:$0xff] %v1158_v5  ;;  %v1175_v52 = vadd.f32 %v1173_v51, %v1139_v59  ;;  %v1176_v25 = vadd.f32 %v1174_v47, %v1140_v63  ;;  %v1181_v61 = vadd.f32 %v1179_v19, %v1145_v18 }
 0x16c   :  { %1190 = vst [vmem:[#allocation7 + $0x28] sm:$0xff] %v1164_v33  ;;  %1192 = vst [vmem:[#allocation7 + $0x30] sm:$0xff] %v1169_v31  ;;  %v1182_v42 = vadd.f32 %v1180_v3, %v1146_v24 }
 0x16d   :  { %1193 = vst [vmem:[#allocation7 + $0x38] sm:$0xff] %v1170_v21  ;;  %1195 = vst [vmem:[#allocation7 + $0x40] sm:$0xff] %v1175_v52 }
 0x16e   :  { %1196 = vst [vmem:[#allocation7 + $0x48] sm:$0xff] %v1176_v25  ;;  %1198 = vst [vmem:[#allocation7 + $0x50] sm:$0xff] %v1181_v61 }
 0x16f   :  { %1199 = vst [vmem:[#allocation7 + $0x58] sm:$0xff] %v1182_v42 }
 0x170   :  { %1443 = shalt.err (!%p1440_p3)
}
 0x171   :  { %s3459_s3 = sld [smem:[#allocation112_spill]] }
 0x177   :  { %s1444_s18 = scalar_lea.hbm %s3459_s3, 1536 }
 0x178   :  { %p1445_p4 = scmp.ne.s32.totalorder %s3459_s3, %s1444_s18  ;;  %p1448_p5 = scmp.lt.u32.totalorder %s1444_s18, %s3459_s3 }
 0x17a   :  { %p1450_p6 = pnand %p1448_p5, %p1445_p4 }
 0x17c   :  { %1453 = shalt.err (!%p1450_p6)
}
 0x17d   :  { %s3460_s10 = smov 16   ;;  %s3461_s12 = smov 256  }
 0x17e   :  { %1211 = dma.vmem_to_hbm [thread:$0]  %s1206_s15, 1536, %s3459_s3, [#allocation4], %s3461_s12, %s3461_s12, %s3460_s10  }
 0x17f   :  { %1458 = dma.done.wait [#allocation4], 1536  }
 0x180   :  { %1459 = vsyncadd [#allocation4], 4294965760 }
 0x181   :  { %1215 = vsyncpa [#allocation3], 1 }
 0x182   :  { %1216 = vsyncpa [#allocation4], 1 }
 0x183   :  { %1217 = vsyncpa [#allocation5], 1 }

</bundles_post_ra>
